<compile_context>
chip_gen: v7x
topology: tpu7x:2x2x1
jax: 0.10.0
libtpu: 0.0.40
codegen_flags: <defaults>
</compile_context>

<pallas_src>
import functools
import math

import jax
import jax.numpy as jnp
from jax import lax
from jax.experimental import pallas as pl
from jax.experimental.pallas import tpu as pltpu


# ------------------------------ Pallas kernel --------------------------------
def _fused_gcn_kernel(adj_ref, x_ref, w1_ref, w2_ref, out_ref, h_ref, *,
                      alpha, d_valid, tm):
    """Fused 2-layer GCNII forward.

    grid = (2, N // tm): axis 0 is the layer phase (0 -> gc1, 1 -> gc2),
    axis 1 walks row tiles of the dense adjacency.  Layer-1 activations are
    written to a persistent VMEM scratch (h_ref), so gc2 reads them without
    an HBM round-trip.
    """
    l = pl.program_id(0)
    i = pl.program_id(1)
    row0 = pl.multiple_of(i * tm, tm)

    @pl.when(l == 0)
    def _layer1():
        # hi = adj @ x            (torch.spmm, dense on MXU: bf16 in, f32 acc)
        hi = jnp.dot(adj_ref[...], x_ref[...], preferred_element_type=jnp.float32)
        h0 = x_ref[pl.ds(row0, tm), :].astype(jnp.float32)          # h0 := input
        support = (1.0 - alpha) * hi + alpha * h0                   # f32 VPU math
        # theta*(S@W_ortho) + (1-theta)*S  ==  S @ W_eff   (W_eff precomputed)
        z = jnp.dot(support.astype(jnp.bfloat16), w1_ref[...],
                    preferred_element_type=jnp.float32)
        h = jnp.maximum(jnp.tanh(z), 0.0)            # activation=tanh, then F.relu
        # TODO(synk): F.dropout treated as inference no-op (training RNG not reproduced).
        h_ref[pl.ds(row0, tm), :] = h.astype(h_ref.dtype)

    @pl.when(l == 1)
    def _layer2():
        hi = jnp.dot(adj_ref[...], h_ref[...], preferred_element_type=jnp.float32)
        h0 = h_ref[pl.ds(row0, tm), :].astype(jnp.float32)
        support = (1.0 - alpha) * hi + alpha * h0
        z = jnp.dot(support.astype(jnp.bfloat16), w2_ref[...],
                    preferred_element_type=jnp.float32)
        z = jnp.tanh(z)
        # log_softmax(dim=1) over the *valid* feature columns only
        # (columns >= d_valid are lane-padding and must not enter the sum).
        col = lax.broadcasted_iota(jnp.int32, z.shape, 1)
        valid = col < d_valid
        m = jnp.max(jnp.where(valid, z, -1e30), axis=1, keepdims=True)
        ez = jnp.where(valid, jnp.exp(z - m), 0.0)
        lse = m + jnp.log(jnp.sum(ez, axis=1, keepdims=True))
        out_ref[...] = (z - lse).astype(out_ref.dtype)   # lane-dense f32 store


# ------------------------- parameter setup (glue JAX) ------------------------
def glorot_init(key, input_dim, output_dim):
    init_range = math.sqrt(6.0 / (input_dim + output_dim))
    u = jax.random.uniform(key, (input_dim, output_dim), dtype=jnp.float32)
    return u * 2.0 * init_range - init_range


def ortho_norm(w):
    # W^T W + 1e-4 I -> Cholesky L -> W @ (L^-1)^T   (tiny DxD op; plain JAX glue)
    wtw = w.T @ w + 1e-4 * jnp.eye(w.shape[1], dtype=w.dtype)
    L = jnp.linalg.cholesky(wtw)
    return w @ jnp.linalg.inv(L).T


@functools.partial(jax.jit, static_argnames=("lamda", "alpha"))
def gcn_forward(x, adj, w1, w2, *, lamda=0.5, alpha=0.1):
    n, d = x.shape
    assert w1.shape == (d, d) and w2.shape == (d, d), \
        "GraphConvolution adds [N,out]+[N,in]; only in_features==out_features runs."
    dp = int(pl.cdiv(d, 128) * 128)          # lane-dense (padded) feature dim
    tm = 128 if n % 128 == 0 else n          # adj row tile
    assert n % tm == 0

    theta1 = math.log(lamda / 1.0 + 1.0)     # l = 1 for gc1
    theta2 = math.log(lamda / 2.0 + 1.0)     # l = 2 for gc2
    eye = jnp.eye(d, dtype=jnp.float32)
    w1_eff = theta1 * ortho_norm(w1) + (1.0 - theta1) * eye   # fold residual into W
    w2_eff = theta2 * ortho_norm(w2) + (1.0 - theta2) * eye

    # bf16 operands for the MXU; zero-pad features to the lane width.
    x_p = jnp.pad(x, ((0, 0), (0, dp - d))).astype(jnp.bfloat16)
    w1_p = jnp.pad(w1_eff, ((0, dp - d), (0, dp - d))).astype(jnp.bfloat16)
    w2_p = jnp.pad(w2_eff, ((0, dp - d), (0, dp - d))).astype(jnp.bfloat16)
    adj_b = adj.astype(jnp.bfloat16)

    kernel = functools.partial(_fused_gcn_kernel, alpha=float(alpha),
                               d_valid=d, tm=tm)
    out = pl.pallas_call(
        kernel,
        out_shape=jax.ShapeDtypeStruct((n, dp), jnp.float32),
        grid=(2, n // tm),                                   # (phase, row tile)
        in_specs=[
            pl.BlockSpec((tm, n), lambda l, i: (i, 0)),      # adj rows (streamed)
            pl.BlockSpec((n, dp), lambda l, i: (0, 0)),      # x        (resident)
            pl.BlockSpec((dp, dp), lambda l, i: (0, 0)),     # W1_eff   (resident)
            pl.BlockSpec((dp, dp), lambda l, i: (0, 0)),     # W2_eff   (resident)
        ],
        # Phase 0 never writes the output; map every phase-0 step to block 0 so
        # no stale buffer is flushed to HBM.  Phase 1 writes block i.
        out_specs=pl.BlockSpec((tm, dp), lambda l, i: (l * i, 0)),
        scratch_shapes=[pltpu.VMEM((n, dp), jnp.bfloat16)],  # layer-1 activations
        compiler_params=pltpu.CompilerParams(
            # NOTE: both axes "arbitrary": phase 1 reads the full layer-1
            # scratch written across *all* phase-0 row tiles, so the row axis
            # must not be sharded across TensorCores (v7x megacore).
            dimension_semantics=("arbitrary", "arbitrary"),
            vmem_limit_bytes=32 * 1024 * 1024,               # fits v5e/v6e/v7x
        ),
    )(adj_b, x_p, w1_p, w2_p)
    return out[:, :d]


# ----------------------------------- main ------------------------------------
if __name__ == "__main__":
    N, D = 256, 32          # nodes; nfeat=[32], nhidden=32, nclass=32
    lamda, alpha = 0.5, 0.1

    key = jax.random.PRNGKey(0)
    kx, ka, k1, k2 = jax.random.split(key, 4)
    x = jax.random.normal(kx, (N, D), dtype=jnp.float32)
    a = jax.random.uniform(ka, (N, N), dtype=jnp.float32)
    adj = a / jnp.sum(a, axis=1, keepdims=True)     # row-normalized dense adjacency
    w1 = glorot_init(k1, D, D)
    w2 = glorot_init(k2, D, D)

    out = jax.block_until_ready(gcn_forward(x, adj, w1, w2, lamda=lamda, alpha=alpha))

    # pure-JAX f32 reference (module semantics) for a sanity check
    def ref_gc(adj_, xx, h0, w, theta, al, relu=False, logsm=False):
        hi = adj_ @ xx
        s = (1.0 - al) * hi + al * h0
        o = jnp.tanh(theta * (s @ w) + (1.0 - theta) * s)
        if relu:
            o = jnp.maximum(o, 0.0)
        if logsm:
            o = jax.nn.log_softmax(o, axis=1)
        return o

    w1o, w2o = ortho_norm(w1), ortho_norm(w2)
    h_ref = ref_gc(adj, x, x, w1o, math.log(lamda / 1.0 + 1.0), alpha, relu=True)
    ref = ref_gc(adj, h_ref, h_ref, w2o, math.log(lamda / 2.0 + 1.0), alpha, logsm=True)

    assert out.shape == (N, D)
    # tolerance reflects bf16 MXU operands (f32 accumulation / f32 elementwise)
    err = float(jnp.max(jnp.abs(out - ref)))
    assert bool(jnp.allclose(out, ref, atol=2e-2, rtol=2e-2)), err
    print("KERNEL_OK")
</pallas_src>

<mosaic_0001>
module attributes {stable_mosaic.version = 11 : i64} {
  func.func @_fused_gcn_kernel(%arg0: i32, %arg1: i32, %arg2: memref<128x256xbf16, #tpu.memory_space<vmem>>, %arg3: memref<256x128xbf16, #tpu.memory_space<vmem>>, %arg4: memref<128x128xbf16, #tpu.memory_space<vmem>>, %arg5: memref<128x128xbf16, #tpu.memory_space<vmem>>, %arg6: memref<128x128xf32, #tpu.memory_space<vmem>>, %arg7: memref<256x128xbf16, #tpu.memory_space<vmem>>) attributes {dimension_semantics = [#tpu.dimension_semantics<arbitrary>, #tpu.dimension_semantics<arbitrary>], iteration_bounds = array<i64: 2, 2>, scalar_prefetch = 0 : i64, scratch_operands = 1 : i64, tpu.core_type = #tpu.core_type<tc>, window_params = [{transform_indices = @transform_0, window_bounds = array<i64: 128, 256>}, {pipeline_mode = #tpu.pipeline_mode<synchronous>, transform_indices = @transform_1, window_bounds = array<i64: 256, 128>}, {pipeline_mode = #tpu.pipeline_mode<synchronous>, transform_indices = @transform_2, window_bounds = array<i64: 128, 128>}, {pipeline_mode = #tpu.pipeline_mode<synchronous>, transform_indices = @transform_3, window_bounds = array<i64: 128, 128>}, {transform_indices = @transform_4, window_bounds = array<i64: 128, 128>}]} {
    %c128_i32 = arith.constant 128 : i32
    %0 = arith.muli %arg1, %c128_i32 : i32
    %1 = tpu.assume_multiple %0, 128 : i32
    %c0_i32 = arith.constant 0 : i32
    %2 = arith.cmpi eq, %arg0, %c0_i32 : i32
    %3 = arith.extui %2 : i1 to i32
    %c0_i32_0 = arith.constant 0 : i32
    %4 = arith.cmpi ne, %3, %c0_i32_0 : i32
    scf.if %4 {
      %c0 = arith.constant 0 : index
      %c0_2 = arith.constant 0 : index
      %8 = vector.load %arg2[%c0, %c0_2] : memref<128x256xbf16, #tpu.memory_space<vmem>>, vector<128x256xbf16>
      %c0_3 = arith.constant 0 : index
      %c0_4 = arith.constant 0 : index
      %9 = vector.load %arg3[%c0_3, %c0_4] : memref<256x128xbf16, #tpu.memory_space<vmem>>, vector<256x128xbf16>
      %cst = arith.constant dense<0.000000e+00> : vector<128x128xf32>
      %10 = tpu.matmul %8, %9, %cst {dimension_numbers = #tpu.dot_dimension_numbers<[1], [0], [0], [1], [0, 0, 1, 1], [], []>} : vector<128x256xbf16>, vector<256x128xbf16>, vector<128x128xf32> -> vector<128x128xf32>
      %11 = arith.index_cast %1 : i32 to index
      %c0_5 = arith.constant 0 : index
      %12 = vector.load %arg3[%11, %c0_5] : memref<256x128xbf16, #tpu.memory_space<vmem>>, vector<128x128xbf16>
      %13 = arith.extf %12 : vector<128x128xbf16> to vector<128x128xf32>
      %cst_6 = arith.constant 0.899999976 : f32
      %14 = vector.broadcast %cst_6 : f32 to vector<128x128xf32>
      %15 = arith.mulf %14, %10 : vector<128x128xf32>
      %cst_7 = arith.constant 1.000000e-01 : f32
      %16 = vector.broadcast %cst_7 : f32 to vector<128x128xf32>
      %17 = arith.mulf %16, %13 : vector<128x128xf32>
      %18 = arith.addf %15, %17 : vector<128x128xf32>
      %19 = arith.truncf %18 : vector<128x128xf32> to vector<128x128xbf16>
      %c0_8 = arith.constant 0 : index
      %c0_9 = arith.constant 0 : index
      %20 = vector.load %arg4[%c0_8, %c0_9] : memref<128x128xbf16, #tpu.memory_space<vmem>>, vector<128x128xbf16>
      %cst_10 = arith.constant dense<0.000000e+00> : vector<128x128xf32>
      %21 = tpu.matmul %19, %20, %cst_10 {dimension_numbers = #tpu.dot_dimension_numbers<[1], [0], [0], [1], [0, 0, 1, 1], [], []>} : vector<128x128xbf16>, vector<128x128xbf16>, vector<128x128xf32> -> vector<128x128xf32>
      %22 = math.tanh %21 : vector<128x128xf32>
      %cst_11 = arith.constant 0.000000e+00 : f32
      %23 = vector.broadcast %cst_11 : f32 to vector<128x128xf32>
      %24 = arith.maximumf %22, %23 : vector<128x128xf32>
      %25 = arith.truncf %24 : vector<128x128xf32> to vector<128x128xbf16>
      %26 = arith.index_cast %1 : i32 to index
      %c0_12 = arith.constant 0 : index
      %27 = vector.load %arg7[%26, %c0_12] : memref<256x128xbf16, #tpu.memory_space<vmem>>, vector<128x128xbf16>
      tpu.vector_store %arg7[%26, %c0_12], %25 {strides = array<i32>} : memref<256x128xbf16, #tpu.memory_space<vmem>>, vector<128x128xbf16>,
    } else {
    }
    %c1_i32 = arith.constant 1 : i32
    %5 = arith.cmpi eq, %arg0, %c1_i32 : i32
    %6 = arith.extui %5 : i1 to i32
    %c0_i32_1 = arith.constant 0 : i32
    %7 = arith.cmpi ne, %6, %c0_i32_1 : i32
    scf.if %7 {
      %c0 = arith.constant 0 : index
      %c0_2 = arith.constant 0 : index
      %8 = vector.load %arg2[%c0, %c0_2] : memref<128x256xbf16, #tpu.memory_space<vmem>>, vector<128x256xbf16>
      %c0_3 = arith.constant 0 : index
      %c0_4 = arith.constant 0 : index
      %9 = vector.load %arg7[%c0_3, %c0_4] : memref<256x128xbf16, #tpu.memory_space<vmem>>, vector<256x128xbf16>
      %cst = arith.constant dense<0.000000e+00> : vector<128x128xf32>
      %10 = tpu.matmul %8, %9, %cst {dimension_numbers = #tpu.dot_dimension_numbers<[1], [0], [0], [1], [0, 0, 1, 1], [], []>} : vector<128x256xbf16>, vector<256x128xbf16>, vector<128x128xf32> -> vector<128x128xf32>
      %11 = arith.index_cast %1 : i32 to index
      %c0_5 = arith.constant 0 : index
      %12 = vector.load %arg7[%11, %c0_5] : memref<256x128xbf16, #tpu.memory_space<vmem>>, vector<128x128xbf16>
      %13 = arith.extf %12 : vector<128x128xbf16> to vector<128x128xf32>
      %cst_6 = arith.constant 0.899999976 : f32
      %14 = vector.broadcast %cst_6 : f32 to vector<128x128xf32>
      %15 = arith.mulf %14, %10 : vector<128x128xf32>
      %cst_7 = arith.constant 1.000000e-01 : f32
      %16 = vector.broadcast %cst_7 : f32 to vector<128x128xf32>
      %17 = arith.mulf %16, %13 : vector<128x128xf32>
      %18 = arith.addf %15, %17 : vector<128x128xf32>
      %19 = arith.truncf %18 : vector<128x128xf32> to vector<128x128xbf16>
      %c0_8 = arith.constant 0 : index
      %c0_9 = arith.constant 0 : index
      %20 = vector.load %arg5[%c0_8, %c0_9] : memref<128x128xbf16, #tpu.memory_space<vmem>>, vector<128x128xbf16>
      %cst_10 = arith.constant dense<0.000000e+00> : vector<128x128xf32>
      %21 = tpu.matmul %19, %20, %cst_10 {dimension_numbers = #tpu.dot_dimension_numbers<[1], [0], [0], [1], [0, 0, 1, 1], [], []>} : vector<128x128xbf16>, vector<128x128xbf16>, vector<128x128xf32> -> vector<128x128xf32>
      %22 = math.tanh %21 : vector<128x128xf32>
      %23 = tpu.iota {dimensions = array<i32: 1>} : vector<128x128xi32>
      %c32_i32 = arith.constant 32 : i32
      %24 = vector.broadcast %c32_i32 : i32 to vector<128x128xi32>
      %25 = arith.cmpi slt, %23, %24 : vector<128x128xi32>
      %cst_11 = arith.constant -1.000000e+30 : f32
      %26 = vector.broadcast %cst_11 : f32 to vector<128x128xf32>
      %27 = arith.select %25, %22, %26 : vector<128x128xi1>, vector<128x128xf32>
      %cst_12 = arith.constant dense<0xFF800000> : vector<128xf32>
      %28 = vector.multi_reduction <maximumf>, %27, %cst_12 [1] : vector<128x128xf32> to vector<128xf32>
      %29 = vector.shape_cast %28 : vector<128xf32> to vector<128x1xf32>
      %30 = vector.broadcast %29 : vector<128x1xf32> to vector<128x128xf32>
      %31 = arith.subf %22, %30 : vector<128x128xf32>
      %32 = math.exp %31 : vector<128x128xf32>
      %cst_13 = arith.constant 0.000000e+00 : f32
      %33 = vector.broadcast %cst_13 : f32 to vector<128x128xf32>
      %34 = arith.select %25, %32, %33 : vector<128x128xi1>, vector<128x128xf32>
      %cst_14 = arith.constant dense<0.000000e+00> : vector<128xf32>
      %35 = vector.multi_reduction <add>, %34, %cst_14 [1] : vector<128x128xf32> to vector<128xf32>
      %36 = vector.shape_cast %35 : vector<128xf32> to vector<128x1xf32>
      %37 = math.log %36 : vector<128x1xf32>
      %38 = arith.addf %29, %37 : vector<128x1xf32>
      %39 = vector.broadcast %38 : vector<128x1xf32> to vector<128x128xf32>
      %40 = arith.subf %22, %39 : vector<128x128xf32>
      %c0_15 = arith.constant 0 : index
      %c0_16 = arith.constant 0 : index
      %41 = vector.load %arg6[%c0_15, %c0_16] : memref<128x128xf32, #tpu.memory_space<vmem>>, vector<128x128xf32>
      tpu.vector_store %arg6[%c0_15, %c0_16], %40 {strides = array<i32>} : memref<128x128xf32, #tpu.memory_space<vmem>>, vector<128x128xf32>,
    } else {
    }
    return
  }
  func.func @transform_0(%arg0: i32, %arg1: i32) -> (i32, i32) {
    %c0_i32 = arith.constant 0 : i32
    %c0_i32_0 = arith.constant 0 : i32
    return %arg1, %c0_i32 : i32, i32
  }
  func.func @transform_1(%arg0: i32, %arg1: i32) -> (i32, i32) {
    %c0_i32 = arith.constant 0 : i32
    %c0_i32_0 = arith.constant 0 : i32
    %c0_i32_1 = arith.constant 0 : i32
    return %c0_i32, %c0_i32_0 : i32, i32
  }
  func.func @transform_2(%arg0: i32, %arg1: i32) -> (i32, i32) {
    %c0_i32 = arith.constant 0 : i32
    %c0_i32_0 = arith.constant 0 : i32
    %c0_i32_1 = arith.constant 0 : i32
    return %c0_i32, %c0_i32_0 : i32, i32
  }
  func.func @transform_3(%arg0: i32, %arg1: i32) -> (i32, i32) {
    %c0_i32 = arith.constant 0 : i32
    %c0_i32_0 = arith.constant 0 : i32
    %c0_i32_1 = arith.constant 0 : i32
    return %c0_i32, %c0_i32_0 : i32, i32
  }
  func.func @transform_4(%arg0: i32, %arg1: i32) -> (i32, i32) {
    %0 = arith.muli %arg0, %arg1 : i32
    %c0_i32 = arith.constant 0 : i32
    %c0_i32_0 = arith.constant 0 : i32
    return %0, %c0_i32 : i32, i32
  }
}

</mosaic_0001>

<bundles_post_ra>
// kernel: custom-call.21
= control target key start
LH: loop header
LB: loop body
LE: loop exit
PB: predicated region body
PF: predicated region fallthrough
CT: control target
= control target key end

     0   :  { %v1561_v0 = vmov 0.0   ;;  %vm53_vm0 = vcmask 7168   ;;  %vm110_vm1 = vcmask 15368   ;;  %vm127_vm2 = vcmask 1047553   ;;  %s1900_s0 = inlined_call_operand.vmem [shape: f32[32,32], index: 0, kind: input, shape index: {}]   ;;  %s1901_s1 = inlined_call_operand.vmem [shape: f32[32,32], index: 1, kind: output, shape index: {}]  }
   0x1   :  { %46 = vst [vmem:[#allocation1] sm:$0xff] %v1561_v0  ;;  %v1575_v4 = vld [vmem:[%s1900_s0] sm:$0xff]  ;;  %v1581_v5 = vld [vmem:[%s1900_s0 + $0x8] sm:$0xff]  ;;  %v1601_v22 = vld [vmem:[%s1900_s0 + $0x10] sm:$0xff]  ;;  %vm171_vm4 = vcmask 23568   ;;  %vm188_vm5 = vcmask 1047554  }
   0x2   :  { %36 = vst [vmem:[#allocation0] sm:$0xff] %v1575_v4  ;;  %38 = vst [vmem:[#allocation0 + $0x8] sm:$0xff] %v1581_v5  ;;  %v1626_v46 = vld [vmem:[%s1900_s0 + $0x18] sm:$0xff]  ;;  %vm232_vm7 = vcmask 31768   ;;  %vm249_vm8 = vcmask 1047555   ;;  %vm293_vm10 = vcmask 39968  }
   0x3   :  { %40 = vst [vmem:[#allocation0 + $0x10] sm:$0xff] %v1601_v22  ;;  %vm128_vm3 = vmand %vm110_vm1, %vm127_vm2  ;;  %vm310_vm11 = vcmask 1047556   ;;  %vm354_vm13 = vcmask 48168   ;;  %vm371_vm14 = vcmask 1047557  }
   0x4   :  { %42 = vst [vmem:[#allocation0 + $0x18] sm:$0xff] %v1626_v46  ;;  %vm189_vm6 = vmand %vm171_vm4, %vm188_vm5 }
   0x5   :  { %vm250_vm9 = vmand %vm232_vm7, %vm249_vm8 }
   0x6   :  { %vm311_vm12 = vmand %vm293_vm10, %vm310_vm11 }
   0x7   :  { %vm372_vm15 = vmand %vm354_vm13, %vm371_vm14 }
   0x8   :  { %v54_v1 = vld [vmem:[#allocation1] ss:$0 sm:$0xff] }
   0x9   :  { %v56_v2 = vmul.f32 %v54_v1, %v54_v1  ;;  %v75_v3 = vmul.f32 0.0, %v54_v1  ;;  %v55_v6 = vld [vmem:[#allocation0] ss:$0 sm:$0xff]  ;;  %v114_v23 = vld [vmem:[#allocation0 + $0x1] ss:$0 sm:$0xff] }
   0xa   :  { %v175_v47 = vld [vmem:[#allocation0 + $0x2] ss:$0 sm:$0xff] }
   0xb   :  { %57 = vadd.xlane.f32.xlu0 %v56_v2  ;;  %76 = vadd.xlane.f32.xlu1 %v75_v3 }
   0xf   :  { %64 = vadd.xlane.f32.xlu0 %v75_v3 }
  0x98   :  { %v58_v7 = vpop.xlane.xlu0 %57  ;;  %v77_v13 = vpop.xlane.xlu1 %76 }
  0x99   :  { %v59_v8 = vsub.f32 %v55_v6, %v58_v7  ;;  %v78_v15 = vsub.f32 %v1581_v5, %v77_v13 }
  0x9b   :  { %1496 = vrsqrt.f32 %v59_v8 }
  0x9c   :  { %v65_v9 = vpop.xlane.xlu0 %64 }
  0x9d   :  { %v66_v10 = vsub.f32 %v1575_v4, %v65_v9 }
  0xa5   :  { %v1585_v11 = vpop.eup %1496 }
  0xa6   :  { %v67_v12 = vmul.f32 %v1585_v11, %v66_v10  ;;  %v79_v16 = vmul.f32 %v1585_v11, %v78_v15 }
  0xa8   :  { %v68_v14 = vsel %vm53_vm0, %v67_v12, 0.0  ;;  %v80_v17 = vsel %vm53_vm0, %v79_v16, 0.0 }
  0xa9   :  { %70 = vst [vmem:[#allocation1] sm:$0xff] %v68_v14 }
  0xb0   :  { %v1592_v18 = vld [vmem:[#allocation1 + $0x1] ss:$0 sm:$0xff] }
  0xb1   :  { %v122_v19 = vmul.f32 %v1592_v18, %v68_v14  ;;  %v115_v20 = vmul.f32 %v1592_v18, %v1592_v18  ;;  %v136_v21 = vmul.f32 %v1592_v18, %v80_v17 }
  0xb3   :  { %123 = vadd.xlane.f32.xlu0 %v122_v19  ;;  %116 = vadd.xlane.f32.xlu1 %v115_v20 }
  0xb7   :  { %137 = vadd.xlane.f32.xlu0 %v136_v21  ;;  %89 = vadd.xlane.f32.xlu1 %v75_v3 }
 0x140   :  { %v117_v24 = vpop.xlane.xlu1 %116  ;;  %v124_v26 = vpop.xlane.xlu0 %123 }
 0x141   :  { %v118_v25 = vsub.f32 %v114_v23, %v117_v24  ;;  %v125_v27 = vsub.f32 %v1575_v4, %v124_v26 }
 0x143   :  { %1498 = vrsqrt.f32 %v118_v25 }
 0x144   :  { %v90_v29 = vpop.xlane.xlu1 %89  ;;  %v138_v35 = vpop.xlane.xlu0 %137 }
 0x145   :  { %v91_v32 = vsub.f32 %v1601_v22, %v90_v29  ;;  %v139_v36 = vsub.f32 %v1581_v5, %v138_v35 }
 0x147   :  { %v92_v34 = vmul.f32 %v1585_v11, %v91_v32 }
 0x149   :  { %v93_v37 = vsel %vm53_vm0, %v92_v34, 0.0 }
 0x14a   :  { %v149_v43 = vmul.f32 %v1592_v18, %v93_v37 }
 0x14d   :  { %v1605_v28 = vpop.eup %1498 }
 0x14e   :  { %v126_v30 = vmul.f32 %v1605_v28, %v125_v27  ;;  %v140_v38 = vmul.f32 %v1605_v28, %v139_v36 }
 0x150   :  { %v129_v31 = vsel %vm128_vm3, %v126_v30, 0.0  ;;  %v141_v42 = vsel %vm110_vm1, %v140_v38, 0.0 }
 0x151   :  { %v130_v33 = vadd.f32 %v129_v31, %v68_v14  ;;  %v142_v44 = vadd.f32 %v141_v42, %v80_v17  ;;  %v236_v14 = vld [vmem:[#allocation0 + $0x3] ss:$0 sm:$0xff] }
 0x153   :  { %131 = vst [vmem:[#allocation1] sm:$0xff] %v130_v33 }
 0x15a   :  { %v1615_v39 = vld [vmem:[#allocation1 + $0x2] ss:$0 sm:$0xff] }
 0x15b   :  { %v183_v40 = vmul.f32 %v1615_v39, %v130_v33  ;;  %v176_v41 = vmul.f32 %v1615_v39, %v1615_v39  ;;  %v197_v45 = vmul.f32 %v1615_v39, %v142_v44 }
 0x15d   :  { %184 = vadd.xlane.f32.xlu0 %v183_v40  ;;  %177 = vadd.xlane.f32.xlu1 %v176_v41 }
 0x161   :  { %102 = vadd.xlane.f32.xlu1 %v75_v3  ;;  %150 = vadd.xlane.f32.xlu0 %v149_v43 }
 0x165   :  { %198 = vadd.xlane.f32.xlu1 %v197_v45 }
 0x1ea   :  { %v178_v48 = vpop.xlane.xlu1 %177  ;;  %v185_v50 = vpop.xlane.xlu0 %184 }
 0x1eb   :  { %v179_v49 = vsub.f32 %v175_v47, %v178_v48  ;;  %v186_v51 = vsub.f32 %v1575_v4, %v185_v50  ;;  %v297_v47 = vld [vmem:[#allocation0 + $0x4] ss:$0 sm:$0xff] }
 0x1ed   :  { %1500 = vrsqrt.f32 %v179_v49 }
 0x1ee   :  { %v151_v53 = vpop.xlane.xlu0 %150  ;;  %v103_v54 = vpop.xlane.xlu1 %102 }
 0x1ef   :  { %v152_v56 = vsub.f32 %v1601_v22, %v151_v53  ;;  %v104_v57 = vsub.f32 %v1626_v46, %v103_v54 }
 0x1f1   :  { %v153_v60 = vmul.f32 %v1605_v28, %v152_v56  ;;  %v105_v61 = vmul.f32 %v1585_v11, %v104_v57 }
 0x1f2   :  { %v199_v62 = vpop.xlane.xlu1 %198 }
 0x1f3   :  { %v154_v63 = vsel %vm110_vm1, %v153_v60, 0.0  ;;  %v106_v0 = vsel %vm53_vm0, %v105_v61, 0.0  ;;  %v200_v1 = vsub.f32 %v1581_v5, %v199_v62  ;;  %vm415_vm0 = vcmask 56368  }
 0x1f4   :  { %v155_v6 = vadd.f32 %v154_v63, %v93_v37  ;;  %v162_v11 = vmul.f32 %v1592_v18, %v106_v0 }
 0x1f6   :  { %v210_v10 = vmul.f32 %v1615_v39, %v155_v6 }
 0x1f7   :  { %v1630_v52 = vpop.eup %1500 }
 0x1f8   :  { %v187_v55 = vmul.f32 %v1630_v52, %v186_v51  ;;  %v201_v2 = vmul.f32 %v1630_v52, %v200_v1 }
 0x1fa   :  { %v190_v58 = vsel %vm189_vm6, %v187_v55, 0.0  ;;  %v202_v9 = vsel %vm171_vm4, %v201_v2, 0.0  ;;  %vm537_vm6 = vcmask 72768  }
 0x1fb   :  { %v191_v59 = vadd.f32 %v190_v58, %v130_v33  ;;  %v203_v12 = vadd.f32 %v202_v9, %v142_v44 }
 0x1fd   :  { %192 = vst [vmem:[#allocation1] sm:$0xff] %v191_v59 }
 0x204   :  { %v1643_v3 = vld [vmem:[#allocation1 + $0x3] ss:$0 sm:$0xff] }
 0x205   :  { %v244_v7 = vmul.f32 %v1643_v3, %v191_v59  ;;  %v237_v8 = vmul.f32 %v1643_v3, %v1643_v3  ;;  %v258_v13 = vmul.f32 %v1643_v3, %v203_v12 }
 0x207   :  { %245 = vadd.xlane.f32.xlu1 %v244_v7  ;;  %238 = vadd.xlane.f32.xlu0 %v237_v8 }
 0x20b   :  { %211 = vadd.xlane.f32.xlu1 %v210_v10  ;;  %163 = vadd.xlane.f32.xlu0 %v162_v11 }
 0x20f   :  { %259 = vadd.xlane.f32.xlu0 %v258_v13 }
 0x294   :  { %v239_v15 = vpop.xlane.xlu0 %238  ;;  %v246_v17 = vpop.xlane.xlu1 %245 }
 0x295   :  { %v240_v16 = vsub.f32 %v236_v14, %v239_v15  ;;  %v247_v19 = vsub.f32 %v1575_v4, %v246_v17  ;;  %v358_v15 = vld [vmem:[#allocation0 + $0x5] ss:$0 sm:$0xff] }
 0x297   :  { %1502 = vrsqrt.f32 %v240_v16 }
 0x298   :  { %v164_v18 = vpop.xlane.xlu0 %163  ;;  %v212_v21 = vpop.xlane.xlu1 %211 }
 0x299   :  { %v165_v25 = vsub.f32 %v1626_v46, %v164_v18  ;;  %v213_v26 = vsub.f32 %v1601_v22, %v212_v21 }
 0x29b   :  { %v166_v29 = vmul.f32 %v1605_v28, %v165_v25  ;;  %v214_v30 = vmul.f32 %v1630_v52, %v213_v26 }
 0x29c   :  { %v260_v31 = vpop.xlane.xlu0 %259 }
 0x29d   :  { %v167_v32 = vsel %vm110_vm1, %v166_v29, 0.0  ;;  %v215_v33 = vsel %vm171_vm4, %v214_v30, 0.0  ;;  %v261_v34 = vsub.f32 %v1581_v5, %v260_v31  ;;  %vm432_vm1 = vcmask 1047558  }
 0x29e   :  { %v168_v37 = vadd.f32 %v167_v32, %v106_v0  ;;  %v216_v38 = vadd.f32 %v215_v33, %v155_v6  ;;  %vm433_vm3 = vmand %vm415_vm0, %vm432_vm1 }
 0x2a0   :  { %v223_v42 = vmul.f32 %v1615_v39, %v168_v37  ;;  %v271_v43 = vmul.f32 %v1643_v3, %v216_v38 }
 0x2a1   :  { %v1653_v20 = vpop.eup %1502 }
 0x2a2   :  { %v248_v23 = vmul.f32 %v1653_v20, %v247_v19  ;;  %v262_v35 = vmul.f32 %v1653_v20, %v261_v34 }
 0x2a4   :  { %v251_v24 = vsel %vm250_vm9, %v248_v23, 0.0  ;;  %v263_v41 = vsel %vm232_vm7, %v262_v35, 0.0 }
 0x2a5   :  { %v252_v27 = vadd.f32 %v251_v24, %v191_v59  ;;  %v264_v44 = vadd.f32 %v263_v41, %v203_v12 }
 0x2a7   :  { %253 = vst [vmem:[#allocation1] sm:$0xff] %v252_v27 }
 0x2ae   :  { %v1666_v36 = vld [vmem:[#allocation1 + $0x4] ss:$0 sm:$0xff] }
 0x2af   :  { %v305_v40 = vmul.f32 %v1666_v36, %v252_v27  ;;  %v298_v28 = vmul.f32 %v1666_v36, %v1666_v36  ;;  %v319_v45 = vmul.f32 %v1666_v36, %v264_v44 }
 0x2b1   :  { %306 = vadd.xlane.f32.xlu0 %v305_v40  ;;  %299 = vadd.xlane.f32.xlu1 %v298_v28 }
 0x2b5   :  { %224 = vadd.xlane.f32.xlu1 %v223_v42  ;;  %272 = vadd.xlane.f32.xlu0 %v271_v43 }
 0x2b9   :  { %320 = vadd.xlane.f32.xlu1 %v319_v45 }
 0x33e   :  { %v300_v48 = vpop.xlane.xlu1 %299  ;;  %v307_v50 = vpop.xlane.xlu0 %306 }
 0x33f   :  { %v301_v49 = vsub.f32 %v297_v47, %v300_v48  ;;  %v308_v51 = vsub.f32 %v1575_v4, %v307_v50  ;;  %v419_v48 = vld [vmem:[#allocation0 + $0x6] ss:$0 sm:$0xff] }
 0x341   :  { %1504 = vrsqrt.f32 %v301_v49 }
 0x342   :  { %v273_v39 = vpop.xlane.xlu0 %272  ;;  %v225_v54 = vpop.xlane.xlu1 %224 }
 0x343   :  { %v274_v56 = vsub.f32 %v1601_v22, %v273_v39  ;;  %v226_v57 = vsub.f32 %v1626_v46, %v225_v54 }
 0x345   :  { %v275_v60 = vmul.f32 %v1653_v20, %v274_v56  ;;  %v227_v61 = vmul.f32 %v1630_v52, %v226_v57 }
 0x346   :  { %v321_v62 = vpop.xlane.xlu1 %320 }
 0x347   :  { %v276_v63 = vsel %vm232_vm7, %v275_v60, 0.0  ;;  %v228_v0 = vsel %vm171_vm4, %v227_v61, 0.0  ;;  %v322_v1 = vsub.f32 %v1581_v5, %v321_v62  ;;  %vm476_vm4 = vcmask 64568  }
 0x348   :  { %v277_v7 = vadd.f32 %v276_v63, %v216_v38  ;;  %v229_v8 = vadd.f32 %v228_v0, %v168_v37 }
 0x34a   :  { %v332_v11 = vmul.f32 %v1666_v36, %v277_v7  ;;  %v284_v12 = vmul.f32 %v1643_v3, %v229_v8 }
 0x34b   :  { %v1676_v53 = vpop.eup %1504 }
 0x34c   :  { %v309_v55 = vmul.f32 %v1676_v53, %v308_v51  ;;  %v323_v2 = vmul.f32 %v1676_v53, %v322_v1 }
 0x34e   :  { %v312_v58 = vsel %vm311_vm12, %v309_v55, 0.0  ;;  %v324_v52 = vsel %vm293_vm10, %v323_v2, 0.0 }
 0x34f   :  { %v313_v59 = vadd.f32 %v312_v58, %v252_v27  ;;  %v325_v13 = vadd.f32 %v324_v52, %v264_v44 }
 0x351   :  { %314 = vst [vmem:[#allocation1] sm:$0xff] %v313_v59 }
 0x358   :  { %v1689_v6 = vld [vmem:[#allocation1 + $0x5] ss:$0 sm:$0xff] }
 0x359   :  { %v366_v9 = vmul.f32 %v1689_v6, %v313_v59  ;;  %v359_v10 = vmul.f32 %v1689_v6, %v1689_v6  ;;  %v380_v14 = vmul.f32 %v1689_v6, %v325_v13 }
 0x35b   :  { %367 = vadd.xlane.f32.xlu1 %v366_v9  ;;  %360 = vadd.xlane.f32.xlu0 %v359_v10 }
 0x35f   :  { %333 = vadd.xlane.f32.xlu1 %v332_v11  ;;  %285 = vadd.xlane.f32.xlu0 %v284_v12 }
 0x363   :  { %381 = vadd.xlane.f32.xlu0 %v380_v14 }
 0x3e8   :  { %v361_v16 = vpop.xlane.xlu0 %360  ;;  %v368_v19 = vpop.xlane.xlu1 %367 }
 0x3e9   :  { %v362_v17 = vsub.f32 %v358_v15, %v361_v16  ;;  %v369_v18 = vsub.f32 %v1575_v4, %v368_v19 }
 0x3eb   :  { %1506 = vrsqrt.f32 %v362_v17 }
 0x3ec   :  { %v286_v3 = vpop.xlane.xlu0 %285  ;;  %v334_v23 = vpop.xlane.xlu1 %333 }
 0x3ed   :  { %v287_v26 = vsub.f32 %v1626_v46, %v286_v3  ;;  %v335_v27 = vsub.f32 %v1601_v22, %v334_v23 }
 0x3ef   :  { %v288_v30 = vmul.f32 %v1653_v20, %v287_v26  ;;  %v336_v31 = vmul.f32 %v1676_v53, %v335_v27 }
 0x3f0   :  { %v382_v32 = vpop.xlane.xlu0 %381 }
 0x3f1   :  { %v289_v33 = vsel %vm232_vm7, %v288_v30, 0.0  ;;  %v337_v34 = vsel %vm293_vm10, %v336_v31, 0.0  ;;  %v383_v35 = vsub.f32 %v1581_v5, %v382_v32  ;;  %vm586_vm7 = vcmask 80968  }
 0x3f2   :  { %v290_v40 = vadd.f32 %v289_v33, %v229_v8  ;;  %v338_v28 = vadd.f32 %v337_v34, %v277_v7  ;;  %vm606_vm9 = vmand %vm586_vm7, %vm127_vm2 }
 0x3f4   :  { %v345_v43 = vmul.f32 %v1666_v36, %v290_v40  ;;  %v393_v44 = vmul.f32 %v1689_v6, %v338_v28 }
 0x3f5   :  { %v1699_v21 = vpop.eup %1506 }
 0x3f6   :  { %v370_v24 = vmul.f32 %v1699_v21, %v369_v18  ;;  %v384_v37 = vmul.f32 %v1699_v21, %v383_v35  ;;  %v480_v18 = vld [vmem:[#allocation0 + $0x7] ss:$0 sm:$0xff] }
 0x3f8   :  { %v373_v25 = vsel %vm372_vm15, %v370_v24, 0.0  ;;  %v385_v20 = vsel %vm354_vm13, %v384_v37, 0.0 }
 0x3f9   :  { %v374_v29 = vadd.f32 %v373_v25, %v313_v59  ;;  %v386_v45 = vadd.f32 %v385_v20, %v325_v13 }
 0x3fb   :  { %375 = vst [vmem:[#allocation1] sm:$0xff] %v374_v29 }
 0x402   :  { %v417_v38 = vld [vmem:[#allocation1 + $0x6] ss:$0 sm:$0xff] }
 0x403   :  { %v427_v41 = vmul.f32 %v417_v38, %v374_v29  ;;  %v420_v42 = vmul.f32 %v417_v38, %v417_v38  ;;  %v441_v47 = vmul.f32 %v417_v38, %v386_v45 }
 0x405   :  { %428 = vadd.xlane.f32.xlu0 %v427_v41  ;;  %421 = vadd.xlane.f32.xlu1 %v420_v42 }
 0x409   :  { %346 = vadd.xlane.f32.xlu1 %v345_v43  ;;  %394 = vadd.xlane.f32.xlu0 %v393_v44 }
 0x40d   :  { %442 = vadd.xlane.f32.xlu1 %v441_v47 }
 0x492   :  { %v422_v49 = vpop.xlane.xlu1 %421  ;;  %v429_v54 = vpop.xlane.xlu0 %428 }
 0x493   :  { %v423_v50 = vsub.f32 %v419_v48, %v422_v49  ;;  %v430_v57 = vsub.f32 %v1575_v4, %v429_v54 }
 0x495   :  { %1508 = vrsqrt.f32 %v423_v50 }
 0x496   :  { %v347_v51 = vpop.xlane.xlu1 %346  ;;  %v395_v60 = vpop.xlane.xlu0 %394 }
 0x497   :  { %v348_v39 = vsub.f32 %v1626_v46, %v347_v51  ;;  %v396_v63 = vsub.f32 %v1601_v22, %v395_v60 }
 0x499   :  { %v349_v55 = vmul.f32 %v1676_v53, %v348_v39  ;;  %v397_v4 = vmul.f32 %v1699_v21, %v396_v63  ;;  %v541_v39 = vld [vmem:[#allocation0 + $0x8] ss:$0 sm:$0xff] }
 0x49a   :  { %v443_v61 = vpop.xlane.xlu1 %442 }
 0x49b   :  { %v350_v56 = vsel %vm293_vm10, %v349_v55, 0.0  ;;  %v444_v0 = vsub.f32 %v1581_v5, %v443_v61  ;;  %v398_v7 = vsel %vm354_vm13, %v397_v4, 0.0  ;;  %vm637_vm10 = vcmask 89168  }
 0x49c   :  { %v351_v36 = vadd.f32 %v350_v56, %v290_v40  ;;  %v399_v10 = vadd.f32 %v398_v7, %v338_v28  ;;  %vm657_vm12 = vmand %vm637_vm10, %vm188_vm5 }
 0x49e   :  { %v406_v58 = vmul.f32 %v1689_v6, %v351_v36  ;;  %v454_v12 = vmul.f32 %v417_v38, %v399_v10 }
 0x49f   :  { %v1509_v59 = vpop.eup %1508 }
 0x4a0   :  { %v431_v62 = vmul.f32 %v1509_v59, %v430_v57  ;;  %407 = vadd.xlane.f32.xlu1 %v406_v58  ;;  %v445_v2 = vmul.f32 %v1509_v59, %v444_v0 }
 0x4a2   :  { %v434_v53 = vsel %vm433_vm3, %v431_v62, 0.0  ;;  %v446_v6 = vsel %vm415_vm0, %v445_v2, 0.0 }
 0x4a3   :  { %v435_v1 = vadd.f32 %v434_v53, %v374_v29  ;;  %v447_v8 = vadd.f32 %v446_v6, %v386_v45 }
 0x4a5   :  { %436 = vst [vmem:[#allocation1] sm:$0xff] %v435_v1 }
 0x4ac   :  { %v478_v9 = vld [vmem:[#allocation1 + $0x7] ss:$0 sm:$0xff] }
 0x4ad   :  { %v481_v52 = vmul.f32 %v478_v9, %v478_v9  ;;  %v502_v11 = vmul.f32 %v478_v9, %v447_v8 }
 0x4af   :  { %482 = vadd.xlane.f32.xlu0 %v481_v52  ;;  %503 = vadd.xlane.f32.xlu1 %v502_v11 }
 0x4b3   :  { %455 = vadd.xlane.f32.xlu0 %v454_v12  ;;  %v590_v12 = vld [vmem:[#allocation0 + $0x9] ss:$0 sm:$0xff] }
 0x52d   :  { %v408_v13 = vpop.xlane.xlu1 %407 }
 0x52e   :  { %v409_v14 = vsub.f32 %v1626_v46, %v408_v13 }
 0x530   :  { %v410_v15 = vmul.f32 %v1699_v21, %v409_v14 }
 0x532   :  { %v411_v16 = vsel %vm354_vm13, %v410_v15, 0.0  ;;  %vm688_vm13 = vcmask 97368  }
 0x533   :  { %v412_v17 = vadd.f32 %v411_v16, %v351_v36  ;;  %vm708_vm15 = vmand %vm688_vm13, %vm249_vm8 }
 0x535   :  { %v467_v19 = vmul.f32 %v417_v38, %v412_v17 }
 0x537   :  { %468 = vadd.xlane.f32.xlu0 %v467_v19 }
 0x53c   :  { %v483_v3 = vpop.xlane.xlu0 %482  ;;  %v504_v27 = vpop.xlane.xlu1 %503 }
 0x53d   :  { %v484_v23 = vsub.f32 %v480_v18, %v483_v3  ;;  %v505_v31 = vsub.f32 %v1581_v5, %v504_v27 }
 0x53f   :  { %1510 = vrsqrt.f32 %v484_v23 }
 0x540   :  { %v456_v24 = vpop.xlane.xlu0 %455 }
 0x541   :  { %v457_v25 = vsub.f32 %v1601_v22, %v456_v24 }
 0x543   :  { %v458_v26 = vmul.f32 %v1509_v59, %v457_v25 }
 0x545   :  { %v459_v29 = vsel %vm415_vm0, %v458_v26, 0.0 }
 0x546   :  { %v460_v30 = vadd.f32 %v459_v29, %v399_v10 }
 0x548   :  { %v515_v21 = vmul.f32 %v478_v9, %v460_v30 }
 0x549   :  { %v1733_v32 = vpop.eup %1510 }
 0x54a   :  { %v506_v33 = vmul.f32 %v1733_v32, %v505_v31  ;;  %516 = vadd.xlane.f32.xlu1 %v515_v21 }
 0x54c   :  { %v507_v34 = vsel %vm476_vm4, %v506_v33, 0.0 }
 0x54d   :  { %v508_v35 = vadd.f32 %v507_v34, %v447_v8 }
 0x54f   :  { %510 = vst [vmem:[#allocation1 + $0x8] sm:$0xff] %v508_v35 }
 0x556   :  { %v539_v37 = vld [vmem:[#allocation1 + $0x8] ss:$0 sm:$0xff] }
 0x557   :  { %v551_v38 = vmul.f32 %v539_v37, %v508_v35  ;;  %v542_v40 = vmul.f32 %v539_v37, %v539_v37 }
 0x559   :  { %552 = vadd.xlane.f32.xlu1 %v551_v38  ;;  %543 = vadd.xlane.f32.xlu0 %v542_v40 }
 0x5c4   :  { %v469_v28 = vpop.xlane.xlu0 %468 }
 0x5c5   :  { %v470_v41 = vsub.f32 %v1626_v46, %v469_v28  ;;  %v641_v28 = vld [vmem:[#allocation0 + $0xa] ss:$0 sm:$0xff] }
 0x5c7   :  { %v471_v42 = vmul.f32 %v1509_v59, %v470_v41 }
 0x5c9   :  { %v472_v20 = vsel %vm415_vm0, %v471_v42, 0.0  ;;  %vm739_vm0 = vcmask 105568  }
 0x5ca   :  { %v473_v43 = vadd.f32 %v472_v20, %v412_v17  ;;  %vm759_vm3 = vmand %vm739_vm0, %vm310_vm11 }
 0x5cc   :  { %v528_v44 = vmul.f32 %v478_v9, %v473_v43 }
 0x5ce   :  { %529 = vadd.xlane.f32.xlu0 %v528_v44 }
 0x5d7   :  { %v517_v45 = vpop.xlane.xlu1 %516 }
 0x5d8   :  { %v518_v47 = vsub.f32 %v1601_v22, %v517_v45 }
 0x5da   :  { %v519_v48 = vmul.f32 %v1733_v32, %v518_v47 }
 0x5dc   :  { %v520_v49 = vsel %vm476_vm4, %v519_v48, 0.0 }
 0x5dd   :  { %v521_v50 = vadd.f32 %v520_v49, %v460_v30 }
 0x5df   :  { %v564_v51 = vmul.f32 %v539_v37, %v521_v50 }
 0x5e1   :  { %565 = vadd.xlane.f32.xlu1 %v564_v51 }
 0x5e6   :  { %v544_v54 = vpop.xlane.xlu0 %543  ;;  %v553_v56 = vpop.xlane.xlu1 %552 }
 0x5e7   :  { %v545_v55 = vsub.f32 %v541_v39, %v544_v54  ;;  %v554_v36 = vsub.f32 %v1581_v5, %v553_v56 }
 0x5e9   :  { %1512 = vrsqrt.f32 %v545_v55 }
 0x5f3   :  { %v1513_v57 = vpop.eup %1512 }
 0x5f4   :  { %v555_v58 = vmul.f32 %v1513_v57, %v554_v36 }
 0x5f6   :  { %v556_v59 = vsel %vm537_vm6, %v555_v58, 0.0 }
 0x5f7   :  { %v557_v60 = vadd.f32 %v556_v59, %v508_v35 }
 0x5f9   :  { %559 = vst [vmem:[#allocation1 + $0x8] sm:$0xff] %v557_v60 }
 0x600   :  { %v588_v61 = vld [vmem:[#allocation1 + $0x9] ss:$0 sm:$0xff] }
 0x601   :  { %v600_v62 = vmul.f32 %v588_v61, %v557_v60  ;;  %v591_v63 = vmul.f32 %v588_v61, %v588_v61 }
 0x603   :  { %601 = vadd.xlane.f32.xlu1 %v600_v62  ;;  %592 = vadd.xlane.f32.xlu0 %v591_v63 }
 0x65b   :  { %v530_v53 = vpop.xlane.xlu0 %529 }
 0x65c   :  { %v531_v0 = vsub.f32 %v1626_v46, %v530_v53  ;;  %v692_v53 = vld [vmem:[#allocation0 + $0xb] ss:$0 sm:$0xff] }
 0x65e   :  { %v532_v1 = vmul.f32 %v1733_v32, %v531_v0 }
 0x660   :  { %v533_v2 = vsel %vm476_vm4, %v532_v1, 0.0 }
 0x661   :  { %v534_v4 = vadd.f32 %v533_v2, %v473_v43 }
 0x663   :  { %v577_v6 = vmul.f32 %v539_v37, %v534_v4 }
 0x665   :  { %578 = vadd.xlane.f32.xlu0 %v577_v6 }
 0x66e   :  { %v566_v7 = vpop.xlane.xlu1 %565 }
 0x66f   :  { %v567_v8 = vsub.f32 %v1601_v22, %v566_v7 }
 0x671   :  { %v568_v9 = vmul.f32 %v1513_v57, %v567_v8 }
 0x673   :  { %v569_v10 = vsel %vm537_vm6, %v568_v9, 0.0 }
 0x674   :  { %v570_v52 = vadd.f32 %v569_v10, %v521_v50 }
 0x676   :  { %v615_v11 = vmul.f32 %v588_v61, %v570_v52 }
 0x678   :  { %616 = vadd.xlane.f32.xlu1 %v615_v11 }
 0x690   :  { %v593_v13 = vpop.xlane.xlu0 %592  ;;  %v602_v15 = vpop.xlane.xlu1 %601 }
 0x691   :  { %v594_v14 = vsub.f32 %v590_v12, %v593_v13  ;;  %v603_v16 = vsub.f32 %v1581_v5, %v602_v15 }
 0x693   :  { %1514 = vrsqrt.f32 %v594_v14 }
 0x69d   :  { %v1515_v17 = vpop.eup %1514 }
 0x69e   :  { %v604_v19 = vmul.f32 %v1515_v17, %v603_v16 }
 0x6a0   :  { %v607_v18 = vsel %vm606_vm9, %v604_v19, 0.0  ;;  %vm841_vm9 = vcmask 121968  }
 0x6a1   :  { %v608_v3 = vadd.f32 %v607_v18, %v557_v60 }
 0x6a3   :  { %610 = vst [vmem:[#allocation1 + $0x8] sm:$0xff] %v608_v3 }
 0x6aa   :  { %v639_v23 = vld [vmem:[#allocation1 + $0xa] ss:$0 sm:$0xff] }
 0x6ab   :  { %v651_v24 = vmul.f32 %v639_v23, %v608_v3  ;;  %v642_v25 = vmul.f32 %v639_v23, %v639_v23 }
 0x6ad   :  { %652 = vadd.xlane.f32.xlu1 %v651_v24  ;;  %643 = vadd.xlane.f32.xlu0 %v642_v25  ;;  %v743_v25 = vld [vmem:[#allocation0 + $0xc] ss:$0 sm:$0xff] }
 0x6f2   :  { %v579_v26 = vpop.xlane.xlu0 %578 }
 0x6f3   :  { %v580_v27 = vsub.f32 %v1626_v46, %v579_v26 }
 0x6f5   :  { %v581_v29 = vmul.f32 %v1513_v57, %v580_v27 }
 0x6f7   :  { %v582_v30 = vsel %vm537_vm6, %v581_v29, 0.0  ;;  %v1770_v29 = vld [vmem:[#allocation0 + $0x8] sm:$0xff]  ;;  %vm790_vm6 = vcmask 113768  }
 0x6f8   :  { %v583_v31 = vadd.f32 %v582_v30, %v534_v4 }
 0x6fa   :  { %v628_v21 = vmul.f32 %v588_v61, %v583_v31 }
 0x6fc   :  { %629 = vadd.xlane.f32.xlu0 %v628_v21 }
 0x705   :  { %v617_v33 = vpop.xlane.xlu1 %616 }
 0x706   :  { %v618_v34 = vsub.f32 %v1601_v22, %v617_v33 }
 0x708   :  { %v619_v35 = vmul.f32 %v1515_v17, %v618_v34 }
 0x70a   :  { %v620_v37 = vsel %vm586_vm7, %v619_v35, 0.0 }
 0x70b   :  { %v621_v38 = vadd.f32 %v620_v37, %v570_v52 }
 0x70d   :  { %v666_v40 = vmul.f32 %v639_v23, %v621_v38 }
 0x70f   :  { %667 = vadd.xlane.f32.xlu1 %v666_v40 }
 0x73a   :  { %v644_v41 = vpop.xlane.xlu0 %643  ;;  %v653_v20 = vpop.xlane.xlu1 %652 }
 0x73b   :  { %v645_v42 = vsub.f32 %v641_v28, %v644_v41  ;;  %v654_v43 = vsub.f32 %v1581_v5, %v653_v20 }
 0x73d   :  { %1516 = vrsqrt.f32 %v645_v42 }
 0x747   :  { %v1517_v44 = vpop.eup %1516 }
 0x748   :  { %v655_v45 = vmul.f32 %v1517_v44, %v654_v43 }
 0x74a   :  { %v658_v47 = vsel %vm657_vm12, %v655_v45, 0.0  ;;  %vm892_vm12 = vcmask 130168  }
 0x74b   :  { %v659_v48 = vadd.f32 %v658_v47, %v608_v3 }
 0x74d   :  { %661 = vst [vmem:[#allocation1 + $0x8] sm:$0xff] %v659_v48 }
 0x754   :  { %v690_v49 = vld [vmem:[#allocation1 + $0xb] ss:$0 sm:$0xff] }
 0x755   :  { %v702_v50 = vmul.f32 %v690_v49, %v659_v48  ;;  %v693_v51 = vmul.f32 %v690_v49, %v690_v49 }
 0x757   :  { %703 = vadd.xlane.f32.xlu1 %v702_v50  ;;  %694 = vadd.xlane.f32.xlu0 %v693_v51 }
 0x789   :  { %v630_v39 = vpop.xlane.xlu0 %629 }
 0x78a   :  { %v631_v54 = vsub.f32 %v1626_v46, %v630_v39  ;;  %v794_v39 = vld [vmem:[#allocation0 + $0xd] ss:$0 sm:$0xff] }
 0x78c   :  { %v632_v55 = vmul.f32 %v1515_v17, %v631_v54 }
 0x78e   :  { %v633_v56 = vsel %vm586_vm7, %v632_v55, 0.0  ;;  %vm810_vm7 = vmand %vm790_vm6, %vm371_vm14 }
 0x78f   :  { %v634_v36 = vadd.f32 %v633_v56, %v583_v31 }
 0x791   :  { %v679_v57 = vmul.f32 %v639_v23, %v634_v36 }
 0x793   :  { %680 = vadd.xlane.f32.xlu0 %v679_v57 }
 0x79c   :  { %v668_v58 = vpop.xlane.xlu1 %667 }
 0x79d   :  { %v669_v59 = vsub.f32 %v1601_v22, %v668_v58 }
 0x79f   :  { %v670_v60 = vmul.f32 %v1517_v44, %v669_v59 }
 0x7a1   :  { %v671_v61 = vsel %vm637_vm10, %v670_v60, 0.0  ;;  %v1784_v60 = vld [vmem:[#allocation0 + $0x18] sm:$0xff] }
 0x7a2   :  { %v672_v62 = vadd.f32 %v671_v61, %v621_v38 }
 0x7a4   :  { %v717_v63 = vmul.f32 %v690_v49, %v672_v62 }
 0x7a6   :  { %718 = vadd.xlane.f32.xlu1 %v717_v63 }
 0x7e4   :  { %v695_v0 = vpop.xlane.xlu0 %694  ;;  %v704_v2 = vpop.xlane.xlu1 %703 }
 0x7e5   :  { %v696_v1 = vsub.f32 %v692_v53, %v695_v0  ;;  %v705_v4 = vsub.f32 %v1581_v5, %v704_v2 }
 0x7e7   :  { %1518 = vrsqrt.f32 %v696_v1 }
 0x7f1   :  { %v1519_v6 = vpop.eup %1518 }
 0x7f2   :  { %v706_v7 = vmul.f32 %v1519_v6, %v705_v4 }
 0x7f4   :  { %v709_v8 = vsel %vm708_vm15, %v706_v7, 0.0  ;;  %vm979_vm15 = vcmask 146568  }
 0x7f5   :  { %v710_v9 = vadd.f32 %v709_v8, %v659_v48 }
 0x7f7   :  { %712 = vst [vmem:[#allocation1 + $0x8] sm:$0xff] %v710_v9 }
 0x7fe   :  { %v741_v10 = vld [vmem:[#allocation1 + $0xc] ss:$0 sm:$0xff] }
 0x7ff   :  { %v753_v52 = vmul.f32 %v741_v10, %v710_v9  ;;  %v744_v11 = vmul.f32 %v741_v10, %v741_v10 }
 0x801   :  { %754 = vadd.xlane.f32.xlu1 %v753_v52  ;;  %745 = vadd.xlane.f32.xlu0 %v744_v11 }
 0x820   :  { %v681_v12 = vpop.xlane.xlu0 %680 }
 0x821   :  { %v682_v13 = vsub.f32 %v1626_v46, %v681_v12  ;;  %v845_v12 = vld [vmem:[#allocation0 + $0xe] ss:$0 sm:$0xff] }
 0x823   :  { %v683_v14 = vmul.f32 %v1517_v44, %v682_v13  ;;  %v1777_v44 = vld [vmem:[#allocation0 + $0x10] sm:$0xff] }
 0x825   :  { %v684_v15 = vsel %vm637_vm10, %v683_v14, 0.0  ;;  %vm861_vm10 = vmand %vm841_vm9, %vm432_vm1 }
 0x826   :  { %v685_v5 = vadd.f32 %v684_v15, %v634_v36 }
 0x828   :  { %v730_v16 = vmul.f32 %v690_v49, %v685_v5 }
 0x82a   :  { %731 = vadd.xlane.f32.xlu0 %v730_v16 }
 0x833   :  { %v719_v17 = vpop.xlane.xlu1 %718 }
 0x834   :  { %v720_v19 = vsub.f32 %v1601_v22, %v719_v17 }
 0x836   :  { %v721_v18 = vmul.f32 %v1519_v6, %v720_v19 }
 0x838   :  { %v722_v3 = vsel %vm688_vm13, %v721_v18, 0.0 }
 0x839   :  { %v723_v23 = vadd.f32 %v722_v3, %v672_v62 }
 0x83b   :  { %v768_v24 = vmul.f32 %v741_v10, %v723_v23 }
 0x83d   :  { %769 = vadd.xlane.f32.xlu1 %v768_v24 }
 0x88e   :  { %v746_v26 = vpop.xlane.xlu0 %745  ;;  %v755_v30 = vpop.xlane.xlu1 %754 }
 0x88f   :  { %v747_v27 = vsub.f32 %v743_v25, %v746_v26  ;;  %v756_v31 = vsub.f32 %v1770_v29, %v755_v30 }
 0x891   :  { %1520 = vrsqrt.f32 %v747_v27 }
 0x89b   :  { %v1521_v21 = vpop.eup %1520 }
 0x89c   :  { %v757_v22 = vmul.f32 %v1521_v21, %v756_v31 }
 0x89e   :  { %v760_v33 = vsel %vm759_vm3, %v757_v22, 0.0  ;;  %vm1017_vm3 = vcmask 154768  }
 0x89f   :  { %v761_v34 = vadd.f32 %v760_v33, %v710_v9 }
 0x8a1   :  { %763 = vst [vmem:[#allocation1 + $0x8] sm:$0xff] %v761_v34 }
 0x8a8   :  { %v792_v35 = vld [vmem:[#allocation1 + $0xd] ss:$0 sm:$0xff] }
 0x8a9   :  { %v804_v37 = vmul.f32 %v792_v35, %v761_v34  ;;  %v795_v38 = vmul.f32 %v792_v35, %v792_v35 }
 0x8ab   :  { %805 = vadd.xlane.f32.xlu1 %v804_v37  ;;  %796 = vadd.xlane.f32.xlu0 %v795_v38 }
 0x8b7   :  { %v732_v40 = vpop.xlane.xlu0 %731 }
 0x8b8   :  { %v733_v28 = vsub.f32 %v1626_v46, %v732_v40 }
 0x8ba   :  { %v734_v41 = vmul.f32 %v1519_v6, %v733_v28 }
 0x8bc   :  { %v735_v42 = vsel %vm688_vm13, %v734_v41, 0.0  ;;  %vm943_vm13 = vcmask 138368  }
 0x8bd   :  { %v736_v20 = vadd.f32 %v735_v42, %v685_v5 }
 0x8bf   :  { %v781_v43 = vmul.f32 %v741_v10, %v736_v20 }
 0x8c1   :  { %782 = vadd.xlane.f32.xlu0 %v781_v43 }
 0x8ca   :  { %v770_v45 = vpop.xlane.xlu1 %769 }
 0x8cb   :  { %v771_v47 = vsub.f32 %v1777_v44, %v770_v45 }
 0x8cd   :  { %v772_v48 = vmul.f32 %v1521_v21, %v771_v47 }
 0x8cf   :  { %v773_v49 = vsel %vm739_vm0, %v772_v48, 0.0 }
 0x8d0   :  { %v774_v50 = vadd.f32 %v773_v49, %v723_v23 }
 0x8d2   :  { %v819_v51 = vmul.f32 %v792_v35, %v774_v50 }
 0x8d4   :  { %820 = vadd.xlane.f32.xlu1 %v819_v51 }
 0x938   :  { %v797_v54 = vpop.xlane.xlu0 %796  ;;  %v806_v55 = vpop.xlane.xlu1 %805 }
 0x939   :  { %v798_v46 = vsub.f32 %v794_v39, %v797_v54  ;;  %v807_v56 = vsub.f32 %v1770_v29, %v806_v55 }
 0x93b   :  { %1522 = vrsqrt.f32 %v798_v46 }
 0x945   :  { %v1523_v36 = vpop.eup %1522 }
 0x946   :  { %v808_v57 = vmul.f32 %v1523_v36, %v807_v56 }
 0x948   :  { %v811_v58 = vsel %vm810_vm7, %v808_v57, 0.0  ;;  %vm1055_vm7 = vcmask 162968  }
 0x949   :  { %v812_v59 = vadd.f32 %v811_v58, %v761_v34 }
 0x94b   :  { %814 = vst [vmem:[#allocation1 + $0x8] sm:$0xff] %v812_v59 }
 0x94e   :  { %v783_v61 = vpop.xlane.xlu0 %782 }
 0x94f   :  { %v784_v62 = vsub.f32 %v1784_v60, %v783_v61 }
 0x951   :  { %v785_v63 = vmul.f32 %v1521_v21, %v784_v62  ;;  %v947_v62 = vld [vmem:[#allocation0 + $0x10] ss:$0 sm:$0xff] }
 0x952   :  { %v843_v53 = vld [vmem:[#allocation1 + $0xe] ss:$0 sm:$0xff] }
 0x953   :  { %v855_v0 = vmul.f32 %v843_v53, %v812_v59  ;;  %v846_v1 = vmul.f32 %v843_v53, %v843_v53  ;;  %v786_v2 = vsel %vm739_vm0, %v785_v63, 0.0  ;;  %vm999_vm0 = vmand %vm979_vm15, %vm127_vm2 }
 0x954   :  { %v787_v4 = vadd.f32 %v786_v2, %v736_v20  ;;  %v896_v20 = vld [vmem:[#allocation0 + $0xf] ss:$0 sm:$0xff] }
 0x955   :  { %856 = vadd.xlane.f32.xlu1 %v855_v0  ;;  %847 = vadd.xlane.f32.xlu0 %v846_v1 }
 0x956   :  { %v832_v6 = vmul.f32 %v792_v35, %v787_v4 }
 0x959   :  { %833 = vadd.xlane.f32.xlu0 %v832_v6 }
 0x961   :  { %v821_v7 = vpop.xlane.xlu1 %820 }
 0x962   :  { %v822_v8 = vsub.f32 %v1777_v44, %v821_v7 }
 0x964   :  { %v823_v9 = vmul.f32 %v1523_v36, %v822_v8 }
 0x966   :  { %v824_v10 = vsel %vm790_vm6, %v823_v9, 0.0 }
 0x967   :  { %v825_v52 = vadd.f32 %v824_v10, %v774_v50 }
 0x969   :  { %v870_v11 = vmul.f32 %v843_v53, %v825_v52 }
 0x96b   :  { %871 = vadd.xlane.f32.xlu1 %v870_v11 }
 0x9e2   :  { %v848_v13 = vpop.xlane.xlu0 %847  ;;  %v857_v17 = vpop.xlane.xlu1 %856 }
 0x9e3   :  { %v849_v14 = vsub.f32 %v845_v12, %v848_v13  ;;  %v858_v3 = vsub.f32 %v1770_v29, %v857_v17 }
 0x9e5   :  { %1524 = vrsqrt.f32 %v849_v14 }
 0x9e6   :  { %v834_v15 = vpop.xlane.xlu0 %833 }
 0x9e7   :  { %v835_v5 = vsub.f32 %v1784_v60, %v834_v15 }
 0x9e9   :  { %v836_v16 = vmul.f32 %v1523_v36, %v835_v5  ;;  %v983_v5 = vld [vmem:[#allocation0 + $0x11] ss:$0 sm:$0xff] }
 0x9eb   :  { %v837_v19 = vsel %vm790_vm6, %v836_v16, 0.0  ;;  %vm1037_vm6 = vmand %vm1017_vm3, %vm188_vm5 }
 0x9ec   :  { %v838_v18 = vadd.f32 %v837_v19, %v787_v4 }
 0x9ee   :  { %v883_v23 = vmul.f32 %v843_v53, %v838_v18 }
 0x9ef   :  { %v1525_v24 = vpop.eup %1524 }
 0x9f0   :  { %v859_v25 = vmul.f32 %v1525_v24, %v858_v3  ;;  %884 = vadd.xlane.f32.xlu1 %v883_v23 }
 0x9f2   :  { %v862_v26 = vsel %vm861_vm10, %v859_v25, 0.0  ;;  %vm1093_vm10 = vcmask 171168  }
 0x9f3   :  { %v1795_v27 = vadd.f32 %v862_v26, %v812_v59 }
 0x9f5   :  { %865 = vst [vmem:[#allocation1 + $0x8] sm:$0xff] %v1795_v27 }
 0x9f8   :  { %v872_v30 = vpop.xlane.xlu1 %871 }
 0x9f9   :  { %v873_v31 = vsub.f32 %v1777_v44, %v872_v30 }
 0x9fb   :  { %v874_v21 = vmul.f32 %v1525_v24, %v873_v31 }
 0x9fc   :  { %v1799_v22 = vld [vmem:[#allocation1 + $0xf] ss:$0 sm:$0xff] }
 0x9fd   :  { %v897_v29 = vmul.f32 %v1799_v22, %v1799_v22  ;;  %v875_v33 = vsel %vm841_vm9, %v874_v21, 0.0 }
 0x9fe   :  { %v876_v34 = vadd.f32 %v875_v33, %v825_v52 }
 0x9ff   :  { %898 = vadd.xlane.f32.xlu0 %v897_v29 }
 0xa00   :  { %v921_v35 = vmul.f32 %v1799_v22, %v876_v34 }
 0xa03   :  { %922 = vadd.xlane.f32.xlu0 %v921_v35 }
 0xa7d   :  { %v885_v37 = vpop.xlane.xlu1 %884 }
 0xa7e   :  { %v886_v38 = vsub.f32 %v1784_v60, %v885_v37 }
 0xa80   :  { %v887_v40 = vmul.f32 %v1525_v24, %v886_v38  ;;  %v1021_v38 = vld [vmem:[#allocation0 + $0x12] ss:$0 sm:$0xff] }
 0xa82   :  { %v888_v28 = vsel %vm841_vm9, %v887_v40, 0.0  ;;  %vm1075_vm9 = vmand %vm1055_vm7, %vm249_vm8 }
 0xa83   :  { %v889_v41 = vadd.f32 %v888_v28, %v838_v18 }
 0xa85   :  { %v934_v42 = vmul.f32 %v1799_v22, %v889_v41 }
 0xa87   :  { %935 = vadd.xlane.f32.xlu1 %v934_v42 }
 0xa8c   :  { %v899_v43 = vpop.xlane.xlu0 %898 }
 0xa8d   :  { %v900_v45 = vsub.f32 %v896_v20, %v899_v43 }
 0xa8f   :  { %1526 = vrsqrt.f32 %v900_v45 }
 0xa90   :  { %v923_v47 = vpop.xlane.xlu0 %922 }
 0xa91   :  { %v924_v48 = vsub.f32 %v1777_v44, %v923_v47 }
 0xa99   :  { %v1809_v49 = vpop.eup %1526 }
 0xa9a   :  { %v925_v50 = vmul.f32 %v1809_v49, %v924_v48 }
 0xa9c   :  { %v926_v51 = vsel %vm892_vm12, %v925_v50, 0.0 }
 0xa9d   :  { %v927_v39 = vadd.f32 %v926_v51, %v876_v34 }
 0xa9f   :  { %929 = vst [vmem:[#allocation1 + $0x10] sm:$0xff] %v927_v39 }
 0xaa6   :  { %v945_v54 = vld [vmem:[#allocation1 + $0x10] ss:$0 sm:$0xff] }
 0xaa7   :  { %v948_v46 = vmul.f32 %v945_v54, %v945_v54  ;;  %v957_v55 = vmul.f32 %v945_v54, %v927_v39 }
 0xaa9   :  { %949 = vadd.xlane.f32.xlu0 %v948_v46  ;;  %958 = vadd.xlane.f32.xlu1 %v957_v55 }
 0xb14   :  { %v936_v56 = vpop.xlane.xlu1 %935 }
 0xb15   :  { %v937_v36 = vsub.f32 %v1784_v60, %v936_v56 }
 0xb17   :  { %v938_v57 = vmul.f32 %v1809_v49, %v937_v36 }
 0xb19   :  { %v939_v58 = vsel %vm892_vm12, %v938_v57, 0.0  ;;  %v1059_v57 = vld [vmem:[#allocation0 + $0x13] ss:$0 sm:$0xff] }
 0xb1a   :  { %v940_v59 = vadd.f32 %v939_v58, %v889_v41 }
 0xb1c   :  { %v970_v61 = vmul.f32 %v945_v54, %v940_v59 }
 0xb1e   :  { %971 = vadd.xlane.f32.xlu0 %v970_v61 }
 0xb36   :  { %v950_v63 = vpop.xlane.xlu0 %949  ;;  %v959_v0 = vpop.xlane.xlu1 %958 }
 0xb37   :  { %v951_v53 = vsub.f32 %v947_v62, %v950_v63  ;;  %v960_v1 = vsub.f32 %v1777_v44, %v959_v0 }
 0xb39   :  { %1528 = vrsqrt.f32 %v951_v53 }
 0xb43   :  { %v1529_v2 = vpop.eup %1528 }
 0xb44   :  { %v961_v4 = vmul.f32 %v1529_v2, %v960_v1 }
 0xb46   :  { %v962_v6 = vsel %vm943_vm13, %v961_v4, 0.0 }
 0xb47   :  { %v963_v7 = vadd.f32 %v962_v6, %v927_v39 }
 0xb49   :  { %965 = vst [vmem:[#allocation1 + $0x10] sm:$0xff] %v963_v7 }
 0xb50   :  { %v981_v8 = vld [vmem:[#allocation1 + $0x11] ss:$0 sm:$0xff] }
 0xb51   :  { %v993_v9 = vmul.f32 %v981_v8, %v963_v7  ;;  %v984_v10 = vmul.f32 %v981_v8, %v981_v8 }
 0xb53   :  { %994 = vadd.xlane.f32.xlu0 %v993_v9  ;;  %985 = vadd.xlane.f32.xlu1 %v984_v10 }
 0xbab   :  { %v972_v52 = vpop.xlane.xlu0 %971 }
 0xbac   :  { %v973_v11 = vsub.f32 %v1784_v60, %v972_v52 }
 0xbae   :  { %v974_v12 = vmul.f32 %v1529_v2, %v973_v11 }
 0xbb0   :  { %v975_v13 = vsel %vm943_vm13, %v974_v12, 0.0  ;;  %v1097_v12 = vld [vmem:[#allocation0 + $0x14] ss:$0 sm:$0xff]  ;;  %vm1113_vm13 = vmand %vm1093_vm10, %vm310_vm11 }
 0xbb1   :  { %v976_v14 = vadd.f32 %v975_v13, %v940_v59 }
 0xbb3   :  { %v1008_v15 = vmul.f32 %v981_v8, %v976_v14 }
 0xbb5   :  { %1009 = vadd.xlane.f32.xlu1 %v1008_v15 }
 0xbe0   :  { %v986_v16 = vpop.xlane.xlu1 %985  ;;  %v995_v19 = vpop.xlane.xlu0 %994 }
 0xbe1   :  { %v987_v17 = vsub.f32 %v983_v5, %v986_v16  ;;  %v996_v18 = vsub.f32 %v1777_v44, %v995_v19 }
 0xbe3   :  { %1530 = vrsqrt.f32 %v987_v17 }
 0xbed   :  { %v1531_v3 = vpop.eup %1530 }
 0xbee   :  { %v997_v23 = vmul.f32 %v1531_v3, %v996_v18 }
 0xbf0   :  { %v1000_v24 = vsel %vm999_vm0, %v997_v23, 0.0 }
 0xbf1   :  { %v1001_v25 = vadd.f32 %v1000_v24, %v963_v7 }
 0xbf3   :  { %1003 = vst [vmem:[#allocation1 + $0x10] sm:$0xff] %v1001_v25 }
 0xbfa   :  { %v1019_v26 = vld [vmem:[#allocation1 + $0x12] ss:$0 sm:$0xff] }
 0xbfb   :  { %v1031_v30 = vmul.f32 %v1019_v26, %v1001_v25  ;;  %v1022_v31 = vmul.f32 %v1019_v26, %v1019_v26 }
 0xbfd   :  { %1032 = vadd.xlane.f32.xlu1 %v1031_v30  ;;  %1023 = vadd.xlane.f32.xlu0 %v1022_v31 }
 0xc42   :  { %v1010_v21 = vpop.xlane.xlu1 %1009 }
 0xc43   :  { %v1011_v29 = vsub.f32 %v1784_v60, %v1010_v21 }
 0xc45   :  { %v1012_v33 = vmul.f32 %v1531_v3, %v1011_v29 }
 0xc47   :  { %v1013_v34 = vsel %vm979_vm15, %v1012_v33, 0.0  ;;  %v1135_v33 = vld [vmem:[#allocation0 + $0x15] ss:$0 sm:$0xff]  ;;  %vm1131_vm15 = vcmask 179368  }
 0xc48   :  { %v1014_v35 = vadd.f32 %v1013_v34, %v976_v14  ;;  %vm1151_vm0 = vmand %vm1131_vm15, %vm371_vm14 }
 0xc4a   :  { %v1046_v37 = vmul.f32 %v1019_v26, %v1014_v35 }
 0xc4c   :  { %1047 = vadd.xlane.f32.xlu0 %v1046_v37 }
 0xc8a   :  { %v1024_v40 = vpop.xlane.xlu0 %1023  ;;  %v1033_v41 = vpop.xlane.xlu1 %1032 }
 0xc8b   :  { %v1025_v28 = vsub.f32 %v1021_v38, %v1024_v40  ;;  %v1034_v42 = vsub.f32 %v1777_v44, %v1033_v41 }
 0xc8d   :  { %1532 = vrsqrt.f32 %v1025_v28 }
 0xc97   :  { %v1533_v20 = vpop.eup %1532 }
 0xc98   :  { %v1035_v43 = vmul.f32 %v1533_v20, %v1034_v42 }
 0xc9a   :  { %v1038_v45 = vsel %vm1037_vm6, %v1035_v43, 0.0 }
 0xc9b   :  { %v1039_v47 = vadd.f32 %v1038_v45, %v1001_v25 }
 0xc9d   :  { %1041 = vst [vmem:[#allocation1 + $0x10] sm:$0xff] %v1039_v47 }
 0xca4   :  { %v1057_v48 = vld [vmem:[#allocation1 + $0x13] ss:$0 sm:$0xff] }
 0xca5   :  { %v1069_v50 = vmul.f32 %v1057_v48, %v1039_v47  ;;  %v1060_v51 = vmul.f32 %v1057_v48, %v1057_v48 }
 0xca7   :  { %1070 = vadd.xlane.f32.xlu0 %v1069_v50  ;;  %1061 = vadd.xlane.f32.xlu1 %v1060_v51 }
 0xcd9   :  { %v1048_v39 = vpop.xlane.xlu0 %1047 }
 0xcda   :  { %v1049_v54 = vsub.f32 %v1784_v60, %v1048_v39 }
 0xcdc   :  { %v1050_v46 = vmul.f32 %v1533_v20, %v1049_v54 }
 0xcde   :  { %v1051_v55 = vsel %vm1017_vm3, %v1050_v46, 0.0  ;;  %v1173_v46 = vld [vmem:[#allocation0 + $0x16] ss:$0 sm:$0xff]  ;;  %vm1169_vm3 = vcmask 187568  }
 0xcdf   :  { %v1052_v56 = vadd.f32 %v1051_v55, %v1014_v35  ;;  %vm1189_vm6 = vmand %vm1169_vm3, %vm432_vm1 }
 0xce1   :  { %v1084_v36 = vmul.f32 %v1057_v48, %v1052_v56 }
 0xce3   :  { %1085 = vadd.xlane.f32.xlu1 %v1084_v36 }
 0xd34   :  { %v1062_v58 = vpop.xlane.xlu1 %1061  ;;  %v1071_v61 = vpop.xlane.xlu0 %1070 }
 0xd35   :  { %v1063_v59 = vsub.f32 %v1059_v57, %v1062_v58  ;;  %v1072_v62 = vsub.f32 %v1777_v44, %v1071_v61 }
 0xd37   :  { %1534 = vrsqrt.f32 %v1063_v59 }
 0xd41   :  { %v1535_v63 = vpop.eup %1534 }
 0xd42   :  { %v1073_v53 = vmul.f32 %v1535_v63, %v1072_v62 }
 0xd44   :  { %v1076_v0 = vsel %vm1075_vm9, %v1073_v53, 0.0  ;;  %vm1245_vm9 = vcmask 203968  }
 0xd45   :  { %v1077_v1 = vadd.f32 %v1076_v0, %v1039_v47 }
 0xd47   :  { %1079 = vst [vmem:[#allocation1 + $0x10] sm:$0xff] %v1077_v1 }
 0xd4e   :  { %v1095_v2 = vld [vmem:[#allocation1 + $0x14] ss:$0 sm:$0xff] }
 0xd4f   :  { %v1107_v4 = vmul.f32 %v1095_v2, %v1077_v1  ;;  %v1098_v6 = vmul.f32 %v1095_v2, %v1095_v2 }
 0xd51   :  { %1108 = vadd.xlane.f32.xlu1 %v1107_v4  ;;  %1099 = vadd.xlane.f32.xlu0 %v1098_v6 }
 0xd70   :  { %v1086_v7 = vpop.xlane.xlu1 %1085 }
 0xd71   :  { %v1087_v8 = vsub.f32 %v1784_v60, %v1086_v7 }
 0xd73   :  { %v1088_v9 = vmul.f32 %v1535_v63, %v1087_v8  ;;  %v1211_v8 = vld [vmem:[#allocation0 + $0x17] ss:$0 sm:$0xff] }
 0xd75   :  { %v1089_v10 = vsel %vm1055_vm7, %v1088_v9, 0.0  ;;  %vm1207_vm7 = vcmask 195768  }
 0xd76   :  { %v1090_v52 = vadd.f32 %v1089_v10, %v1052_v56 }
 0xd78   :  { %v1122_v11 = vmul.f32 %v1095_v2, %v1090_v52 }
 0xd7a   :  { %1123 = vadd.xlane.f32.xlu0 %v1122_v11 }
 0xdde   :  { %v1100_v13 = vpop.xlane.xlu0 %1099  ;;  %v1109_v15 = vpop.xlane.xlu1 %1108 }
 0xddf   :  { %v1101_v14 = vsub.f32 %v1097_v12, %v1100_v13  ;;  %v1110_v5 = vsub.f32 %v1777_v44, %v1109_v15 }
 0xde1   :  { %1536 = vrsqrt.f32 %v1101_v14 }
 0xdeb   :  { %v1537_v16 = vpop.eup %1536 }
 0xdec   :  { %v1111_v17 = vmul.f32 %v1537_v16, %v1110_v5 }
 0xdee   :  { %v1114_v19 = vsel %vm1113_vm13, %v1111_v17, 0.0 }
 0xdef   :  { %v1115_v18 = vadd.f32 %v1114_v19, %v1077_v1  ;;  %v1249_v19 = vld [vmem:[#allocation0 + $0x18] ss:$0 sm:$0xff] }
 0xdf1   :  { %1117 = vst [vmem:[#allocation1 + $0x10] sm:$0xff] %v1115_v18 }
 0xdf8   :  { %v1133_v3 = vld [vmem:[#allocation1 + $0x15] ss:$0 sm:$0xff] }
 0xdf9   :  { %v1145_v23 = vmul.f32 %v1133_v3, %v1115_v18  ;;  %v1136_v24 = vmul.f32 %v1133_v3, %v1133_v3 }
 0xdfb   :  { %1146 = vadd.xlane.f32.xlu0 %v1145_v23  ;;  %1137 = vadd.xlane.f32.xlu1 %v1136_v24 }
 0xe07   :  { %v1124_v25 = vpop.xlane.xlu0 %1123 }
 0xe08   :  { %v1125_v26 = vsub.f32 %v1784_v60, %v1124_v25 }
 0xe0a   :  { %v1126_v30 = vmul.f32 %v1537_v16, %v1125_v26 }
 0xe0c   :  { %v1127_v31 = vsel %vm1093_vm10, %v1126_v30, 0.0  ;;  %vm1268_vm10 = vcmask 212168  }
 0xe0d   :  { %v1128_v21 = vadd.f32 %v1127_v31, %v1090_v52  ;;  %vm1288_vm13 = vmand %vm1268_vm10, %vm127_vm2  ;;  %vm1393_vm10 = vcmask 253168  }
 0xe0f   :  { %v1160_v29 = vmul.f32 %v1133_v3, %v1128_v21 }
 0xe11   :  { %1161 = vadd.xlane.f32.xlu1 %v1160_v29 }
 0xe88   :  { %v1138_v34 = vpop.xlane.xlu1 %1137  ;;  %v1147_v37 = vpop.xlane.xlu0 %1146 }
 0xe89   :  { %v1139_v35 = vsub.f32 %v1135_v33, %v1138_v34  ;;  %v1148_v38 = vsub.f32 %v1777_v44, %v1147_v37  ;;  %v1272_v34 = vld [vmem:[#allocation0 + $0x19] ss:$0 sm:$0xff] }
 0xe8b   :  { %1538 = vrsqrt.f32 %v1139_v35 }
 0xe95   :  { %v1539_v40 = vpop.eup %1538 }
 0xe96   :  { %v1149_v28 = vmul.f32 %v1539_v40, %v1148_v38 }
 0xe98   :  { %v1152_v41 = vsel %vm1151_vm0, %v1149_v28, 0.0  ;;  %vm1318_vm0 = vcmask 228568  }
 0xe99   :  { %v1153_v42 = vadd.f32 %v1152_v41, %v1115_v18 }
 0xe9b   :  { %1155 = vst [vmem:[#allocation1 + $0x10] sm:$0xff] %v1153_v42 }
 0xe9e   :  { %v1162_v20 = vpop.xlane.xlu1 %1161 }
 0xe9f   :  { %v1163_v43 = vsub.f32 %v1784_v60, %v1162_v20 }
 0xea1   :  { %v1164_v45 = vmul.f32 %v1539_v40, %v1163_v43 }
 0xea2   :  { %v1171_v47 = vld [vmem:[#allocation1 + $0x16] ss:$0 sm:$0xff] }
 0xea3   :  { %v1183_v48 = vmul.f32 %v1171_v47, %v1153_v42  ;;  %v1174_v50 = vmul.f32 %v1171_v47, %v1171_v47  ;;  %v1165_v51 = vsel %vm1131_vm15, %v1164_v45, 0.0  ;;  %vm1293_vm15 = vcmask 220368  }
 0xea4   :  { %v1166_v39 = vadd.f32 %v1165_v51, %v1128_v21  ;;  %vm1313_vm2 = vmand %vm1293_vm15, %vm188_vm5 }
 0xea5   :  { %1184 = vadd.xlane.f32.xlu1 %v1183_v48  ;;  %1175 = vadd.xlane.f32.xlu0 %v1174_v50  ;;  %v1297_v48 = vld [vmem:[#allocation0 + $0x1a] ss:$0 sm:$0xff]  ;;  %vm1338_vm5 = vmand %vm1318_vm0, %vm249_vm8 }
 0xea6   :  { %v1198_v54 = vmul.f32 %v1171_v47, %v1166_v39 }
 0xea9   :  { %1199 = vadd.xlane.f32.xlu0 %v1198_v54 }
 0xf32   :  { %v1176_v55 = vpop.xlane.xlu0 %1175  ;;  %v1185_v36 = vpop.xlane.xlu1 %1184 }
 0xf33   :  { %v1177_v56 = vsub.f32 %v1173_v46, %v1176_v55  ;;  %v1186_v57 = vsub.f32 %v1777_v44, %v1185_v36 }
 0xf35   :  { %1540 = vrsqrt.f32 %v1177_v56 }
 0xf36   :  { %v1200_v59 = vpop.xlane.xlu0 %1199 }
 0xf37   :  { %v1201_v63 = vsub.f32 %v1784_v60, %v1200_v59 }
 0xf3f   :  { %v1541_v58 = vpop.eup %1540 }
 0xf40   :  { %v1187_v61 = vmul.f32 %v1541_v58, %v1186_v57  ;;  %v1202_v0 = vmul.f32 %v1541_v58, %v1201_v63 }
 0xf42   :  { %v1190_v62 = vsel %vm1189_vm6, %v1187_v61, 0.0  ;;  %v1203_v1 = vsel %vm1169_vm3, %v1202_v0, 0.0  ;;  %v1322_v61 = vld [vmem:[#allocation0 + $0x1b] ss:$0 sm:$0xff]  ;;  %vm1343_vm3 = vcmask 236768   ;;  %vm1368_vm6 = vcmask 244968  }
 0xf43   :  { %v1844_v53 = vadd.f32 %v1190_v62, %v1153_v42  ;;  %v1204_v2 = vadd.f32 %v1203_v1, %v1166_v39  ;;  %vm1363_vm8 = vmand %vm1343_vm3, %vm310_vm11 }
 0xf44   :  { %vm1388_vm11 = vmand %vm1368_vm6, %vm371_vm14  ;;  %vm493_vm14 = vcmask 1047559  }
 0xf45   :  { %1193 = vst [vmem:[#allocation1 + $0x10] sm:$0xff] %v1844_v53 }
 0xf4c   :  { %v1847_v4 = vld [vmem:[#allocation1 + $0x17] ss:$0 sm:$0xff] }
 0xf4d   :  { %v1212_v6 = vmul.f32 %v1847_v4, %v1847_v4  ;;  %v1236_v7 = vmul.f32 %v1847_v4, %v1204_v2 }
 0xf4f   :  { %1213 = vadd.xlane.f32.xlu1 %v1212_v6  ;;  %1237 = vadd.xlane.f32.xlu0 %v1236_v7 }
 0xfdc   :  { %v1214_v9 = vpop.xlane.xlu1 %1213  ;;  %v1238_v52 = vpop.xlane.xlu0 %1237 }
 0xfdd   :  { %v1215_v10 = vsub.f32 %v1211_v8, %v1214_v9  ;;  %v1239_v11 = vsub.f32 %v1784_v60, %v1238_v52 }
 0xfdf   :  { %1542 = vrsqrt.f32 %v1215_v10 }
 0xfe9   :  { %v1853_v12 = vpop.eup %1542 }
 0xfea   :  { %v1240_v13 = vmul.f32 %v1853_v12, %v1239_v11  ;;  %v1347_v11 = vld [vmem:[#allocation0 + $0x1c] ss:$0 sm:$0xff] }
 0xfec   :  { %v1241_v14 = vsel %vm1207_vm7, %v1240_v13, 0.0 }
 0xfed   :  { %v1242_v15 = vadd.f32 %v1241_v14, %v1204_v2 }
 0xfef   :  { %1244 = vst [vmem:[#allocation1 + $0x18] sm:$0xff] %v1242_v15 }
 0xff6   :  { %v1247_v5 = vld [vmem:[#allocation1 + $0x18] ss:$0 sm:$0xff] }
 0xff7   :  { %v1259_v16 = vmul.f32 %v1247_v5, %v1242_v15  ;;  %v1250_v17 = vmul.f32 %v1247_v5, %v1247_v5 }
 0xff9   :  { %1260 = vadd.xlane.f32.xlu0 %v1259_v16  ;;  %1251 = vadd.xlane.f32.xlu1 %v1250_v17 }
0x1086   :  { %v1252_v18 = vpop.xlane.xlu1 %1251  ;;  %v1261_v23 = vpop.xlane.xlu0 %1260 }
0x1087   :  { %v1253_v3 = vsub.f32 %v1249_v19, %v1252_v18  ;;  %v1262_v24 = vsub.f32 %v1784_v60, %v1261_v23 }
0x1089   :  { %1544 = vrsqrt.f32 %v1253_v3 }
0x1093   :  { %v1545_v25 = vpop.eup %1544 }
0x1094   :  { %v1263_v26 = vmul.f32 %v1545_v25, %v1262_v24  ;;  %v1372_v25 = vld [vmem:[#allocation0 + $0x1d] ss:$0 sm:$0xff] }
0x1096   :  { %v1264_v30 = vsel %vm1245_vm9, %v1263_v26, 0.0  ;;  %vm494_vm9 = vmand %vm476_vm4, %vm493_vm14 }
0x1097   :  { %v1265_v31 = vadd.f32 %v1264_v30, %v1242_v15  ;;  %vm1413_vm4 = vmand %vm1393_vm10, %vm432_vm1 }
0x1098   :  { %vm912_vm1 = vmand %vm892_vm12, %vm493_vm14 }
0x1099   :  { %1267 = vst [vmem:[#allocation1 + $0x18] sm:$0xff] %v1265_v31 }
0x10a0   :  { %v1270_v21 = vld [vmem:[#allocation1 + $0x19] ss:$0 sm:$0xff] }
0x10a1   :  { %v1282_v29 = vmul.f32 %v1270_v21, %v1265_v31  ;;  %v1273_v33 = vmul.f32 %v1270_v21, %v1270_v21 }
0x10a3   :  { %1283 = vadd.xlane.f32.xlu0 %v1282_v29  ;;  %1274 = vadd.xlane.f32.xlu1 %v1273_v33 }
0x1130   :  { %v1275_v35 = vpop.xlane.xlu1 %1274  ;;  %v1284_v38 = vpop.xlane.xlu0 %1283 }
0x1131   :  { %v1276_v37 = vsub.f32 %v1272_v34, %v1275_v35  ;;  %v1285_v40 = vsub.f32 %v1784_v60, %v1284_v38 }
0x1133   :  { %1546 = vrsqrt.f32 %v1276_v37 }
0x113d   :  { %v1547_v28 = vpop.eup %1546 }
0x113e   :  { %v1286_v41 = vmul.f32 %v1547_v28, %v1285_v40  ;;  %v487_v28 = vld [vmem:[#allocation1] sm:$0xff] }
0x1140   :  { %v1289_v42 = vsel %vm1288_vm13, %v1286_v41, 0.0  ;;  %v1560_v41 = vld [vmem:[#allocation1 + $0x7] ss:$0 sm:$0xff]  ;;  %vm1227_vm13 = vmand %vm1207_vm7, %vm493_vm14  ;;  %vm1418_vm7 = vcmask 261368  }
0x1141   :  { %v1290_v20 = vadd.f32 %v1289_v42, %v1265_v31  ;;  %v488_v42 = vmul.f32 %v1560_v41, %v487_v28  ;;  %vm1438_vm15 = vmand %vm1418_vm7, %vm493_vm14 }
0x1143   :  { %1292 = vst [vmem:[#allocation1 + $0x18] sm:$0xff] %v1290_v20 }
0x114a   :  { %v1295_v43 = vld [vmem:[#allocation1 + $0x1a] ss:$0 sm:$0xff] }
0x114b   :  { %v1307_v45 = vmul.f32 %v1295_v43, %v1290_v20  ;;  %v1298_v47 = vmul.f32 %v1295_v43, %v1295_v43  ;;  %v1397_v43 = vld [vmem:[#allocation0 + $0x1e] ss:$0 sm:$0xff] }
0x114d   :  { %1308 = vadd.xlane.f32.xlu0 %v1307_v45  ;;  %1299 = vadd.xlane.f32.xlu1 %v1298_v47 }
0x11da   :  { %v1300_v50 = vpop.xlane.xlu1 %1299  ;;  %v1309_v39 = vpop.xlane.xlu0 %1308 }
0x11db   :  { %v1301_v51 = vsub.f32 %v1297_v48, %v1300_v50  ;;  %v1310_v54 = vsub.f32 %v1784_v60, %v1309_v39  ;;  %v486_v50 = vld [vmem:[#allocation0] sm:$0xff] }
0x11dd   :  { %1548 = vrsqrt.f32 %v1301_v51 }
0x11e7   :  { %v1549_v46 = vpop.eup %1548 }
0x11e8   :  { %v1311_v55 = vmul.f32 %v1549_v46, %v1310_v54 }
0x11ea   :  { %v1314_v56 = vsel %vm1313_vm2, %v1311_v55, 0.0 }
0x11eb   :  { %v1315_v36 = vadd.f32 %v1314_v56, %v1290_v20  ;;  %v1221_v20 = vmul.f32 %v1847_v4, %v1844_v53 }
0x11ed   :  { %1317 = vst [vmem:[#allocation1 + $0x18] sm:$0xff] %v1315_v36 }
0x11f4   :  { %v1320_v57 = vld [vmem:[#allocation1 + $0x1b] ss:$0 sm:$0xff] }
0x11f5   :  { %v1332_v58 = vmul.f32 %v1320_v57, %v1315_v36  ;;  %v1323_v59 = vmul.f32 %v1320_v57, %v1320_v57 }
0x11f7   :  { %1333 = vadd.xlane.f32.xlu0 %v1332_v58  ;;  %1324 = vadd.xlane.f32.xlu1 %v1323_v59 }
0x1284   :  { %v1325_v62 = vpop.xlane.xlu1 %1324  ;;  %v1334_v0 = vpop.xlane.xlu0 %1333 }
0x1285   :  { %v1326_v63 = vsub.f32 %v1322_v61, %v1325_v62  ;;  %v1335_v1 = vsub.f32 %v1784_v60, %v1334_v0  ;;  %v906_v0 = vmul.f32 %v1799_v22, %v1795_v27 }
0x1287   :  { %1550 = vrsqrt.f32 %v1326_v63 }
0x1291   :  { %v1551_v2 = vpop.eup %1550 }
0x1292   :  { %v1336_v6 = vmul.f32 %v1551_v2, %v1335_v1  ;;  %v1422_v2 = vld [vmem:[#allocation0 + $0x1f] ss:$0 sm:$0xff] }
0x1294   :  { %v1339_v7 = vsel %vm1338_vm5, %v1336_v6, 0.0 }
0x1295   :  { %v1340_v8 = vadd.f32 %v1339_v7, %v1315_v36  ;;  %v903_v7 = vld [vmem:[#allocation0 + $0x8] sm:$0xff] }
0x1297   :  { %1342 = vst [vmem:[#allocation1 + $0x18] sm:$0xff] %v1340_v8 }
0x129e   :  { %v1345_v9 = vld [vmem:[#allocation1 + $0x1c] ss:$0 sm:$0xff] }
0x129f   :  { %v1357_v10 = vmul.f32 %v1345_v9, %v1340_v8  ;;  %v1348_v52 = vmul.f32 %v1345_v9, %v1345_v9 }
0x12a1   :  { %1358 = vadd.xlane.f32.xlu0 %v1357_v10  ;;  %1349 = vadd.xlane.f32.xlu1 %v1348_v52 }
0x132e   :  { %v1350_v13 = vpop.xlane.xlu1 %1349  ;;  %v1359_v15 = vpop.xlane.xlu0 %1358 }
0x132f   :  { %v1351_v14 = vsub.f32 %v1347_v11, %v1350_v13  ;;  %v1360_v5 = vsub.f32 %v1784_v60, %v1359_v15 }
0x1331   :  { %1552 = vrsqrt.f32 %v1351_v14 }
0x133b   :  { %v1553_v16 = vpop.eup %1552 }
0x133c   :  { %v1361_v17 = vmul.f32 %v1553_v16, %v1360_v5 }
0x133e   :  { %v1364_v19 = vsel %vm1363_vm8, %v1361_v17, 0.0 }
0x133f   :  { %v1365_v18 = vadd.f32 %v1364_v19, %v1340_v8 }
0x1341   :  { %1367 = vst [vmem:[#allocation1 + $0x18] sm:$0xff] %v1365_v18 }
0x1348   :  { %v1370_v3 = vld [vmem:[#allocation1 + $0x1d] ss:$0 sm:$0xff] }
0x1349   :  { %v1382_v23 = vmul.f32 %v1370_v3, %v1365_v18  ;;  %v1373_v24 = vmul.f32 %v1370_v3, %v1370_v3 }
0x134b   :  { %1383 = vadd.xlane.f32.xlu0 %v1382_v23  ;;  %1374 = vadd.xlane.f32.xlu1 %v1373_v24 }
0x13d8   :  { %v1375_v26 = vpop.xlane.xlu1 %1374  ;;  %v1384_v31 = vpop.xlane.xlu0 %1383 }
0x13d9   :  { %v1376_v30 = vsub.f32 %v1372_v25, %v1375_v26  ;;  %v1385_v21 = vsub.f32 %v1784_v60, %v1384_v31 }
0x13db   :  { %1554 = vrsqrt.f32 %v1376_v30 }
0x13e5   :  { %v1555_v29 = vpop.eup %1554 }
0x13e6   :  { %v1386_v33 = vmul.f32 %v1555_v29, %v1385_v21 }
0x13e8   :  { %v1389_v34 = vsel %vm1388_vm11, %v1386_v33, 0.0 }
0x13e9   :  { %v1390_v35 = vadd.f32 %v1389_v34, %v1365_v18 }
0x13eb   :  { %1392 = vst [vmem:[#allocation1 + $0x18] sm:$0xff] %v1390_v35 }
0x13f2   :  { %v1395_v37 = vld [vmem:[#allocation1 + $0x1e] ss:$0 sm:$0xff] }
0x13f3   :  { %v1407_v38 = vmul.f32 %v1395_v37, %v1390_v35  ;;  %v1398_v40 = vmul.f32 %v1395_v37, %v1395_v37 }
0x13f5   :  { %1408 = vadd.xlane.f32.xlu0 %v1407_v38  ;;  %1399 = vadd.xlane.f32.xlu1 %v1398_v40 }
0x13f9   :  { %489 = vadd.xlane.f32.xlu0 %v488_v42 }
0x13fd   :  { %1222 = vadd.xlane.f32.xlu0 %v1221_v20 }
0x1482   :  { %v1409_v45 = vpop.xlane.xlu0 %1408  ;;  %v1400_v47 = vpop.xlane.xlu1 %1399 }
0x1483   :  { %v1401_v48 = vsub.f32 %v1397_v43, %v1400_v47  ;;  %v1410_v57 = vsub.f32 %v1784_v60, %v1409_v45 }
0x1485   :  { %1556 = vrsqrt.f32 %v1401_v48 }
0x1486   :  { %v490_v51 = vpop.xlane.xlu0 %489 }
0x1487   :  { %v491_v39 = vsub.f32 %v486_v50, %v490_v51 }
0x1489   :  { %v492_v54 = vmul.f32 %v1733_v32, %v491_v39 }
0x148a   :  { %v1223_v46 = vpop.xlane.xlu0 %1222 }
0x148b   :  { %v495_v55 = vsel %vm494_vm9, %v492_v54, 0.0  ;;  %v1224_v56 = vsub.f32 %v1777_v44, %v1223_v46 }
0x148c   :  { %v496_v4 = vadd.f32 %v495_v55, %v487_v28 }
0x148d   :  { %v1225_v36 = vmul.f32 %v1853_v12, %v1224_v56 }
0x148e   :  { %497 = vst [vmem:[#allocation1] sm:$0xff] %v496_v4  ;;  %1477 = vst [vmem:[%s1901_s1] sm:$0xff] %v496_v4 }
0x148f   :  { %v1557_v58 = vpop.eup %1556  ;;  %v1228_v32 = vsel %vm1227_vm13, %v1225_v36, 0.0 }
0x1490   :  { %v1411_v59 = vmul.f32 %v1557_v58, %v1410_v57  ;;  %v1229_v44 = vadd.f32 %v1228_v32, %v1844_v53 }
0x1492   :  { %v1414_v61 = vsel %vm1413_vm4, %v1411_v59, 0.0  ;;  %1231 = vst [vmem:[#allocation1 + $0x10] sm:$0xff] %v1229_v44  ;;  %1481 = vst [vmem:[%s1901_s1 + $0x10] sm:$0xff] %v1229_v44 }
0x1493   :  { %v1415_v12 = vadd.f32 %v1414_v61, %v1390_v35 }
0x1495   :  { %1417 = vst [vmem:[#allocation1 + $0x18] sm:$0xff] %v1415_v12 }
0x149c   :  { %v1420_v62 = vld [vmem:[#allocation1 + $0x1f] ss:$0 sm:$0xff] }
0x149d   :  { %v1423_v63 = vmul.f32 %v1420_v62, %v1420_v62  ;;  %v1432_v1 = vmul.f32 %v1420_v62, %v1415_v12 }
0x149f   :  { %1424 = vadd.xlane.f32.xlu1 %v1423_v63 }
0x14a3   :  { %907 = vadd.xlane.f32.xlu1 %v906_v0 }
0x14a7   :  { %1433 = vadd.xlane.f32.xlu1 %v1432_v1 }
0x152c   :  { %v1425_v6 = vpop.xlane.xlu1 %1424 }
0x152d   :  { %v1426_v53 = vsub.f32 %v1422_v2, %v1425_v6 }
0x152f   :  { %1558 = vrsqrt.f32 %v1426_v53 }
0x1530   :  { %v908_v8 = vpop.xlane.xlu1 %907 }
0x1531   :  { %v909_v9 = vsub.f32 %v903_v7, %v908_v8 }
0x1533   :  { %v910_v10 = vmul.f32 %v1809_v49, %v909_v9 }
0x1534   :  { %v1434_v11 = vpop.xlane.xlu1 %1433 }
0x1535   :  { %v913_v52 = vsel %vm912_vm1, %v910_v10, 0.0  ;;  %v1435_v22 = vsub.f32 %v1784_v60, %v1434_v11 }
0x1536   :  { %v914_v13 = vadd.f32 %v913_v52, %v1795_v27 }
0x1538   :  { %916 = vst [vmem:[#allocation1 + $0x8] sm:$0xff] %v914_v13  ;;  %1479 = vst [vmem:[%s1901_s1 + $0x8] sm:$0xff] %v914_v13 }
0x1539   :  { %v1559_v14 = vpop.eup %1558 }
0x153a   :  { %v1436_v15 = vmul.f32 %v1559_v14, %v1435_v22 }
0x153c   :  { %v1439_v5 = vsel %vm1438_vm15, %v1436_v15, 0.0 }
0x153d   :  { %v1440_v16 = vadd.f32 %v1439_v5, %v1415_v12 }
0x153f   :  { %1442 = vst [vmem:[#allocation1 + $0x18] sm:$0xff] %v1440_v16  ;;  %1483 = vst [vmem:[%s1901_s1 + $0x18] sm:$0xff] %v1440_v16 }

// kernel: custom-call.22
= control target key start
LH: loop header
LB: loop body
LE: loop exit
PB: predicated region body
PF: predicated region fallthrough
CT: control target
= control target key end

     0   :  { %5 = vsyncpa [#allocation4], 0  ;;  %s979_s0 = inlined_call_operand.vmem [shape: f32[32,32], index: 0, kind: input, shape index: {}]   ;;  %s980_s1 = inlined_call_operand.vmem [shape: f32[32,32], index: 1, kind: output, shape index: {0}]   ;;  %s981_s2 = inlined_call_operand.hbm [shape: s32[32], index: 2, kind: output, shape index: {1}]   ;;  %s982_s3 = inlined_call_operand.vmem [shape: s32[32], index: 3, kind: output, shape index: {2}]  }
   0x1   :  { %s19_s14 = scalar_lea.vmem %s979_s0, 24 }
   0x2   :  { %p518_p0 = scmp.gt.s32.totalorder %s979_s0, %s19_s14 }
   0x3   :  { %s815_s17 = smov (!%p518_p0), [#allocation0]   ;;  %s819_s20 = smov (!%p518_p0), %s979_s0  }
   0x4   :  { %519 = sbr.rel (%p518_p0) target bundleno = 21 (0x15), region = 165 }
   0xb LB: > { %v53_v0 = vld [vmem:[%s821_s20] sm:$0xff]  ;;  %s55_s20 = scalar_lea.vmem %s821_s20, 8   ;;  %s821_s20 = sphi %s819_s20, %s55_s20   ;;  %s817_s17 = sphi %s815_s17, %s56_s17  }
   0xc   : > { %54 = vst [vmem:[%s817_s17] sm:$0xff] %v53_v0  ;;  %s56_s17 = scalar_lea.vmem %s817_s17, 8   ;;  %p50_p1 = scmp.gt.s32.totalorder %s55_s20, %s19_s14 }
   0xe   :  { %52 = sbr.rel (!%p50_p1) target bundleno = 11 (0xb), region = 171 }
  0x15 PF:  { %v68_v1 = vld [vmem:[#allocation0] sm:$0xff]  ;;  %v72_v2 = vld [vmem:[#allocation0 + $0x8] sm:$0xff]  ;;  %v76_v3 = vld [vmem:[#allocation0 + $0x10] sm:$0xff]  ;;  %v83_v4 = vlaneseq  ;;  %v839_v6 = vmov 0   ;;  %s823_s0 = smov 0  }
  0x16   :  { %69 = vst [vmem:[#allocation1] sm:$0xff] %v68_v1  ;;  %73 = vst [vmem:[#allocation1 + $0x8] sm:$0xff] %v72_v2  ;;  %v80_v5 = vld [vmem:[#allocation0 + $0x18] sm:$0xff] }
  0x17   :  { %77 = vst [vmem:[#allocation1 + $0x10] sm:$0xff] %v76_v3  ;;  %82 = vst [vmem:[#allocation2] sm:$0x1] %v839_v6  ;;  %v871_v7 = vshrl.u32 %v83_v4, 7 }
  0x18   :  { %81 = vst [vmem:[#allocation1 + $0x18] sm:$0xff] %v80_v5 }
  0x19 LB: > { %s576_s21 = sshll.u32 %s825_s0, 3  ;;  %s91_s0 = sadd.s32 1, %s825_s0   ;;  %s825_s0 = sphi %s823_s0, %s91_s0  }
  0x1a   : > { %v95_v8 = vstv %s576_s21  ;;  %s93_s22 = scalar_lea.vmem [#allocation7], %s576_s21  ;;  %p88_p2 = scmp.ge.s32.totalorder %s91_s0, 4  }
  0x1b   : > { %v96_v9 = vadd.s32 %v95_v8, %v871_v7  ;;  %s874_s23 = smov (%p88_p2), 0  }
  0x1c   :  { %90 = sbr.rel (!%p88_p2) target bundleno = 25 (0x19), region = 182 }
  0x1d   : > { %97 = vst [vmem:[%s93_s22] sm:$0xff] %v96_v9 }
  0x23 LB: > { %v108_v10 = vld [vmem:[#allocation1] sm:$0xff]  ;;  %v120_v11 = vld [vmem:[#allocation1 + $0x8] sm:$0xff]  ;;  %v880_v12 = vadd.s32 8, %v871_v7  ;;  %v883_v14 = vstv %s829_s23  ;;  %v132_v16 = vld [vmem:[#allocation1 + $0x10] sm:$0xff]  ;;  %v888_v17 = vadd.s32 16, %v871_v7  ;;  %v895_v22 = vadd.s32 24, %v871_v7  ;;  %s829_s23 = sphi %s874_s23, %s103_s23  }
  0x24   : > { %v109_v13 = vand.u32 2147483647, %v108_v10  ;;  %v121_v15 = vand.u32 2147483647, %v120_v11  ;;  %vm112_vm0 = vcmp.ge.s32.totalorder %v871_v7, %v883_v14  ;;  %v133_v20 = vand.u32 2147483647, %v132_v16 }
  0x25   : > { %vm124_vm3 = vcmp.ge.s32.totalorder %v880_v12, %v883_v14  ;;  %v144_v21 = vld [vmem:[#allocation1 + $0x18] sm:$0xff]  ;;  %vm136_vm6 = vcmp.ge.s32.totalorder %v888_v17, %v883_v14  ;;  %vm148_vm9 = vcmp.ge.s32.totalorder %v895_v22, %v883_v14  ;;  %s190_s24 = ssub.s32 128, %s829_s23  ;;  %v196_v58 = vand.u32 127, %v83_v4  ;;  %v199_v60 = vld [vmem:[#allocation2] ss:$0 sm:$0xff]  ;;  %s202_s25 = scalar_lea.vmem [#allocation1], %s829_s23 }
  0x26   : > { %vm578_vm1 = vcmp.gt.f32.partialorder %v109_v13, -inf  ;;  %v145_v25 = vand.u32 2147483647, %v144_v21  ;;  %v204_v61 = vld [vmem:[%s202_s25] ss:$0 sm:$0xff]  ;;  %s208_s27 = scalar_lea.vmem [#allocation7], %s829_s23 }
  0x27   : > { %vm116_vm2 = vmand %vm112_vm0, %vm578_vm1  ;;  %v210_v62 = vld [vmem:[%s208_s27] ss:$0 sm:$0xff]  ;;  %s103_s23 = sadd.s32 1, %s829_s23  }
  0x28   : > { %v117_v18 = vsel %vm116_vm2, %v871_v7, %v883_v14  ;;  %v118_v19 = vsel %vm116_vm2, %v109_v13, -inf  ;;  %p100_p3 = scmp.ge.s32.totalorder %s103_s23, 32  }
  0x29   : > { %vm127_vm4 = vcmp.lt.f32.partialorder %v118_v19, %v121_v15  ;;  %s831_s5 = smov (%p100_p3), %s980_s1   ;;  %s835_s6 = smov (%p100_p3), [#allocation1]  }
  0x2a   : > { %vm128_vm5 = vmand %vm124_vm3, %vm127_vm4  ;;  %vm907_vm3 = vcmp.eq.s32.totalorder %v196_v58, %v883_v14 }
  0x2b   : > { %v129_v23 = vsel %vm128_vm5, %v880_v12, %v117_v18  ;;  %v130_v24 = vsel %vm128_vm5, %v121_v15, %v118_v19  ;;  %vm243_vm5 = vcmp.gt.s32.totalorder %v880_v12, %v883_v14 }
  0x2c   : > { %vm139_vm7 = vcmp.lt.f32.partialorder %v130_v24, %v133_v20 }
  0x2d   : > { %vm140_vm8 = vmand %vm136_vm6, %vm139_vm7  ;;  %vm228_vm6 = vcmp.gt.s32.totalorder %v871_v7, %v883_v14  ;;  %vm258_vm7 = vcmp.gt.s32.totalorder %v888_v17, %v883_v14 }
  0x2e   : > { %v141_v26 = vsel %vm140_vm8, %v888_v17, %v129_v23  ;;  %v142_v27 = vsel %vm140_vm8, %v133_v20, %v130_v24 }
  0x2f   : > { %vm151_vm10 = vcmp.lt.f32.partialorder %v142_v27, %v145_v25 }
  0x30   : > { %vm152_vm11 = vmand %vm148_vm9, %vm151_vm10  ;;  %vm273_vm9 = vcmp.gt.s32.totalorder %v895_v22, %v883_v14 }
  0x31   : > { %v153_v28 = vsel %vm152_vm11, %v895_v22, %v141_v26  ;;  %v154_v29 = vsel %vm152_vm11, %v145_v25, %v142_v27  ;;  %vm247_vm10 = vmand %vm243_vm5, %vm907_vm3 }
  0x32   : > { %v155_v30 = vrot.slane %v154_v29, 1  ;;  %v156_v31 = vrot.slane %v153_v28, 1  ;;  %vm232_vm11 = vmand %vm228_vm6, %vm907_vm3 }
  0x34   : > { %vm157_vm12 = vcmp.ge.f32.partialorder %v155_v30, %v154_v29  ;;  %v160_v32 = vrot.slane %v155_v30, 1  ;;  %v161_v33 = vrot.slane %v156_v31, 1 }
  0x35   : > { %v158_v34 = vsel %vm157_vm12, %v155_v30, %v154_v29  ;;  %v159_v35 = vsel %vm157_vm12, %v156_v31, %v153_v28  ;;  %vm262_vm12 = vmand %vm258_vm7, %vm907_vm3 }
  0x36   : > { %vm162_vm13 = vcmp.ge.f32.partialorder %v160_v32, %v158_v34  ;;  %v165_v36 = vrot.slane %v160_v32, 1  ;;  %v166_v37 = vrot.slane %v161_v33, 1 }
  0x37   : > { %v163_v38 = vsel %vm162_vm13, %v160_v32, %v158_v34  ;;  %v164_v39 = vsel %vm162_vm13, %v161_v33, %v159_v35  ;;  %vm277_vm13 = vmand %vm273_vm9, %vm907_vm3 }
  0x38   : > { %vm167_vm14 = vcmp.ge.f32.partialorder %v165_v36, %v163_v38  ;;  %v170_v40 = vrot.slane %v165_v36, 1  ;;  %v171_v41 = vrot.slane %v166_v37, 1 }
  0x39   : > { %v168_v42 = vsel %vm167_vm14, %v165_v36, %v163_v38  ;;  %v169_v43 = vsel %vm167_vm14, %v166_v37, %v164_v39  ;;  %vm220_vm14 = vcmp.gt.s32.totalorder %v196_v58, %v883_v14 }
  0x3a   : > { %vm172_vm15 = vcmp.ge.f32.partialorder %v170_v40, %v168_v42  ;;  %v175_v44 = vrot.slane %v170_v40, 1  ;;  %v176_v45 = vrot.slane %v171_v41, 1 }
  0x3b   : > { %v173_v46 = vsel %vm172_vm15, %v170_v40, %v168_v42  ;;  %v174_v47 = vsel %vm172_vm15, %v171_v41, %v169_v43 }
  0x3c   : > { %vm177_vm0 = vcmp.ge.f32.partialorder %v175_v44, %v173_v46  ;;  %v180_v48 = vrot.slane %v175_v44, 1  ;;  %v181_v49 = vrot.slane %v176_v45, 1 }
  0x3d   : > { %v178_v50 = vsel %vm177_vm0, %v175_v44, %v173_v46  ;;  %v179_v51 = vsel %vm177_vm0, %v176_v45, %v174_v47 }
  0x3e   : > { %vm182_vm1 = vcmp.ge.f32.partialorder %v180_v48, %v178_v50  ;;  %v185_v52 = vrot.slane %v180_v48, 1  ;;  %v186_v53 = vrot.slane %v181_v49, 1 }
  0x3f   : > { %v183_v54 = vsel %vm182_vm1, %v180_v48, %v178_v50  ;;  %v184_v55 = vsel %vm182_vm1, %v181_v49, %v179_v51 }
  0x40   : > { %vm187_vm2 = vcmp.ge.f32.partialorder %v185_v52, %v183_v54 }
  0x41   : > { %v189_v56 = vsel %vm187_vm2, %v186_v53, %v184_v55 }
  0x42   : > { %191 = vrot.lane.b32.xlu0 %v189_v56, %s190_s24 }
  0xb4   : > { %v192_v57 = vpop.permute.xlu0 %191 }
  0xb5   : > { %586 = vpush %v192_v57 }
  0xe6   : > { %s587_s26 = spop %586 }
  0xe7   : > { %v198_v63 = vstv %s587_s26  ;;  %s203_s28 = scalar_lea.vmem [#allocation1], %s587_s26  ;;  %s209_s29 = scalar_lea.vmem [#allocation7], %s587_s26 }
  0xe8   : > { %v200_v0 = vsel %vm907_vm3, %v198_v63, %v199_v60  ;;  %v205_v1 = vld [vmem:[%s203_s28] ss:$0 sm:$0xff] }
  0xe9   : > { %v211_v2 = vld [vmem:[%s209_s29] ss:$0 sm:$0xff]  ;;  %201 = vst [vmem:[#allocation2] sm:$0x1] %v200_v0  ;;  %206 = vst [vmem:[%s203_s28] sm:$0x1] %v204_v61  ;;  %vm214_vm4 = vcmp.ne.f32.partialorder %v205_v1, 0.0 }
  0xea   : > { %212 = vst [vmem:[%s209_s29] sm:$0x1] %v210_v62  ;;  %207 = vst [vmem:[%s202_s25] sm:$0x1] %v205_v1  ;;  %v221_v29 = vsel %vm220_vm14, %v205_v1, 0.0 }
  0xeb   : > { %213 = vst [vmem:[%s208_s27] sm:$0x1] %v211_v2  ;;  %vm215_vm8 = vmand %vm907_vm3, %vm214_vm4 }
  0xec   : > { %v216_v3 = vsel %vm215_vm8, %v205_v1, 1.0 }
  0xed   : > { %v244_v5 = vsel %vm243_vm5, %v216_v3, 1.0  ;;  %v229_v6 = vsel %vm228_vm6, %v216_v3, 1.0  ;;  %v259_v8 = vsel %vm258_vm7, %v216_v3, 1.0  ;;  %v274_v9 = vsel %vm273_vm9, %v216_v3, 1.0 }
  0xee   : > { %719 = vrcp.f32 %v244_v5 }
  0xef   : > { %721 = vrcp.f32 %v229_v6 }
  0xf0   : > { %723 = vrcp.f32 %v259_v8  ;;  %v339_v42 = vld [vmem:[#allocation2] sm:$0x1] (%p100_p3) }
  0xf1   : > { %725 = vrcp.f32 %v274_v9  ;;  %v240_v11 = vld [vmem:[#allocation1 + $0x8] sm:$0xff]  ;;  %v225_v16 = vld [vmem:[#allocation1] sm:$0xff]  ;;  %v255_v20 = vld [vmem:[#allocation1 + $0x10] sm:$0xff]  ;;  %341 = vst [vmem:[#allocation3] sm:$0x1] (%p100_p3), %v339_v42 }
  0xf2   : > { %v270_v12 = vld [vmem:[#allocation1 + $0x18] sm:$0xff]  ;;  %v288_v41 = vld [vmem:[#allocation7 + $0x10] sm:$0xff] (%p100_p3)  ;;  %v290_v43 = vld [vmem:[#allocation7 + $0x18] sm:$0xff] (%p100_p3) }
  0xf3   :  { %v284_v14 = vld [vmem:[#allocation7] sm:$0xff] (%p100_p3)  ;;  %v286_v40 = vld [vmem:[#allocation7 + $0x8] sm:$0xff] (%p100_p3) }
  0xf8   : > { %v720_v10 = vpop.eup %719 }
  0xf9   : > { %v722_v13 = vpop.eup %721  ;;  %v246_v15 = vmul.f32 %v720_v10, %v240_v11 }
  0xfa   : > { %v724_v18 = vpop.eup %723  ;;  %v231_v19 = vmul.f32 %v722_v13, %v225_v16 }
  0xfb   : > { %v248_v21 = vsel %vm247_vm10, %v246_v15, 0.0  ;;  %v261_v23 = vmul.f32 %v724_v18, %v255_v20  ;;  %v726_v24 = vpop.eup %725 }
  0xfc   : > { %249 = vadd.xlane.f32.xlu1 %v248_v21  ;;  %v233_v25 = vsel %vm232_vm11, %v231_v19, 0.0  ;;  %v276_v27 = vmul.f32 %v726_v24, %v270_v12 }
  0xfd   : > { %234 = vadd.xlane.f32.xlu0 %v233_v25  ;;  %v263_v26 = vsel %vm262_vm12, %v261_v23, 0.0 }
  0xfe   : > { %v278_v28 = vsel %vm277_vm13, %v276_v27, 0.0 }
 0x100   : > { %264 = vadd.xlane.f32.xlu1 %v263_v26 }
 0x104   : > { %279 = vadd.xlane.f32.xlu1 %v278_v28 }
 0x12a   :  { %303 = vxpose.xlu0.b32.start [1/4] (short) (narrow) (%p100_p3), %v284_v14, 8 }
 0x12e   :  { %304 = vxpose.xlu0.b32.cont [2/4] (short) (narrow) (%p100_p3), %v286_v40, 8 }
 0x132   :  { %305 = vxpose.xlu0.b32.cont [3/4] (short) (narrow) (%p100_p3), %v288_v41, 8 }
 0x136   :  { %306 = vxpose.xlu0.b32.end [4/4] (short) (narrow) (%p100_p3), %v290_v43, 8 }
 0x189   : > { %v250_v30 = vpop.xlane.xlu1 %249 }
 0x18a   : > { %v251_v31 = vmul.f32 %v250_v30, %v221_v29  ;;  %v235_v17 = vpop.xlane.xlu0 %234 }
 0x18b   : > { %v236_v32 = vmul.f32 %v235_v17, %v221_v29 }
 0x18c   : > { %v252_v33 = vsub.f32 %v246_v15, %v251_v31 }
 0x18d   : > { %v237_v34 = vsub.f32 %v231_v19, %v236_v32  ;;  %v265_v35 = vpop.xlane.xlu1 %264 }
 0x18e   : > { %253 = vst [vmem:[#allocation1 + $0x8] sm:$0xff] %v252_v33  ;;  %v266_v36 = vmul.f32 %v265_v35, %v221_v29 }
 0x18f   : > { %238 = vst [vmem:[#allocation1] sm:$0xff] %v237_v34 }
 0x190   : > { %v267_v37 = vsub.f32 %v261_v23, %v266_v36 }
 0x191   : > { %v280_v38 = vpop.xlane.xlu1 %279 }
 0x192   : > { %268 = vst [vmem:[#allocation1 + $0x10] sm:$0xff] %v267_v37  ;;  %v281_v22 = vmul.f32 %v280_v38, %v221_v29 }
 0x194   : > { %v282_v39 = vsub.f32 %v276_v27, %v281_v22  ;;  %102 = sbr.rel (!%p100_p3) target bundleno = 35 (0x23), region = 193 }
 0x196   : > { %283 = vst [vmem:[#allocation1 + $0x18] sm:$0xff] %v282_v39 }
 0x1aa   :  { %v319_v44 = vpop.trf.xlu0 }
 0x1ab   :  { %335 = vst [vmem:[#allocation5] sm:$0x1] %v319_v44 }
 0x1b2   :  { %v345_v45 = vld [vmem:[#allocation5] sm:$0x1] }
 0x1b3   :  { %347 = vst [vmem:[#allocation6] sm:$0x1] %v345_v45 }
 0x1b4 LB: > { %v395_v4 = vld [vmem:[%s837_s6] sm:$0xff]  ;;  %s397_s6 = scalar_lea.vmem %s837_s6, 8   ;;  %s837_s6 = sphi %s835_s6, %s397_s6   ;;  %s833_s5 = sphi %s831_s5, %s398_s5  }
 0x1b5   : > { %396 = vst [vmem:[%s833_s5] sm:$0xff] %v395_v4  ;;  %s398_s5 = scalar_lea.vmem %s833_s5, 8   ;;  %p392_p4 = scmp.gt.s32.totalorder %s397_s6, [#allocation1 + $0x18] }
 0x1b6   :  { %s840_s7 = smov (%p392_p4), [#allocation3]  }
 0x1b7   :  { %394 = sbr.rel (!%p392_p4) target bundleno = 436 (0x1b4), region = 215  ;;  %s415_s8 = sshll.u32 (%p392_p4), %s840_s7, 4  ;;  %s416_s8 = int_to_ptr.vmem [resolvable:$true] %s415_s8 }
 0x1b8   :  { %s727_s1 = scalar_lea.vmem (%p392_p4), %s416_s8, 16  ;;  %s731_s11 = scalar_lea.vmem (%p392_p4), %s416_s8, 32 }
 0x1b9   :  { %p728_p5 = scmp.ne.s32.totalorder (%p392_p4), %s416_s8, %s727_s1  ;;  %p732_p6 = scmp.lt.s32.totalorder (%p392_p4), %s416_s8, %s416_s8 }
 0x1ba   :  { %v481_v7 = vld [vmem:[#allocation6] sm:$0x1] (%p392_p4)  ;;  %p733_p7 = scmp.lt.s32.totalorder (%p392_p4), %s731_s11, %s727_s1 }
 0x1bb   :  { %482 = vst [vmem:[%s982_s3] sm:$0x1] (%p392_p4), %v481_v7 }
 0x1bc   :  { %p734_p8 = por (%p392_p4), %p733_p7, %p732_p6 }
 0x1be   :  { %p735_p9 = pnand %p734_p8, %p728_p5 }
 0x1c0   :  { %738 = shalt.err (!%p735_p9)
}
 0x1c1   :  { %s739_s14 = scalar_lea.hbm %s981_s2, 16 }
 0x1c2   :  { %p740_p10 = scmp.ne.s32.totalorder %s981_s2, %s739_s14  ;;  %p743_p11 = scmp.lt.u32.totalorder %s739_s14, %s981_s2 }
 0x1c4   :  { %p745_p12 = pnand %p743_p11, %p740_p10 }
 0x1c6   :  { %748 = shalt.err (!%p745_p12)
}
 0x1c7   :  { %418 = dma.vmem_to_hbm [thread:$0]  %s416_s8, 16, %s981_s2, [#allocation4]  }
 0x1c8   :  { %813 = dma.done.wait [#allocation4], 16  }
 0x1c9   :  { %814 = vsyncadd [#allocation4], 4294967280 }
 0x1ca   :  { %488 = vsyncpa [#allocation4], 1 }

// kernel: custom-call.23
= control target key start
LH: loop header
LB: loop body
LE: loop exit
PB: predicated region body
PF: predicated region fallthrough
CT: control target
= control target key end

     0   :  { %v46_v0 = vlaneseq  ;;  %v729_v10 = vmov -1.0   ;;  %v730_v48 = vmov 0.0   ;;  %s1003_s0 = inlined_call_operand.vmem [shape: f32[1,32,32], index: 0, kind: input, shape index: {}]   ;;  %s1004_s1 = inlined_call_operand.vmem [shape: f32[1,32,32], index: 1, kind: output, shape index: {}]  }
   0x1   :  { %v41_v3 = vld [vmem:[%s1003_s0 + $0x18] sm:$0xff]  ;;  %v39_v37 = vld [vmem:[%s1003_s0 + $0x10] sm:$0xff] }
   0x2   :  { %v741_v1 = vand.u32 127, %v46_v0  ;;  %v743_v2 = vshrl.u32 %v46_v0, 7 }
   0x4   :  { %vm48_vm0 = vcmp.lt.s32.totalorder %v741_v1, 32  ;;  %v99_v4 = vadd.s32 24, %v743_v2  ;;  %vm140_vm4 = vcmp.eq.s32.totalorder %v741_v1, 31  ;;  %vm148_vm6 = vcmp.eq.s32.totalorder %v741_v1, 30 }
   0x5   :  { %v141_v11 = vsel %vm140_vm4, 1.0, %v729_v10  ;;  %vm158_vm7 = vcmp.eq.s32.totalorder %v741_v1, 29  ;;  %vm168_vm8 = vcmp.eq.s32.totalorder %v741_v1, 28  ;;  %vm178_vm9 = vcmp.eq.s32.totalorder %v741_v1, 27 }
   0x6   :  { %vm100_vm1 = vcmp.eq.s32.totalorder %v99_v4, %v741_v1  ;;  %vm105_vm2 = vcmp.le.s32.totalorder %v99_v4, %v741_v1  ;;  %vm137_vm5 = vcmp.eq.s32.totalorder %v741_v1, %v99_v4  ;;  %v83_v32 = vadd.s32 16, %v743_v2 }
   0x7   :  { %v102_v5 = vsel %vm100_vm1, %v41_v3, 0.0  ;;  %vm106_vm3 = vmand %vm105_vm2, %vm48_vm0  ;;  %v142_v12 = vsel %vm137_vm5, %v141_v11, 0.0  ;;  %vm188_vm11 = vcmp.eq.s32.totalorder %v741_v1, 26  ;;  %vm198_vm15 = vcmp.eq.s32.totalorder %v741_v1, 25 }
   0x8   :  { %v107_v6 = vsel %vm106_vm3, %v41_v3, 0.0  ;;  %103 = vadd.xlane.f32.xlu0 %v102_v5  ;;  %vm84_vm10 = vcmp.eq.s32.totalorder %v83_v32, %v741_v1  ;;  %vm89_vm12 = vcmp.le.s32.totalorder %v83_v32, %v741_v1  ;;  %vm130_vm14 = vcmp.eq.s32.totalorder %v741_v1, %v83_v32 }
   0x9   :  { %v86_v38 = vsel %vm84_vm10, %v39_v37, 0.0  ;;  %vm90_vm13 = vmand %vm89_vm12, %vm48_vm0  ;;  %v131_v49 = vsel %vm130_vm14, -1.0, %v730_v48  ;;  %vm218_vm1 = vcmp.eq.s32.totalorder %v741_v1, 23  ;;  %vm208_vm2 = vcmp.eq.s32.totalorder %v741_v1, 24 }
   0xa   :  { %v91_v45 = vsel %vm90_vm13, %v39_v37, 0.0  ;;  %vm232_vm3 = vcmp.eq.s32.totalorder %v741_v1, 22  ;;  %vm246_vm4 = vcmp.eq.s32.totalorder %v741_v1, 21  ;;  %vm260_vm5 = vcmp.eq.s32.totalorder %v741_v1, 20 }
   0xb   :  { %vm316_vm13 = vcmp.eq.s32.totalorder %v741_v1, 16  ;;  %vm330_vm14 = vcmp.eq.s32.totalorder %v741_v1, 15 }
  0x95   :  { %v754_v7 = vpop.xlane.xlu0 %103 }
  0x96   :  { %721 = vrcp.f32 %v754_v7 }
  0xa0   :  { %v757_v8 = vpop.eup %721 }
  0xa1   :  { %v109_v9 = vmul.f32 %v757_v8, %v107_v6 }
  0xa3   :  { %110 = vst [vmem:[#allocation2 + $0x18] sm:$0xff] %v109_v9 }
  0xaa   :  { %v144_v13 = vld [vmem:[#allocation2 + $0x1e] ss:$0 sm:$0xff]  ;;  %v154_v16 = vld [vmem:[#allocation2 + $0x1d] ss:$0 sm:$0xff]  ;;  %v164_v21 = vld [vmem:[#allocation2 + $0x1c] ss:$0 sm:$0xff] }
  0xab   :  { %v145_v14 = vxor.u32 2147483648, %v144_v13  ;;  %v155_v18 = vxor.u32 2147483648, %v154_v16  ;;  %v165_v23 = vxor.u32 2147483648, %v164_v21  ;;  %v174_v26 = vld [vmem:[#allocation2 + $0x1b] ss:$0 sm:$0xff] }
  0xac   :  { %v175_v28 = vxor.u32 2147483648, %v174_v26  ;;  %v184_v31 = vld [vmem:[#allocation2 + $0x1a] ss:$0 sm:$0xff]  ;;  %v194_v39 = vld [vmem:[#allocation2 + $0x19] ss:$0 sm:$0xff] }
  0xad   :  { %v149_v15 = vmul.f32 %v145_v14, %v142_v12  ;;  %v185_v34 = vxor.u32 2147483648, %v184_v31  ;;  %v195_v41 = vxor.u32 2147483648, %v194_v39  ;;  %v204_v53 = vld [vmem:[#allocation2 + $0x18] ss:$0 sm:$0xff]  ;;  %v67_v39 = vadd.s32 8, %v743_v2 }
  0xae   :  { %v205_v55 = vxor.u32 2147483648, %v204_v53 }
  0xaf   :  { %150 = vadd.xlane.f32.xlu0 %v149_v15  ;;  %vm123_vm12 = vcmp.eq.s32.totalorder %v741_v1, %v67_v39 }
 0x13c   :  { %v151_v17 = vpop.xlane.xlu0 %150 }
 0x13d   :  { %v152_v19 = vsel %vm148_vm6, %v151_v17, %v142_v12  ;;  %vm274_vm6 = vcmp.eq.s32.totalorder %v741_v1, 19 }
 0x13e   :  { %v159_v20 = vmul.f32 %v155_v18, %v152_v19 }
 0x140   :  { %160 = vadd.xlane.f32.xlu1 %v159_v20 }
 0x1cd   :  { %v161_v22 = vpop.xlane.xlu1 %160 }
 0x1ce   :  { %v162_v24 = vsel %vm158_vm7, %v161_v22, %v152_v19  ;;  %vm288_vm7 = vcmp.eq.s32.totalorder %v741_v1, 18 }
 0x1cf   :  { %v169_v25 = vmul.f32 %v165_v23, %v162_v24 }
 0x1d1   :  { %170 = vadd.xlane.f32.xlu1 %v169_v25 }
 0x25e   :  { %v171_v27 = vpop.xlane.xlu1 %170 }
 0x25f   :  { %v172_v29 = vsel %vm168_vm8, %v171_v27, %v162_v24  ;;  %vm68_vm8 = vcmp.eq.s32.totalorder %v67_v39, %v741_v1 }
 0x260   :  { %v179_v30 = vmul.f32 %v175_v28, %v172_v29 }
 0x262   :  { %180 = vadd.xlane.f32.xlu0 %v179_v30 }
 0x2ef   :  { %v181_v33 = vpop.xlane.xlu0 %180 }
 0x2f0   :  { %v182_v35 = vsel %vm178_vm9, %v181_v33, %v172_v29  ;;  %vm73_vm9 = vcmp.le.s32.totalorder %v67_v39, %v741_v1 }
 0x2f1   :  { %v189_v36 = vmul.f32 %v185_v34, %v182_v35  ;;  %vm74_vm10 = vmand %vm73_vm9, %vm48_vm0  ;;  %vm116_vm9 = vcmp.eq.s32.totalorder %v741_v1, %v743_v2 }
 0x2f3   :  { %190 = vadd.xlane.f32.xlu1 %v189_v36 }
 0x2f7   :  { %87 = vadd.xlane.f32.xlu1 %v86_v38 }
 0x380   :  { %v191_v40 = vpop.xlane.xlu1 %190 }
 0x381   :  { %v192_v42 = vsel %vm188_vm11, %v191_v40, %v182_v35  ;;  %vm302_vm11 = vcmp.eq.s32.totalorder %v741_v1, 17 }
 0x382   :  { %v199_v43 = vmul.f32 %v195_v41, %v192_v42 }
 0x384   :  { %200 = vadd.xlane.f32.xlu0 %v199_v43  ;;  %v772_v44 = vpop.xlane.xlu1 %87 }
 0x385   :  { %723 = vrcp.f32 %v772_v44 }
 0x38f   :  { %v778_v46 = vpop.eup %723 }
 0x390   :  { %v93_v47 = vmul.f32 %v778_v46, %v91_v45  ;;  %v37_v45 = vld [vmem:[%s1003_s0 + $0x8] sm:$0xff] }
 0x392   :  { %94 = vst [vmem:[#allocation2 + $0x10] sm:$0xff] %v93_v47  ;;  %v70_v47 = vsel %vm68_vm8, %v37_v45, 0.0 }
 0x399   :  { %v214_v50 = vld [vmem:[#allocation2 + $0x17] ss:$0 sm:$0xff]  ;;  %v228_v58 = vld [vmem:[#allocation2 + $0x16] ss:$0 sm:$0xff]  ;;  %v242_v4 = vld [vmem:[#allocation2 + $0x15] ss:$0 sm:$0xff] }
 0x39a   :  { %v215_v51 = vxor.u32 2147483648, %v214_v50  ;;  %v229_v59 = vxor.u32 2147483648, %v228_v58  ;;  %v243_v6 = vxor.u32 2147483648, %v242_v4  ;;  %v256_v14 = vld [vmem:[#allocation2 + $0x14] ss:$0 sm:$0xff] }
 0x39b   :  { %v257_v16 = vxor.u32 2147483648, %v256_v14  ;;  %v270_v22 = vld [vmem:[#allocation2 + $0x13] ss:$0 sm:$0xff]  ;;  %v284_v30 = vld [vmem:[#allocation2 + $0x12] ss:$0 sm:$0xff] }
 0x39c   :  { %v219_v52 = vmul.f32 %v215_v51, %v131_v49  ;;  %v271_v24 = vxor.u32 2147483648, %v270_v22  ;;  %v285_v32 = vxor.u32 2147483648, %v284_v30  ;;  %v298_v38 = vld [vmem:[#allocation2 + $0x11] ss:$0 sm:$0xff] }
 0x39d   :  { %v299_v41 = vxor.u32 2147483648, %v298_v38 }
 0x39e   :  { %220 = vadd.xlane.f32.xlu1 %v219_v52 }
 0x411   :  { %v201_v54 = vpop.xlane.xlu0 %200 }
 0x412   :  { %v202_v56 = vsel %vm198_vm15, %v201_v54, %v192_v42  ;;  %v75_v54 = vsel %vm74_vm10, %v37_v45, 0.0  ;;  %vm348_vm15 = vcmp.eq.s32.totalorder %v741_v1, 14  ;;  %vm474_vm10 = vcmp.eq.s32.totalorder %v741_v1, 7 }
 0x413   :  { %v209_v57 = vmul.f32 %v205_v55, %v202_v56 }
 0x415   :  { %210 = vadd.xlane.f32.xlu0 %v209_v57 }
 0x42b   :  { %v221_v60 = vpop.xlane.xlu1 %220 }
 0x42c   :  { %v222_v61 = vsel %vm218_vm1, %v221_v60, %v131_v49 }
 0x42d   :  { %v233_v62 = vmul.f32 %v229_v59, %v222_v61 }
 0x42f   :  { %234 = vadd.xlane.f32.xlu1 %v233_v62 }
 0x4a2   :  { %v211_v63 = vpop.xlane.xlu0 %210 }
 0x4a3   :  { %v212_v0 = vsel %vm208_vm2, %v211_v63, %v202_v56  ;;  %vm384_vm2 = vcmp.eq.s32.totalorder %v741_v1, 12 }
 0x4a4   :  { %v223_v3 = vmul.f32 %v215_v51, %v212_v0 }
 0x4a6   :  { %224 = vadd.xlane.f32.xlu0 %v223_v3  ;;  %v124_v3 = vsel %vm123_vm12, -1.0, %v730_v48  ;;  %vm518_vm12 = vcmp.eq.s32.totalorder %v741_v1, 5 }
 0x4bc   :  { %v235_v5 = vpop.xlane.xlu1 %234 }
 0x4bd   :  { %v236_v9 = vsel %vm232_vm3, %v235_v5, %v222_v61 }
 0x4be   :  { %v247_v10 = vmul.f32 %v243_v6, %v236_v9 }
 0x4c0   :  { %248 = vadd.xlane.f32.xlu1 %v247_v10 }
 0x533   :  { %v225_v11 = vpop.xlane.xlu0 %224 }
 0x534   :  { %v226_v12 = vsel %vm218_vm1, %v225_v11, %v212_v0  ;;  %vm366_vm1 = vcmp.eq.s32.totalorder %v741_v1, 13 }
 0x535   :  { %v237_v13 = vmul.f32 %v229_v59, %v226_v12  ;;  %v312_v59 = vld [vmem:[#allocation2 + $0x10] ss:$0 sm:$0xff] }
 0x536   :  { %v313_v63 = vxor.u32 2147483648, %v312_v59 }
 0x537   :  { %238 = vadd.xlane.f32.xlu0 %v237_v13 }
 0x54d   :  { %v249_v15 = vpop.xlane.xlu1 %248 }
 0x54e   :  { %v250_v17 = vsel %vm246_vm4, %v249_v15, %v236_v9 }
 0x54f   :  { %v261_v18 = vmul.f32 %v257_v16, %v250_v17 }
 0x551   :  { %262 = vadd.xlane.f32.xlu1 %v261_v18 }
 0x5c4   :  { %v239_v19 = vpop.xlane.xlu0 %238 }
 0x5c5   :  { %v240_v20 = vsel %vm232_vm3, %v239_v19, %v226_v12  ;;  %vm402_vm3 = vcmp.eq.s32.totalorder %v741_v1, 11 }
 0x5c6   :  { %v251_v21 = vmul.f32 %v243_v6, %v240_v20 }
 0x5c8   :  { %252 = vadd.xlane.f32.xlu0 %v251_v21 }
 0x5de   :  { %v263_v23 = vpop.xlane.xlu1 %262 }
 0x5df   :  { %v264_v25 = vsel %vm260_vm5, %v263_v23, %v250_v17 }
 0x5e0   :  { %v275_v26 = vmul.f32 %v271_v24, %v264_v25 }
 0x5e2   :  { %276 = vadd.xlane.f32.xlu1 %v275_v26 }
 0x655   :  { %v253_v27 = vpop.xlane.xlu0 %252 }
 0x656   :  { %v254_v28 = vsel %vm246_vm4, %v253_v27, %v240_v20  ;;  %vm420_vm4 = vcmp.eq.s32.totalorder %v741_v1, 10 }
 0x657   :  { %v265_v29 = vmul.f32 %v257_v16, %v254_v28 }
 0x659   :  { %266 = vadd.xlane.f32.xlu0 %v265_v29 }
 0x66f   :  { %v277_v31 = vpop.xlane.xlu1 %276 }
 0x670   :  { %v278_v33 = vsel %vm274_vm6, %v277_v31, %v264_v25 }
 0x671   :  { %v289_v34 = vmul.f32 %v285_v32, %v278_v33 }
 0x673   :  { %290 = vadd.xlane.f32.xlu1 %v289_v34 }
 0x6e6   :  { %v267_v35 = vpop.xlane.xlu0 %266 }
 0x6e7   :  { %v268_v36 = vsel %vm260_vm5, %v267_v35, %v254_v28  ;;  %vm52_vm5 = vcmp.eq.s32.totalorder %v743_v2, %v741_v1 }
 0x6e8   :  { %v279_v37 = vmul.f32 %v271_v24, %v268_v36 }
 0x6ea   :  { %280 = vadd.xlane.f32.xlu0 %v279_v37 }
 0x700   :  { %v291_v40 = vpop.xlane.xlu1 %290 }
 0x701   :  { %v292_v42 = vsel %vm288_vm7, %v291_v40, %v278_v33 }
 0x702   :  { %v303_v43 = vmul.f32 %v299_v41, %v292_v42 }
 0x704   :  { %304 = vadd.xlane.f32.xlu1 %v303_v43 }
 0x708   :  { %71 = vadd.xlane.f32.xlu1 %v70_v47 }
 0x777   :  { %v281_v49 = vpop.xlane.xlu0 %280 }
 0x778   :  { %v282_v50 = vsel %vm274_vm6, %v281_v49, %v268_v36  ;;  %vm438_vm6 = vcmp.eq.s32.totalorder %v741_v1, 9 }
 0x779   :  { %v293_v51 = vmul.f32 %v285_v32, %v282_v50 }
 0x77b   :  { %294 = vadd.xlane.f32.xlu0 %v293_v51 }
 0x791   :  { %v305_v52 = vpop.xlane.xlu1 %304 }
 0x792   :  { %v306_v62 = vsel %vm302_vm11, %v305_v52, %v292_v42 }
 0x793   :  { %v317_v4 = vmul.f32 %v313_v63, %v306_v62 }
 0x795   :  { %v818_v53 = vpop.xlane.xlu1 %71 }
 0x796   :  { %725 = vrcp.f32 %v818_v53 }
 0x7a0   :  { %v824_v55 = vpop.eup %725 }
 0x7a1   :  { %v77_v56 = vmul.f32 %v824_v55, %v75_v54 }
 0x7a3   :  { %78 = vst [vmem:[#allocation2 + $0x8] sm:$0xff] %v77_v56 }
 0x7aa   :  { %v326_v60 = vld [vmem:[#allocation2 + $0xf] ss:$0 sm:$0xff]  ;;  %v344_v11 = vld [vmem:[#allocation2 + $0xe] ss:$0 sm:$0xff]  ;;  %v362_v24 = vld [vmem:[#allocation2 + $0xd] ss:$0 sm:$0xff] }
 0x7ab   :  { %v327_v0 = vxor.u32 2147483648, %v326_v60  ;;  %v345_v15 = vxor.u32 2147483648, %v344_v11  ;;  %v363_v27 = vxor.u32 2147483648, %v362_v24  ;;  %v380_v35 = vld [vmem:[#allocation2 + $0xc] ss:$0 sm:$0xff] }
 0x7ac   :  { %v381_v38 = vxor.u32 2147483648, %v380_v35  ;;  %v398_v49 = vld [vmem:[#allocation2 + $0xb] ss:$0 sm:$0xff] }
 0x7ad   :  { %v331_v5 = vmul.f32 %v327_v0, %v124_v3  ;;  %v399_v52 = vxor.u32 2147483648, %v398_v49 }
 0x808   :  { %v295_v57 = vpop.xlane.xlu0 %294 }
 0x809   :  { %v296_v58 = vsel %vm288_vm7, %v295_v57, %v282_v50  ;;  %vm57_vm7 = vcmp.le.s32.totalorder %v743_v2, %v741_v1 }
 0x80a   :  { %v307_v61 = vmul.f32 %v299_v41, %v296_v58  ;;  %vm58_vm8 = vmand %vm57_vm7, %vm48_vm0  ;;  %vm456_vm0 = vcmp.eq.s32.totalorder %v741_v1, 8 }
 0x80c   :  { %308 = vadd.xlane.f32.xlu0 %v307_v61 }
 0x810   :  { %318 = vadd.xlane.f32.xlu0 %v317_v4 }
 0x814   :  { %332 = vadd.xlane.f32.xlu0 %v331_v5 }
 0x899   :  { %v309_v6 = vpop.xlane.xlu0 %308 }
 0x89a   :  { %v310_v9 = vsel %vm302_vm11, %v309_v6, %v296_v58  ;;  %vm496_vm11 = vcmp.eq.s32.totalorder %v741_v1, 6 }
 0x89b   :  { %v321_v10 = vmul.f32 %v313_v63, %v310_v9 }
 0x89d   :  { %v319_v12 = vpop.xlane.xlu0 %318  ;;  %322 = vadd.xlane.f32.xlu1 %v321_v10 }
 0x89e   :  { %v320_v13 = vsel %vm316_vm13, %v319_v12, %v306_v62  ;;  %v416_v62 = vld [vmem:[#allocation2 + $0xa] ss:$0 sm:$0xff] }
 0x89f   :  { %v335_v14 = vmul.f32 %v327_v0, %v320_v13 }
 0x8a1   :  { %336 = vadd.xlane.f32.xlu1 %v335_v14  ;;  %v333_v16 = vpop.xlane.xlu0 %332 }
 0x8a2   :  { %v334_v17 = vsel %vm330_vm14, %v333_v16, %v124_v3  ;;  %v417_v3 = vxor.u32 2147483648, %v416_v62 }
 0x8a3   :  { %v349_v18 = vmul.f32 %v345_v15, %v334_v17 }
 0x8a5   :  { %350 = vadd.xlane.f32.xlu1 %v349_v18 }
 0x92a   :  { %v323_v19 = vpop.xlane.xlu1 %322 }
 0x92b   :  { %v324_v20 = vsel %vm316_vm13, %v323_v19, %v310_v9  ;;  %vm540_vm13 = vcmp.eq.s32.totalorder %v741_v1, 4 }
 0x92c   :  { %v339_v21 = vmul.f32 %v327_v0, %v324_v20 }
 0x92e   :  { %340 = vadd.xlane.f32.xlu0 %v339_v21  ;;  %v337_v22 = vpop.xlane.xlu1 %336 }
 0x92f   :  { %v338_v23 = vsel %vm330_vm14, %v337_v22, %v320_v13  ;;  %v434_v13 = vld [vmem:[#allocation2 + $0x9] ss:$0 sm:$0xff] }
 0x930   :  { %v353_v25 = vmul.f32 %v345_v15, %v338_v23  ;;  %v435_v16 = vxor.u32 2147483648, %v434_v13 }
 0x932   :  { %354 = vadd.xlane.f32.xlu0 %v353_v25  ;;  %v351_v26 = vpop.xlane.xlu1 %350  ;;  %v35_v25 = vld [vmem:[%s1003_s0] sm:$0xff] }
 0x933   :  { %v352_v28 = vsel %vm348_vm15, %v351_v26, %v334_v17  ;;  %v54_v26 = vsel %vm52_vm5, %v35_v25, 0.0  ;;  %vm651_vm5 = vweird.f32 %v818_v53 }
 0x934   :  { %v367_v29 = vmul.f32 %v363_v27, %v352_v28 }
 0x936   :  { %368 = vadd.xlane.f32.xlu0 %v367_v29 }
 0x9bb   :  { %v341_v30 = vpop.xlane.xlu0 %340 }
 0x9bc   :  { %v342_v31 = vsel %vm330_vm14, %v341_v30, %v324_v20  ;;  %v452_v30 = vld [vmem:[#allocation2 + $0x8] ss:$0 sm:$0xff]  ;;  %vm562_vm14 = vcmp.eq.s32.totalorder %v741_v1, 3 }
 0x9bd   :  { %v357_v32 = vmul.f32 %v345_v15, %v342_v31 }
 0x9bf   :  { %358 = vadd.xlane.f32.xlu1 %v357_v32  ;;  %v355_v33 = vpop.xlane.xlu0 %354 }
 0x9c0   :  { %v356_v34 = vsel %vm348_vm15, %v355_v33, %v338_v23 }
 0x9c1   :  { %v371_v36 = vmul.f32 %v363_v27, %v356_v34 }
 0x9c3   :  { %372 = vadd.xlane.f32.xlu1 %v371_v36  ;;  %v369_v37 = vpop.xlane.xlu0 %368 }
 0x9c4   :  { %v370_v39 = vsel %vm366_vm1, %v369_v37, %v352_v28 }
 0x9c5   :  { %v385_v40 = vmul.f32 %v381_v38, %v370_v39 }
 0x9c7   :  { %386 = vadd.xlane.f32.xlu1 %v385_v40 }
 0xa4c   :  { %v359_v41 = vpop.xlane.xlu1 %358 }
 0xa4d   :  { %v360_v42 = vsel %vm348_vm15, %v359_v41, %v342_v31  ;;  %vm584_vm15 = vcmp.eq.s32.totalorder %v741_v1, 2 }
 0xa4e   :  { %v375_v43 = vmul.f32 %v363_v27, %v360_v42 }
 0xa50   :  { %376 = vadd.xlane.f32.xlu0 %v375_v43  ;;  %v373_v45 = vpop.xlane.xlu1 %372 }
 0xa51   :  { %v374_v47 = vsel %vm366_vm1, %v373_v45, %v356_v34  ;;  %v453_v34 = vxor.u32 2147483648, %v452_v30 }
 0xa52   :  { %v389_v50 = vmul.f32 %v381_v38, %v374_v47 }
 0xa54   :  { %390 = vadd.xlane.f32.xlu0 %v389_v50  ;;  %v387_v51 = vpop.xlane.xlu1 %386 }
 0xa55   :  { %v388_v54 = vsel %vm384_vm2, %v387_v51, %v370_v39  ;;  %v59_v39 = vsel %vm58_vm8, %v35_v25, 0.0 }
 0xa56   :  { %v403_v56 = vmul.f32 %v399_v52, %v388_v54 }
 0xa58   :  { %404 = vadd.xlane.f32.xlu0 %v403_v56 }
 0xadd   :  { %v377_v57 = vpop.xlane.xlu0 %376 }
 0xade   :  { %v378_v58 = vsel %vm366_vm1, %v377_v57, %v360_v42  ;;  %v117_v42 = vsel %vm116_vm9, -1.0, %v730_v48  ;;  %vm606_vm1 = vcmp.eq.s32.totalorder %v741_v1, 1 }
 0xadf   :  { %v393_v59 = vmul.f32 %v381_v38, %v378_v58 }
 0xae1   :  { %394 = vadd.xlane.f32.xlu1 %v393_v59  ;;  %v391_v60 = vpop.xlane.xlu0 %390 }
 0xae2   :  { %v392_v61 = vsel %vm384_vm2, %v391_v60, %v374_v47 }
 0xae3   :  { %v407_v63 = vmul.f32 %v399_v52, %v392_v61 }
 0xae5   :  { %408 = vadd.xlane.f32.xlu1 %v407_v63  ;;  %v405_v0 = vpop.xlane.xlu0 %404 }
 0xae6   :  { %v406_v4 = vsel %vm402_vm3, %v405_v0, %v388_v54 }
 0xae7   :  { %v421_v5 = vmul.f32 %v417_v3, %v406_v4 }
 0xae9   :  { %422 = vadd.xlane.f32.xlu1 %v421_v5 }
 0xb6e   :  { %v395_v6 = vpop.xlane.xlu1 %394 }
 0xb6f   :  { %v396_v9 = vsel %vm384_vm2, %v395_v6, %v378_v58  ;;  %vm627_vm2 = vcmp.eq.s32.totalorder %v741_v1, 0 }
 0xb70   :  { %v411_v10 = vmul.f32 %v399_v52, %v396_v9 }
 0xb72   :  { %412 = vadd.xlane.f32.xlu0 %v411_v10  ;;  %v409_v11 = vpop.xlane.xlu1 %408 }
 0xb73   :  { %v410_v12 = vsel %vm402_vm3, %v409_v11, %v392_v61 }
 0xb74   :  { %v425_v14 = vmul.f32 %v417_v3, %v410_v12 }
 0xb76   :  { %426 = vadd.xlane.f32.xlu0 %v425_v14  ;;  %v423_v15 = vpop.xlane.xlu1 %422 }
 0xb77   :  { %v424_v17 = vsel %vm420_vm4, %v423_v15, %v406_v4 }
 0xb78   :  { %v439_v18 = vmul.f32 %v435_v16, %v424_v17 }
 0xb7a   :  { %440 = vadd.xlane.f32.xlu0 %v439_v18 }
 0xbff   :  { %v413_v19 = vpop.xlane.xlu0 %412 }
 0xc00   :  { %v414_v20 = vsel %vm402_vm3, %v413_v19, %v396_v9 }
 0xc01   :  { %v429_v21 = vmul.f32 %v417_v3, %v414_v20 }
 0xc03   :  { %430 = vadd.xlane.f32.xlu1 %v429_v21  ;;  %v427_v22 = vpop.xlane.xlu0 %426 }
 0xc04   :  { %v428_v23 = vsel %vm420_vm4, %v427_v22, %v410_v12 }
 0xc05   :  { %v443_v24 = vmul.f32 %v435_v16, %v428_v23 }
 0xc07   :  { %444 = vadd.xlane.f32.xlu1 %v443_v24  ;;  %v441_v27 = vpop.xlane.xlu0 %440 }
 0xc08   :  { %v442_v32 = vsel %vm438_vm6, %v441_v27, %v424_v17 }
 0xc09   :  { %v457_v36 = vmul.f32 %v453_v34, %v442_v32 }
 0xc0b   :  { %55 = vadd.xlane.f32.xlu1 %v54_v26 }
 0xc90   :  { %v431_v28 = vpop.xlane.xlu1 %430 }
 0xc91   :  { %v432_v29 = vsel %vm420_vm4, %v431_v28, %v414_v20  ;;  %vm657_vm4 = vweird.f32 %v772_v44 }
 0xc92   :  { %v447_v31 = vmul.f32 %v435_v16, %v432_v29 }
 0xc94   :  { %448 = vadd.xlane.f32.xlu0 %v447_v31  ;;  %v445_v33 = vpop.xlane.xlu1 %444 }
 0xc95   :  { %v446_v35 = vsel %vm438_vm6, %v445_v33, %v428_v23 }
 0xc96   :  { %v461_v37 = vmul.f32 %v453_v34, %v446_v35 }
 0xc98   :  { %458 = vadd.xlane.f32.xlu0 %v457_v36  ;;  %462 = vadd.xlane.f32.xlu1 %v461_v37  ;;  %v889_v38 = vpop.xlane.xlu1 %55 }
 0xc99   :  { %727 = vrcp.f32 %v889_v38  ;;  %vm646_vm3 = vweird.f32 %v889_v38 }
 0xca3   :  { %v896_v40 = vpop.eup %727 }
 0xca4   :  { %v61_v41 = vmul.f32 %v896_v40, %v59_v39 }
 0xca6   :  { %62 = vst [vmem:[#allocation2] sm:$0xff] %v61_v41 }
 0xcad   :  { %v470_v43 = vld [vmem:[#allocation2 + $0x7] ss:$0 sm:$0xff]  ;;  %v492_v58 = vld [vmem:[#allocation2 + $0x6] ss:$0 sm:$0xff]  ;;  %v514_v12 = vld [vmem:[#allocation2 + $0x5] ss:$0 sm:$0xff] }
 0xcae   :  { %v471_v45 = vxor.u32 2147483648, %v470_v43  ;;  %v493_v59 = vxor.u32 2147483648, %v492_v58  ;;  %v515_v14 = vxor.u32 2147483648, %v514_v12  ;;  %v536_v26 = vld [vmem:[#allocation2 + $0x4] ss:$0 sm:$0xff] }
 0xcaf   :  { %v537_v28 = vxor.u32 2147483648, %v536_v26 }
 0xcb0   :  { %v475_v47 = vmul.f32 %v471_v45, %v117_v42 }
 0xcb2   :  { %476 = vadd.xlane.f32.xlu1 %v475_v47 }
 0xd21   :  { %v449_v49 = vpop.xlane.xlu0 %448 }
 0xd22   :  { %v450_v50 = vsel %vm438_vm6, %v449_v49, %v432_v29  ;;  %vm663_vm6 = vweird.f32 %v754_v7 }
 0xd23   :  { %v465_v51 = vmul.f32 %v453_v34, %v450_v50 }
 0xd25   :  { %466 = vadd.xlane.f32.xlu0 %v465_v51  ;;  %v459_v52 = vpop.xlane.xlu0 %458  ;;  %v463_v54 = vpop.xlane.xlu1 %462 }
 0xd26   :  { %v460_v56 = vsel %vm456_vm0, %v459_v52, %v442_v32  ;;  %v464_v2 = vsel %vm456_vm0, %v463_v54, %v446_v35 }
 0xd27   :  { %v479_v48 = vmul.f32 %v471_v45, %v460_v56  ;;  %v483_v57 = vmul.f32 %v471_v45, %v464_v2 }
 0xd29   :  { %480 = vadd.xlane.f32.xlu0 %v479_v48  ;;  %484 = vadd.xlane.f32.xlu1 %v483_v57 }
 0xd3f   :  { %v477_v60 = vpop.xlane.xlu1 %476 }
 0xd40   :  { %v478_v61 = vsel %vm474_vm10, %v477_v60, %v117_v42  ;;  %v558_v42 = vld [vmem:[#allocation2 + $0x3] ss:$0 sm:$0xff] }
 0xd41   :  { %v497_v62 = vmul.f32 %v493_v59, %v478_v61 }
 0xd43   :  { %498 = vadd.xlane.f32.xlu1 %v497_v62 }
 0xdb2   :  { %v467_v63 = vpop.xlane.xlu0 %466 }
 0xdb3   :  { %v468_v0 = vsel %vm456_vm0, %v467_v63, %v450_v50 }
 0xdb4   :  { %v487_v3 = vmul.f32 %v471_v45, %v468_v0  ;;  %v559_v45 = vxor.u32 2147483648, %v558_v42 }
 0xdb6   :  { %488 = vadd.xlane.f32.xlu0 %v487_v3  ;;  %v481_v4 = vpop.xlane.xlu0 %480  ;;  %v485_v5 = vpop.xlane.xlu1 %484 }
 0xdb7   :  { %v482_v6 = vsel %vm474_vm10, %v481_v4, %v460_v56  ;;  %v486_v9 = vsel %vm474_vm10, %v485_v5, %v464_v2 }
 0xdb8   :  { %v501_v10 = vmul.f32 %v493_v59, %v482_v6  ;;  %v505_v11 = vmul.f32 %v493_v59, %v486_v9 }
 0xdba   :  { %502 = vadd.xlane.f32.xlu0 %v501_v10  ;;  %506 = vadd.xlane.f32.xlu1 %v505_v11 }
 0xdd0   :  { %v499_v13 = vpop.xlane.xlu1 %498 }
 0xdd1   :  { %v500_v15 = vsel %vm496_vm11, %v499_v13, %v478_v61  ;;  %v602_v13 = vld [vmem:[#allocation2 + $0x1] ss:$0 sm:$0xff] }
 0xdd2   :  { %v519_v16 = vmul.f32 %v515_v14, %v500_v15 }
 0xdd4   :  { %520 = vadd.xlane.f32.xlu1 %v519_v16 }
 0xe43   :  { %v489_v17 = vpop.xlane.xlu0 %488 }
 0xe44   :  { %v490_v18 = vsel %vm474_vm10, %v489_v17, %v468_v0 }
 0xe45   :  { %v509_v19 = vmul.f32 %v493_v59, %v490_v18  ;;  %v580_v59 = vld [vmem:[#allocation2 + $0x2] ss:$0 sm:$0xff] }
 0xe46   :  { %v581_v61 = vxor.u32 2147483648, %v580_v59 }
 0xe47   :  { %510 = vadd.xlane.f32.xlu0 %v509_v19  ;;  %v503_v20 = vpop.xlane.xlu0 %502  ;;  %v507_v21 = vpop.xlane.xlu1 %506 }
 0xe48   :  { %v504_v22 = vsel %vm496_vm11, %v503_v20, %v482_v6  ;;  %v508_v23 = vsel %vm496_vm11, %v507_v21, %v486_v9 }
 0xe49   :  { %v523_v24 = vmul.f32 %v515_v14, %v504_v22  ;;  %v527_v25 = vmul.f32 %v515_v14, %v508_v23 }
 0xe4b   :  { %524 = vadd.xlane.f32.xlu0 %v523_v24  ;;  %528 = vadd.xlane.f32.xlu1 %v527_v25 }
 0xe61   :  { %v521_v27 = vpop.xlane.xlu1 %520 }
 0xe62   :  { %v522_v29 = vsel %vm518_vm12, %v521_v27, %v500_v15  ;;  %v603_v15 = vxor.u32 2147483648, %v602_v13  ;;  %v623_v27 = vld [vmem:[#allocation2] ss:$0 sm:$0xff] }
 0xe63   :  { %v541_v30 = vmul.f32 %v537_v28, %v522_v29 }
 0xe65   :  { %542 = vadd.xlane.f32.xlu1 %v541_v30 }
 0xed4   :  { %v511_v31 = vpop.xlane.xlu0 %510 }
 0xed5   :  { %v512_v32 = vsel %vm496_vm11, %v511_v31, %v490_v18 }
 0xed6   :  { %v531_v33 = vmul.f32 %v515_v14, %v512_v32 }
 0xed8   :  { %532 = vadd.xlane.f32.xlu0 %v531_v33  ;;  %v525_v34 = vpop.xlane.xlu0 %524  ;;  %v529_v35 = vpop.xlane.xlu1 %528 }
 0xed9   :  { %v526_v36 = vsel %vm518_vm12, %v525_v34, %v504_v22  ;;  %v530_v37 = vsel %vm518_vm12, %v529_v35, %v508_v23 }
 0xeda   :  { %v545_v39 = vmul.f32 %v537_v28, %v526_v36  ;;  %v549_v41 = vmul.f32 %v537_v28, %v530_v37 }
 0xedc   :  { %546 = vadd.xlane.f32.xlu0 %v545_v39  ;;  %550 = vadd.xlane.f32.xlu1 %v549_v41 }
 0xef2   :  { %v543_v43 = vpop.xlane.xlu1 %542 }
 0xef3   :  { %v544_v47 = vsel %vm540_vm13, %v543_v43, %v522_v29  ;;  %v624_v29 = vxor.u32 2147483648, %v623_v27 }
 0xef4   :  { %v563_v49 = vmul.f32 %v559_v45, %v544_v47 }
 0xef6   :  { %564 = vadd.xlane.f32.xlu1 %v563_v49 }
 0xf65   :  { %v533_v50 = vpop.xlane.xlu0 %532 }
 0xf66   :  { %v534_v51 = vsel %vm518_vm12, %v533_v50, %v512_v32 }
 0xf67   :  { %v553_v52 = vmul.f32 %v537_v28, %v534_v51 }
 0xf69   :  { %554 = vadd.xlane.f32.xlu0 %v553_v52  ;;  %v547_v54 = vpop.xlane.xlu0 %546  ;;  %v551_v56 = vpop.xlane.xlu1 %550 }
 0xf6a   :  { %v548_v2 = vsel %vm540_vm13, %v547_v54, %v526_v36  ;;  %v552_v48 = vsel %vm540_vm13, %v551_v56, %v530_v37 }
 0xf6b   :  { %v567_v57 = vmul.f32 %v559_v45, %v548_v2  ;;  %v571_v58 = vmul.f32 %v559_v45, %v552_v48 }
 0xf6d   :  { %568 = vadd.xlane.f32.xlu0 %v567_v57  ;;  %572 = vadd.xlane.f32.xlu1 %v571_v58 }
 0xf83   :  { %v565_v60 = vpop.xlane.xlu1 %564 }
 0xf84   :  { %v566_v62 = vsel %vm562_vm14, %v565_v60, %v544_v47 }
 0xf85   :  { %v585_v63 = vmul.f32 %v581_v61, %v566_v62 }
 0xf87   :  { %586 = vadd.xlane.f32.xlu1 %v585_v63 }
 0xff6   :  { %v555_v0 = vpop.xlane.xlu0 %554 }
 0xff7   :  { %v556_v3 = vsel %vm540_vm13, %v555_v0, %v534_v51 }
 0xff8   :  { %v575_v4 = vmul.f32 %v559_v45, %v556_v3 }
 0xffa   :  { %576 = vadd.xlane.f32.xlu0 %v575_v4  ;;  %v569_v5 = vpop.xlane.xlu0 %568  ;;  %v573_v6 = vpop.xlane.xlu1 %572 }
 0xffb   :  { %v570_v9 = vsel %vm562_vm14, %v569_v5, %v548_v2  ;;  %v574_v10 = vsel %vm562_vm14, %v573_v6, %v552_v48 }
 0xffc   :  { %v589_v11 = vmul.f32 %v581_v61, %v570_v9  ;;  %v593_v12 = vmul.f32 %v581_v61, %v574_v10 }
 0xffe   :  { %590 = vadd.xlane.f32.xlu0 %v589_v11  ;;  %594 = vadd.xlane.f32.xlu1 %v593_v12 }
0x1014   :  { %v587_v14 = vpop.xlane.xlu1 %586 }
0x1015   :  { %v588_v16 = vsel %vm584_vm15, %v587_v14, %v566_v62 }
0x1016   :  { %v607_v17 = vmul.f32 %v603_v15, %v588_v16 }
0x1018   :  { %608 = vadd.xlane.f32.xlu1 %v607_v17 }
0x1087   :  { %v577_v18 = vpop.xlane.xlu0 %576 }
0x1088   :  { %v578_v19 = vsel %vm562_vm14, %v577_v18, %v556_v3 }
0x1089   :  { %v597_v20 = vmul.f32 %v581_v61, %v578_v19 }
0x108b   :  { %598 = vadd.xlane.f32.xlu0 %v597_v20  ;;  %v591_v21 = vpop.xlane.xlu0 %590  ;;  %v595_v22 = vpop.xlane.xlu1 %594 }
0x108c   :  { %v592_v23 = vsel %vm584_vm15, %v591_v21, %v570_v9  ;;  %v596_v24 = vsel %vm584_vm15, %v595_v22, %v574_v10 }
0x108d   :  { %v611_v25 = vmul.f32 %v603_v15, %v592_v23  ;;  %v615_v26 = vmul.f32 %v603_v15, %v596_v24 }
0x108f   :  { %612 = vadd.xlane.f32.xlu0 %v611_v25  ;;  %616 = vadd.xlane.f32.xlu1 %v615_v26 }
0x10a5   :  { %v609_v28 = vpop.xlane.xlu1 %608 }
0x10a6   :  { %v610_v30 = vsel %vm606_vm1, %v609_v28, %v588_v16 }
0x10a7   :  { %v628_v31 = vmul.f32 %v624_v29, %v610_v30 }
0x10a9   :  { %629 = vadd.xlane.f32.xlu1 %v628_v31 }
0x1118   :  { %v599_v32 = vpop.xlane.xlu0 %598 }
0x1119   :  { %v600_v33 = vsel %vm584_vm15, %v599_v32, %v578_v19 }
0x111a   :  { %v619_v34 = vmul.f32 %v603_v15, %v600_v33 }
0x111c   :  { %620 = vadd.xlane.f32.xlu0 %v619_v34  ;;  %v613_v35 = vpop.xlane.xlu0 %612  ;;  %v617_v36 = vpop.xlane.xlu1 %616 }
0x111d   :  { %v614_v37 = vsel %vm606_vm1, %v613_v35, %v592_v23  ;;  %v618_v39 = vsel %vm606_vm1, %v617_v36, %v596_v24 }
0x111e   :  { %v632_v41 = vmul.f32 %v624_v29, %v614_v37  ;;  %v636_v42 = vmul.f32 %v624_v29, %v618_v39 }
0x1120   :  { %633 = vadd.xlane.f32.xlu0 %v632_v41  ;;  %637 = vadd.xlane.f32.xlu1 %v636_v42 }
0x1136   :  { %v630_v43 = vpop.xlane.xlu1 %629 }
0x1137   :  { %v631_v45 = vsel %vm627_vm2, %v630_v43, %v610_v30 }
0x1138   :  { %v645_v47 = vmul.f32 %v896_v40, %v631_v45 }
0x113a   :  { %v647_v49 = vsel %vm646_vm3, %v631_v45, %v645_v47 }
0x113b   :  { %701 = vst [vmem:[%s1004_s1] sm:$0xff] %v647_v49 }
0x11a9   :  { %v621_v50 = vpop.xlane.xlu0 %620 }
0x11aa   :  { %v622_v51 = vsel %vm606_vm1, %v621_v50, %v600_v33 }
0x11ab   :  { %v640_v52 = vmul.f32 %v624_v29, %v622_v51 }
0x11ad   :  { %641 = vadd.xlane.f32.xlu0 %v640_v52  ;;  %v634_v54 = vpop.xlane.xlu0 %633  ;;  %v638_v56 = vpop.xlane.xlu1 %637 }
0x11ae   :  { %v635_v2 = vsel %vm627_vm2, %v634_v54, %v614_v37  ;;  %v639_v40 = vsel %vm627_vm2, %v638_v56, %v618_v39 }
0x11af   :  { %v650_v38 = vmul.f32 %v824_v55, %v635_v2  ;;  %v656_v48 = vmul.f32 %v778_v46, %v639_v40 }
0x11b1   :  { %v652_v57 = vsel %vm651_vm5, %v635_v2, %v650_v38  ;;  %v658_v58 = vsel %vm657_vm4, %v639_v40, %v656_v48 }
0x11b2   :  { %703 = vst [vmem:[%s1004_s1 + $0x8] sm:$0xff] %v652_v57  ;;  %705 = vst [vmem:[%s1004_s1 + $0x10] sm:$0xff] %v658_v58 }
0x123a   :  { %v642_v59 = vpop.xlane.xlu0 %641 }
0x123b   :  { %v643_v55 = vsel %vm627_vm2, %v642_v59, %v622_v51 }
0x123c   :  { %v662_v46 = vmul.f32 %v757_v8, %v643_v55 }
0x123e   :  { %v664_v44 = vsel %vm663_vm6, %v643_v55, %v662_v46 }
0x123f   :  { %707 = vst [vmem:[%s1004_s1 + $0x18] sm:$0xff] %v664_v44 }

// kernel: custom-call.24
= control target key start
LH: loop header
LB: loop body
LE: loop exit
PB: predicated region body
PF: predicated region fallthrough
CT: control target
= control target key end

     0   :  { %v46_v0 = vlaneseq  ;;  %v730_v9 = vmov -1.0   ;;  %v731_v53 = vmov 0.0   ;;  %s884_s0 = inlined_call_operand.vmem [shape: f32[1,32,32], index: 0, kind: input, shape index: {}]   ;;  %s885_s1 = inlined_call_operand.vmem [shape: f32[1,32,32], index: 1, kind: output, shape index: {}]  }
   0x1   :  { %v35_v1 = vld [vmem:[%s884_s0] sm:$0xff]  ;;  %v37_v36 = vld [vmem:[%s884_s0 + $0x8] sm:$0xff] }
   0x2   :  { %v745_v2 = vand.u32 127, %v46_v0  ;;  %v747_v3 = vshrl.u32 %v46_v0, 7 }
   0x4   :  { %vm52_vm0 = vcmp.eq.s32.totalorder %v747_v3, %v745_v2  ;;  %vm48_vm1 = vcmp.lt.s32.totalorder %v745_v2, 32  ;;  %vm57_vm2 = vcmp.ge.s32.totalorder %v747_v3, %v745_v2  ;;  %vm119_vm4 = vcmp.eq.s32.totalorder %v745_v2, 0 }
   0x5   :  { %v54_v4 = vsel %vm52_vm0, %v35_v1, 0.0  ;;  %vm58_vm3 = vmand %vm57_vm2, %vm48_vm1  ;;  %vm116_vm5 = vcmp.eq.s32.totalorder %v745_v2, %v747_v3  ;;  %v120_v10 = vsel %vm119_vm4, 1.0, %v730_v9  ;;  %vm148_vm6 = vcmp.eq.s32.totalorder %v745_v2, 1 }
   0x6   :  { %55 = vadd.xlane.f32.xlu0 %v54_v4  ;;  %v59_v6 = vsel %vm58_vm3, %v35_v1, 0.0  ;;  %v121_v11 = vsel %vm116_vm5, %v120_v10, 0.0  ;;  %vm158_vm7 = vcmp.eq.s32.totalorder %v745_v2, 2  ;;  %vm168_vm8 = vcmp.eq.s32.totalorder %v745_v2, 3 }
   0x7   :  { %vm178_vm9 = vcmp.eq.s32.totalorder %v745_v2, 4  ;;  %v67_v31 = vadd.s32 8, %v747_v3  ;;  %vm188_vm11 = vcmp.eq.s32.totalorder %v745_v2, 5  ;;  %vm198_vm14 = vcmp.eq.s32.totalorder %v745_v2, 6 }
   0x8   :  { %vm208_vm0 = vcmp.eq.s32.totalorder %v745_v2, 7  ;;  %vm218_vm2 = vcmp.eq.s32.totalorder %v745_v2, 8  ;;  %vm232_vm3 = vcmp.eq.s32.totalorder %v745_v2, 9  ;;  %vm246_vm4 = vcmp.eq.s32.totalorder %v745_v2, 10 }
   0x9   :  { %vm68_vm10 = vcmp.eq.s32.totalorder %v67_v31, %v745_v2  ;;  %vm73_vm12 = vcmp.ge.s32.totalorder %v67_v31, %v745_v2  ;;  %vm127_vm15 = vcmp.eq.s32.totalorder %v745_v2, %v67_v31  ;;  %vm260_vm5 = vcmp.eq.s32.totalorder %v745_v2, 11 }
   0xa   :  { %v70_v37 = vsel %vm68_vm10, %v37_v36, 0.0  ;;  %vm74_vm13 = vmand %vm73_vm12, %vm48_vm1  ;;  %v128_v54 = vsel %vm127_vm15, -1.0, %v731_v53  ;;  %vm316_vm12 = vcmp.eq.s32.totalorder %v745_v2, 15  ;;  %vm348_vm15 = vcmp.eq.s32.totalorder %v745_v2, 17 }
   0xb   :  { %v75_v44 = vsel %vm74_vm13, %v37_v36, 0.0 }
  0x93   :  { %v751_v5 = vpop.xlane.xlu0 %55 }
  0x94   :  { %722 = vrcp.f32 %v751_v5 }
  0x9e   :  { %v759_v7 = vpop.eup %722 }
  0x9f   :  { %v61_v8 = vmul.f32 %v759_v7, %v59_v6 }
  0xa1   :  { %62 = vst [vmem:[#allocation2] sm:$0xff] %v61_v8 }
  0xa8   :  { %v144_v12 = vld [vmem:[#allocation2 + $0x1] ss:$0 sm:$0xff]  ;;  %v154_v15 = vld [vmem:[#allocation2 + $0x2] ss:$0 sm:$0xff]  ;;  %v164_v20 = vld [vmem:[#allocation2 + $0x3] ss:$0 sm:$0xff] }
  0xa9   :  { %v145_v13 = vxor.u32 2147483648, %v144_v12  ;;  %v155_v17 = vxor.u32 2147483648, %v154_v15  ;;  %v165_v22 = vxor.u32 2147483648, %v164_v20  ;;  %v174_v25 = vld [vmem:[#allocation2 + $0x4] ss:$0 sm:$0xff] }
  0xaa   :  { %v175_v27 = vxor.u32 2147483648, %v174_v25  ;;  %v184_v30 = vld [vmem:[#allocation2 + $0x5] ss:$0 sm:$0xff]  ;;  %v194_v38 = vld [vmem:[#allocation2 + $0x6] ss:$0 sm:$0xff] }
  0xab   :  { %v149_v14 = vmul.f32 %v145_v13, %v121_v11  ;;  %v185_v33 = vxor.u32 2147483648, %v184_v30  ;;  %v195_v40 = vxor.u32 2147483648, %v194_v38  ;;  %v204_v47 = vld [vmem:[#allocation2 + $0x7] ss:$0 sm:$0xff] }
  0xac   :  { %v205_v50 = vxor.u32 2147483648, %v204_v47  ;;  %v83_v47 = vadd.s32 16, %v747_v3 }
  0xad   :  { %150 = vadd.xlane.f32.xlu0 %v149_v14 }
  0xae   :  { %vm89_vm10 = vcmp.ge.s32.totalorder %v83_v47, %v745_v2  ;;  %vm134_vm13 = vcmp.eq.s32.totalorder %v745_v2, %v83_v47 }
 0x13a   :  { %v151_v16 = vpop.xlane.xlu0 %150 }
 0x13b   :  { %v152_v18 = vsel %vm148_vm6, %v151_v16, %v121_v11  ;;  %vm274_vm6 = vcmp.eq.s32.totalorder %v745_v2, 12 }
 0x13c   :  { %v159_v19 = vmul.f32 %v155_v17, %v152_v18 }
 0x13e   :  { %160 = vadd.xlane.f32.xlu1 %v159_v19 }
 0x1cb   :  { %v161_v21 = vpop.xlane.xlu1 %160 }
 0x1cc   :  { %v162_v23 = vsel %vm158_vm7, %v161_v21, %v152_v18  ;;  %vm288_vm7 = vcmp.eq.s32.totalorder %v745_v2, 13 }
 0x1cd   :  { %v169_v24 = vmul.f32 %v165_v22, %v162_v23 }
 0x1cf   :  { %170 = vadd.xlane.f32.xlu1 %v169_v24 }
 0x25c   :  { %v171_v26 = vpop.xlane.xlu1 %170 }
 0x25d   :  { %v172_v28 = vsel %vm168_vm8, %v171_v26, %v162_v23  ;;  %vm84_vm8 = vcmp.eq.s32.totalorder %v83_v47, %v745_v2 }
 0x25e   :  { %v179_v29 = vmul.f32 %v175_v27, %v172_v28 }
 0x260   :  { %180 = vadd.xlane.f32.xlu0 %v179_v29 }
 0x2ed   :  { %v181_v32 = vpop.xlane.xlu0 %180 }
 0x2ee   :  { %v182_v34 = vsel %vm178_vm9, %v181_v32, %v172_v28  ;;  %vm302_vm9 = vcmp.eq.s32.totalorder %v745_v2, 14 }
 0x2ef   :  { %v189_v35 = vmul.f32 %v185_v33, %v182_v34 }
 0x2f1   :  { %190 = vadd.xlane.f32.xlu1 %v189_v35 }
 0x2f5   :  { %71 = vadd.xlane.f32.xlu1 %v70_v37 }
 0x37e   :  { %v191_v39 = vpop.xlane.xlu1 %190 }
 0x37f   :  { %v192_v41 = vsel %vm188_vm11, %v191_v39, %v182_v34  ;;  %vm90_vm11 = vmand %vm89_vm10, %vm48_vm1  ;;  %vm474_vm10 = vcmp.eq.s32.totalorder %v745_v2, 24 }
 0x380   :  { %v199_v42 = vmul.f32 %v195_v40, %v192_v41 }
 0x382   :  { %200 = vadd.xlane.f32.xlu0 %v199_v42  ;;  %v775_v43 = vpop.xlane.xlu1 %71 }
 0x383   :  { %724 = vrcp.f32 %v775_v43 }
 0x38d   :  { %v781_v45 = vpop.eup %724 }
 0x38e   :  { %v77_v46 = vmul.f32 %v781_v45, %v75_v44 }
 0x390   :  { %78 = vst [vmem:[#allocation2 + $0x8] sm:$0xff] %v77_v46 }
 0x397   :  { %v214_v48 = vld [vmem:[#allocation2 + $0x8] ss:$0 sm:$0xff]  ;;  %v228_v59 = vld [vmem:[#allocation2 + $0x9] ss:$0 sm:$0xff]  ;;  %v242_v6 = vld [vmem:[#allocation2 + $0xa] ss:$0 sm:$0xff] }
 0x398   :  { %v215_v51 = vxor.u32 2147483648, %v214_v48  ;;  %v229_v62 = vxor.u32 2147483648, %v228_v59  ;;  %v243_v10 = vxor.u32 2147483648, %v242_v6  ;;  %v256_v15 = vld [vmem:[#allocation2 + $0xb] ss:$0 sm:$0xff] }
 0x399   :  { %v257_v18 = vxor.u32 2147483648, %v256_v15  ;;  %v270_v23 = vld [vmem:[#allocation2 + $0xc] ss:$0 sm:$0xff]  ;;  %v284_v31 = vld [vmem:[#allocation2 + $0xd] ss:$0 sm:$0xff] }
 0x39a   :  { %v223_v56 = vmul.f32 %v215_v51, %v128_v54  ;;  %v271_v26 = vxor.u32 2147483648, %v270_v23  ;;  %v285_v34 = vxor.u32 2147483648, %v284_v31  ;;  %v298_v39 = vld [vmem:[#allocation2 + $0xe] ss:$0 sm:$0xff] }
 0x39b   :  { %v299_v42 = vxor.u32 2147483648, %v298_v39 }
 0x40f   :  { %v201_v49 = vpop.xlane.xlu0 %200 }
 0x410   :  { %v202_v52 = vsel %vm198_vm14, %v201_v49, %v192_v41  ;;  %vm330_vm14 = vcmp.eq.s32.totalorder %v745_v2, 16 }
 0x411   :  { %v209_v55 = vmul.f32 %v205_v50, %v202_v52 }
 0x413   :  { %210 = vadd.xlane.f32.xlu0 %v209_v55  ;;  %v312_v55 = vld [vmem:[#allocation2 + $0xf] ss:$0 sm:$0xff] }
 0x417   :  { %224 = vadd.xlane.f32.xlu0 %v223_v56 }
 0x4a0   :  { %v211_v57 = vpop.xlane.xlu0 %210 }
 0x4a1   :  { %v212_v58 = vsel %vm208_vm0, %v211_v57, %v202_v52  ;;  %v313_v57 = vxor.u32 2147483648, %v312_v55  ;;  %vm366_vm0 = vcmp.eq.s32.totalorder %v745_v2, 18 }
 0x4a2   :  { %v219_v60 = vmul.f32 %v215_v51, %v212_v58  ;;  %v39_v51 = vld [vmem:[%s884_s0 + $0x10] sm:$0xff] }
 0x4a4   :  { %v225_v61 = vpop.xlane.xlu0 %224  ;;  %220 = vadd.xlane.f32.xlu1 %v219_v60 }
 0x4a5   :  { %v226_v63 = vsel %vm218_vm2, %v225_v61, %v128_v54  ;;  %v86_v54 = vsel %vm84_vm8, %v39_v51, 0.0 }
 0x4a6   :  { %v237_v0 = vmul.f32 %v229_v62, %v226_v63 }
 0x4a8   :  { %238 = vadd.xlane.f32.xlu0 %v237_v0 }
 0x531   :  { %v221_v1 = vpop.xlane.xlu1 %220 }
 0x532   :  { %v222_v4 = vsel %vm218_vm2, %v221_v1, %v212_v58  ;;  %vm384_vm2 = vcmp.eq.s32.totalorder %v745_v2, 19 }
 0x533   :  { %v233_v8 = vmul.f32 %v229_v62, %v222_v4 }
 0x535   :  { %v239_v9 = vpop.xlane.xlu0 %238  ;;  %234 = vadd.xlane.f32.xlu1 %v233_v8 }
 0x536   :  { %v240_v11 = vsel %vm232_vm3, %v239_v9, %v226_v63  ;;  %v91_v63 = vsel %vm90_vm11, %v39_v51, 0.0  ;;  %vm496_vm11 = vcmp.eq.s32.totalorder %v745_v2, 25 }
 0x537   :  { %v251_v12 = vmul.f32 %v243_v10, %v240_v11 }
 0x539   :  { %252 = vadd.xlane.f32.xlu0 %v251_v12 }
 0x5c2   :  { %v235_v13 = vpop.xlane.xlu1 %234 }
 0x5c3   :  { %v236_v14 = vsel %vm232_vm3, %v235_v13, %v222_v4  ;;  %vm402_vm3 = vcmp.eq.s32.totalorder %v745_v2, 20 }
 0x5c4   :  { %v247_v16 = vmul.f32 %v243_v10, %v236_v14 }
 0x5c6   :  { %v253_v17 = vpop.xlane.xlu0 %252  ;;  %248 = vadd.xlane.f32.xlu1 %v247_v16 }
 0x5c7   :  { %v254_v19 = vsel %vm246_vm4, %v253_v17, %v240_v11 }
 0x5c8   :  { %v265_v20 = vmul.f32 %v257_v18, %v254_v19 }
 0x5ca   :  { %266 = vadd.xlane.f32.xlu0 %v265_v20 }
 0x653   :  { %v249_v21 = vpop.xlane.xlu1 %248 }
 0x654   :  { %v250_v22 = vsel %vm246_vm4, %v249_v21, %v236_v14  ;;  %v135_v14 = vsel %vm134_vm13, -1.0, %v731_v53  ;;  %vm420_vm4 = vcmp.eq.s32.totalorder %v745_v2, 21  ;;  %vm540_vm13 = vcmp.eq.s32.totalorder %v745_v2, 27 }
 0x655   :  { %v261_v24 = vmul.f32 %v257_v18, %v250_v22 }
 0x657   :  { %v267_v25 = vpop.xlane.xlu0 %266  ;;  %262 = vadd.xlane.f32.xlu1 %v261_v24 }
 0x658   :  { %v268_v27 = vsel %vm260_vm5, %v267_v25, %v254_v19 }
 0x659   :  { %v279_v28 = vmul.f32 %v271_v26, %v268_v27 }
 0x65b   :  { %280 = vadd.xlane.f32.xlu0 %v279_v28 }
 0x6e4   :  { %v263_v29 = vpop.xlane.xlu1 %262 }
 0x6e5   :  { %v264_v30 = vsel %vm260_vm5, %v263_v29, %v250_v22 }
 0x6e6   :  { %v275_v32 = vmul.f32 %v271_v26, %v264_v30 }
 0x6e8   :  { %v281_v33 = vpop.xlane.xlu0 %280  ;;  %276 = vadd.xlane.f32.xlu1 %v275_v32 }
 0x6e9   :  { %v282_v35 = vsel %vm274_vm6, %v281_v33, %v268_v27 }
 0x6ea   :  { %v293_v36 = vmul.f32 %v285_v34, %v282_v35 }
 0x6ec   :  { %294 = vadd.xlane.f32.xlu0 %v293_v36 }
 0x775   :  { %v277_v37 = vpop.xlane.xlu1 %276 }
 0x776   :  { %v278_v38 = vsel %vm274_vm6, %v277_v37, %v264_v30  ;;  %vm438_vm6 = vcmp.eq.s32.totalorder %v745_v2, 22 }
 0x777   :  { %v289_v40 = vmul.f32 %v285_v34, %v278_v38 }
 0x779   :  { %v295_v41 = vpop.xlane.xlu0 %294  ;;  %290 = vadd.xlane.f32.xlu1 %v289_v40 }
 0x77a   :  { %v296_v44 = vsel %vm288_vm7, %v295_v41, %v282_v35 }
 0x77b   :  { %v307_v46 = vmul.f32 %v299_v42, %v296_v44 }
 0x77d   :  { %308 = vadd.xlane.f32.xlu0 %v307_v46 }
 0x806   :  { %v291_v48 = vpop.xlane.xlu1 %290 }
 0x807   :  { %v292_v49 = vsel %vm288_vm7, %v291_v48, %v278_v38 }
 0x808   :  { %v303_v50 = vmul.f32 %v299_v42, %v292_v49 }
 0x80a   :  { %v309_v52 = vpop.xlane.xlu0 %308  ;;  %304 = vadd.xlane.f32.xlu1 %v303_v50 }
 0x80b   :  { %v310_v56 = vsel %vm302_vm9, %v309_v52, %v296_v44 }
 0x80c   :  { %v321_v58 = vmul.f32 %v313_v57, %v310_v56 }
 0x80e   :  { %87 = vadd.xlane.f32.xlu1 %v86_v54 }
 0x812   :  { %322 = vadd.xlane.f32.xlu1 %v321_v58 }
 0x897   :  { %v305_v59 = vpop.xlane.xlu1 %304 }
 0x898   :  { %v306_v60 = vsel %vm302_vm9, %v305_v59, %v292_v49 }
 0x899   :  { %v317_v61 = vmul.f32 %v313_v57, %v306_v60 }
 0x89b   :  { %318 = vadd.xlane.f32.xlu0 %v317_v61  ;;  %v800_v62 = vpop.xlane.xlu1 %87 }
 0x89c   :  { %726 = vrcp.f32 %v800_v62 }
 0x89f   :  { %v323_v4 = vpop.xlane.xlu1 %322 }
 0x8a0   :  { %v324_v9 = vsel %vm316_vm12, %v323_v4, %v310_v56 }
 0x8a6   :  { %v806_v0 = vpop.eup %726 }
 0x8a7   :  { %v93_v1 = vmul.f32 %v806_v0, %v91_v63 }
 0x8a9   :  { %94 = vst [vmem:[#allocation2 + $0x10] sm:$0xff] %v93_v1 }
 0x8b0   :  { %v326_v6 = vld [vmem:[#allocation2 + $0x10] ss:$0 sm:$0xff]  ;;  %v344_v16 = vld [vmem:[#allocation2 + $0x11] ss:$0 sm:$0xff]  ;;  %v362_v27 = vld [vmem:[#allocation2 + $0x12] ss:$0 sm:$0xff] }
 0x8b1   :  { %v327_v8 = vxor.u32 2147483648, %v326_v6  ;;  %v345_v18 = vxor.u32 2147483648, %v344_v16  ;;  %v363_v29 = vxor.u32 2147483648, %v362_v27  ;;  %v380_v38 = vld [vmem:[#allocation2 + $0x13] ss:$0 sm:$0xff] }
 0x8b2   :  { %v381_v40 = vxor.u32 2147483648, %v380_v38  ;;  %v398_v51 = vld [vmem:[#allocation2 + $0x14] ss:$0 sm:$0xff]  ;;  %v416_v1 = vld [vmem:[#allocation2 + $0x15] ss:$0 sm:$0xff] }
 0x8b3   :  { %v335_v10 = vmul.f32 %v327_v8, %v324_v9  ;;  %v339_v15 = vmul.f32 %v327_v8, %v135_v14  ;;  %v399_v54 = vxor.u32 2147483648, %v398_v51  ;;  %v417_v6 = vxor.u32 2147483648, %v416_v1  ;;  %v434_v16 = vld [vmem:[#allocation2 + $0x16] ss:$0 sm:$0xff] }
 0x8b5   :  { %336 = vadd.xlane.f32.xlu1 %v335_v10 }
 0x928   :  { %v319_v11 = vpop.xlane.xlu0 %318 }
 0x929   :  { %v320_v12 = vsel %vm316_vm12, %v319_v11, %v306_v60  ;;  %vm518_vm12 = vcmp.eq.s32.totalorder %v745_v2, 26 }
 0x92a   :  { %v331_v13 = vmul.f32 %v327_v8, %v320_v12 }
 0x92c   :  { %332 = vadd.xlane.f32.xlu0 %v331_v13 }
 0x930   :  { %340 = vadd.xlane.f32.xlu0 %v339_v15 }
 0x942   :  { %v337_v17 = vpop.xlane.xlu1 %336 }
 0x943   :  { %v338_v19 = vsel %vm330_vm14, %v337_v17, %v324_v9  ;;  %v99_v17 = vadd.s32 24, %v747_v3 }
 0x944   :  { %v353_v20 = vmul.f32 %v345_v18, %v338_v19 }
 0x945   :  { %vm100_vm5 = vcmp.eq.s32.totalorder %v99_v17, %v745_v2  ;;  %vm105_vm7 = vcmp.ge.s32.totalorder %v99_v17, %v745_v2  ;;  %vm141_vm9 = vcmp.eq.s32.totalorder %v745_v2, %v99_v17 }
 0x946   :  { %354 = vadd.xlane.f32.xlu0 %v353_v20  ;;  %vm106_vm8 = vmand %vm105_vm7, %vm48_vm1  ;;  %vm456_vm1 = vcmp.eq.s32.totalorder %v745_v2, 23 }
 0x9b9   :  { %v333_v21 = vpop.xlane.xlu0 %332 }
 0x9ba   :  { %v334_v22 = vsel %vm330_vm14, %v333_v21, %v320_v12 }
 0x9bb   :  { %v349_v23 = vmul.f32 %v345_v18, %v334_v22 }
 0x9bd   :  { %v341_v24 = vpop.xlane.xlu0 %340  ;;  %350 = vadd.xlane.f32.xlu1 %v349_v23 }
 0x9be   :  { %v342_v25 = vsel %vm330_vm14, %v341_v24, %v135_v14  ;;  %vm562_vm14 = vcmp.eq.s32.totalorder %v745_v2, 28 }
 0x9bf   :  { %v357_v26 = vmul.f32 %v345_v18, %v342_v25 }
 0x9c1   :  { %358 = vadd.xlane.f32.xlu1 %v357_v26 }
 0x9d3   :  { %v355_v28 = vpop.xlane.xlu0 %354 }
 0x9d4   :  { %v356_v30 = vsel %vm348_vm15, %v355_v28, %v338_v19  ;;  %v435_v19 = vxor.u32 2147483648, %v434_v16 }
 0x9d5   :  { %v371_v31 = vmul.f32 %v363_v29, %v356_v30 }
 0x9d7   :  { %372 = vadd.xlane.f32.xlu1 %v371_v31 }
 0xa4a   :  { %v351_v32 = vpop.xlane.xlu1 %350 }
 0xa4b   :  { %v352_v33 = vsel %vm348_vm15, %v351_v32, %v334_v22  ;;  %v41_v22 = vld [vmem:[%s884_s0 + $0x18] sm:$0xff] }
 0xa4c   :  { %v367_v34 = vmul.f32 %v363_v29, %v352_v33  ;;  %v102_v23 = vsel %vm100_vm5, %v41_v22, 0.0  ;;  %vm647_vm5 = vweird.f32 %v751_v5 }
 0xa4e   :  { %368 = vadd.xlane.f32.xlu0 %v367_v34  ;;  %v359_v35 = vpop.xlane.xlu1 %358 }
 0xa4f   :  { %v360_v36 = vsel %vm348_vm15, %v359_v35, %v342_v25  ;;  %v107_v35 = vsel %vm106_vm8, %v41_v22, 0.0  ;;  %vm584_vm15 = vcmp.eq.s32.totalorder %v745_v2, 29 }
 0xa50   :  { %v375_v37 = vmul.f32 %v363_v29, %v360_v36  ;;  %v452_v29 = vld [vmem:[#allocation2 + $0x17] ss:$0 sm:$0xff] }
 0xa51   :  { %v453_v31 = vxor.u32 2147483648, %v452_v29 }
 0xa52   :  { %376 = vadd.xlane.f32.xlu0 %v375_v37 }
 0xa64   :  { %v373_v39 = vpop.xlane.xlu1 %372 }
 0xa65   :  { %v374_v41 = vsel %vm366_vm0, %v373_v39, %v356_v30 }
 0xa66   :  { %v389_v42 = vmul.f32 %v381_v40, %v374_v41 }
 0xa68   :  { %390 = vadd.xlane.f32.xlu0 %v389_v42 }
 0xadb   :  { %v369_v44 = vpop.xlane.xlu0 %368 }
 0xadc   :  { %v370_v46 = vsel %vm366_vm0, %v369_v44, %v352_v33 }
 0xadd   :  { %v385_v47 = vmul.f32 %v381_v40, %v370_v46 }
 0xadf   :  { %386 = vadd.xlane.f32.xlu1 %v385_v47  ;;  %v377_v48 = vpop.xlane.xlu0 %376 }
 0xae0   :  { %v378_v49 = vsel %vm366_vm0, %v377_v48, %v360_v36  ;;  %vm606_vm0 = vcmp.eq.s32.totalorder %v745_v2, 30 }
 0xae1   :  { %v393_v50 = vmul.f32 %v381_v40, %v378_v49 }
 0xae3   :  { %394 = vadd.xlane.f32.xlu1 %v393_v50  ;;  %v142_v50 = vsel %vm141_vm9, -1.0, %v731_v53 }
 0xaf5   :  { %v391_v52 = vpop.xlane.xlu0 %390 }
 0xaf6   :  { %v392_v55 = vsel %vm384_vm2, %v391_v52, %v374_v41 }
 0xaf7   :  { %v407_v56 = vmul.f32 %v399_v54, %v392_v55 }
 0xaf9   :  { %408 = vadd.xlane.f32.xlu1 %v407_v56 }
 0xb6c   :  { %v387_v57 = vpop.xlane.xlu1 %386 }
 0xb6d   :  { %v388_v58 = vsel %vm384_vm2, %v387_v57, %v370_v46 }
 0xb6e   :  { %v403_v59 = vmul.f32 %v399_v54, %v388_v58 }
 0xb70   :  { %404 = vadd.xlane.f32.xlu0 %v403_v59  ;;  %v395_v60 = vpop.xlane.xlu1 %394 }
 0xb71   :  { %v396_v61 = vsel %vm384_vm2, %v395_v60, %v378_v49  ;;  %vm628_vm2 = vcmp.eq.s32.totalorder %v745_v2, 31 }
 0xb72   :  { %v411_v63 = vmul.f32 %v399_v54, %v396_v61 }
 0xb74   :  { %412 = vadd.xlane.f32.xlu0 %v411_v63 }
 0xb86   :  { %v409_v4 = vpop.xlane.xlu1 %408 }
 0xb87   :  { %v410_v8 = vsel %vm402_vm3, %v409_v4, %v392_v55 }
 0xb88   :  { %v425_v9 = vmul.f32 %v417_v6, %v410_v8 }
 0xb8a   :  { %426 = vadd.xlane.f32.xlu0 %v425_v9 }
 0xbfd   :  { %v405_v10 = vpop.xlane.xlu0 %404 }
 0xbfe   :  { %v406_v11 = vsel %vm402_vm3, %v405_v10, %v388_v58 }
 0xbff   :  { %v421_v12 = vmul.f32 %v417_v6, %v406_v11 }
 0xc01   :  { %422 = vadd.xlane.f32.xlu1 %v421_v12  ;;  %v413_v13 = vpop.xlane.xlu0 %412 }
 0xc02   :  { %v414_v14 = vsel %vm402_vm3, %v413_v13, %v396_v61  ;;  %vm652_vm3 = vweird.f32 %v775_v43 }
 0xc03   :  { %v429_v15 = vmul.f32 %v417_v6, %v414_v14 }
 0xc05   :  { %430 = vadd.xlane.f32.xlu1 %v429_v15 }
 0xc17   :  { %v427_v18 = vpop.xlane.xlu0 %426 }
 0xc18   :  { %v428_v20 = vsel %vm420_vm4, %v427_v18, %v410_v8 }
 0xc19   :  { %v443_v21 = vmul.f32 %v435_v19, %v428_v20 }
 0xc1b   :  { %444 = vadd.xlane.f32.xlu1 %v443_v21 }
 0xc1f   :  { %103 = vadd.xlane.f32.xlu1 %v102_v23 }
 0xc8e   :  { %v423_v24 = vpop.xlane.xlu1 %422 }
 0xc8f   :  { %v424_v25 = vsel %vm420_vm4, %v423_v24, %v406_v11 }
 0xc90   :  { %v439_v3 = vmul.f32 %v435_v19, %v424_v25 }
 0xc92   :  { %440 = vadd.xlane.f32.xlu0 %v439_v3  ;;  %v431_v26 = vpop.xlane.xlu1 %430 }
 0xc93   :  { %v432_v27 = vsel %vm420_vm4, %v431_v26, %v414_v14 }
 0xc94   :  { %v447_v28 = vmul.f32 %v435_v19, %v432_v27 }
 0xc96   :  { %448 = vadd.xlane.f32.xlu0 %v447_v28 }
 0xca8   :  { %v445_v30 = vpop.xlane.xlu1 %444 }
 0xca9   :  { %v446_v32 = vsel %vm438_vm6, %v445_v30, %v428_v20 }
 0xcaa   :  { %v461_v33 = vmul.f32 %v453_v31, %v446_v32 }
 0xcac   :  { %462 = vadd.xlane.f32.xlu1 %v461_v33  ;;  %v832_v34 = vpop.xlane.xlu1 %103 }
 0xcad   :  { %728 = vrcp.f32 %v832_v34  ;;  %vm664_vm4 = vweird.f32 %v832_v34 }
 0xcb7   :  { %v838_v36 = vpop.eup %728 }
 0xcb8   :  { %v109_v37 = vmul.f32 %v838_v36, %v107_v35 }
 0xcba   :  { %110 = vst [vmem:[#allocation2 + $0x18] sm:$0xff] %v109_v37 }
 0xcc1   :  { %v470_v46 = vld [vmem:[#allocation2 + $0x18] ss:$0 sm:$0xff]  ;;  %v492_v60 = vld [vmem:[#allocation2 + $0x19] ss:$0 sm:$0xff]  ;;  %v514_v15 = vld [vmem:[#allocation2 + $0x1a] ss:$0 sm:$0xff] }
 0xcc2   :  { %v471_v47 = vxor.u32 2147483648, %v470_v46  ;;  %v493_v63 = vxor.u32 2147483648, %v492_v60  ;;  %v515_v17 = vxor.u32 2147483648, %v514_v15  ;;  %v536_v28 = vld [vmem:[#allocation2 + $0x1b] ss:$0 sm:$0xff] }
 0xcc3   :  { %v537_v30 = vxor.u32 2147483648, %v536_v28  ;;  %v558_v46 = vld [vmem:[#allocation2 + $0x1c] ss:$0 sm:$0xff] }
 0xcc4   :  { %v487_v52 = vmul.f32 %v471_v47, %v142_v50 }
 0xd1f   :  { %v441_v38 = vpop.xlane.xlu0 %440 }
 0xd20   :  { %v442_v39 = vsel %vm438_vm6, %v441_v38, %v424_v25 }
 0xd21   :  { %v457_v40 = vmul.f32 %v453_v31, %v442_v39 }
 0xd23   :  { %458 = vadd.xlane.f32.xlu0 %v457_v40  ;;  %v449_v41 = vpop.xlane.xlu0 %448 }
 0xd24   :  { %v450_v42 = vsel %vm438_vm6, %v449_v41, %v432_v27  ;;  %vm658_vm6 = vweird.f32 %v800_v62 }
 0xd25   :  { %v465_v44 = vmul.f32 %v453_v31, %v450_v42 }
 0xd27   :  { %466 = vadd.xlane.f32.xlu0 %v465_v44 }
 0xd39   :  { %v463_v48 = vpop.xlane.xlu1 %462 }
 0xd3a   :  { %v464_v49 = vsel %vm456_vm1, %v463_v48, %v446_v32  ;;  %v559_v48 = vxor.u32 2147483648, %v558_v46 }
 0xd3b   :  { %v479_v51 = vmul.f32 %v471_v47, %v464_v49 }
 0xd3d   :  { %480 = vadd.xlane.f32.xlu0 %v479_v51 }
 0xd41   :  { %488 = vadd.xlane.f32.xlu0 %v487_v52 }
 0xdb0   :  { %v459_v54 = vpop.xlane.xlu0 %458 }
 0xdb1   :  { %v460_v55 = vsel %vm456_vm1, %v459_v54, %v442_v39 }
 0xdb2   :  { %v475_v56 = vmul.f32 %v471_v47, %v460_v55 }
 0xdb4   :  { %v467_v57 = vpop.xlane.xlu0 %466  ;;  %476 = vadd.xlane.f32.xlu1 %v475_v56 }
 0xdb5   :  { %v468_v58 = vsel %vm456_vm1, %v467_v57, %v450_v42 }
 0xdb6   :  { %v483_v59 = vmul.f32 %v471_v47, %v468_v58 }
 0xdb8   :  { %484 = vadd.xlane.f32.xlu1 %v483_v59 }
 0xdca   :  { %v481_v61 = vpop.xlane.xlu0 %480 }
 0xdcb   :  { %v482_v1 = vsel %vm474_vm10, %v481_v61, %v464_v49  ;;  %v580_v61 = vld [vmem:[#allocation2 + $0x1d] ss:$0 sm:$0xff] }
 0xdcc   :  { %v501_v4 = vmul.f32 %v493_v63, %v482_v1 }
 0xdce   :  { %502 = vadd.xlane.f32.xlu0 %v501_v4  ;;  %v489_v53 = vpop.xlane.xlu0 %488 }
 0xdcf   :  { %v490_v6 = vsel %vm474_vm10, %v489_v53, %v142_v50 }
 0xdd0   :  { %v509_v8 = vmul.f32 %v493_v63, %v490_v6 }
 0xdd2   :  { %510 = vadd.xlane.f32.xlu0 %v509_v8 }
 0xe41   :  { %v477_v9 = vpop.xlane.xlu1 %476 }
 0xe42   :  { %v478_v10 = vsel %vm474_vm10, %v477_v9, %v460_v55 }
 0xe43   :  { %v497_v11 = vmul.f32 %v493_v63, %v478_v10 }
 0xe45   :  { %498 = vadd.xlane.f32.xlu1 %v497_v11  ;;  %v485_v12 = vpop.xlane.xlu1 %484 }
 0xe46   :  { %v486_v13 = vsel %vm474_vm10, %v485_v12, %v468_v58 }
 0xe47   :  { %v505_v14 = vmul.f32 %v493_v63, %v486_v13 }
 0xe49   :  { %506 = vadd.xlane.f32.xlu1 %v505_v14 }
 0xe5b   :  { %v503_v16 = vpop.xlane.xlu0 %502 }
 0xe5c   :  { %v504_v18 = vsel %vm496_vm11, %v503_v16, %v482_v1  ;;  %v581_v1 = vxor.u32 2147483648, %v580_v61  ;;  %v602_v16 = vld [vmem:[#allocation2 + $0x1e] ss:$0 sm:$0xff] }
 0xe5d   :  { %v523_v19 = vmul.f32 %v515_v17, %v504_v18 }
 0xe5f   :  { %524 = vadd.xlane.f32.xlu0 %v523_v19  ;;  %v511_v20 = vpop.xlane.xlu0 %510 }
 0xe60   :  { %v512_v21 = vsel %vm496_vm11, %v511_v20, %v490_v6 }
 0xe61   :  { %v531_v22 = vmul.f32 %v515_v17, %v512_v21 }
 0xe63   :  { %532 = vadd.xlane.f32.xlu0 %v531_v22 }
 0xed2   :  { %v499_v23 = vpop.xlane.xlu1 %498 }
 0xed3   :  { %v500_v24 = vsel %vm496_vm11, %v499_v23, %v478_v10 }
 0xed4   :  { %v519_v25 = vmul.f32 %v515_v17, %v500_v24 }
 0xed6   :  { %520 = vadd.xlane.f32.xlu1 %v519_v25  ;;  %v507_v3 = vpop.xlane.xlu1 %506 }
 0xed7   :  { %v508_v26 = vsel %vm496_vm11, %v507_v3, %v486_v13 }
 0xed8   :  { %v527_v27 = vmul.f32 %v515_v17, %v508_v26 }
 0xeda   :  { %528 = vadd.xlane.f32.xlu1 %v527_v27 }
 0xeec   :  { %v525_v29 = vpop.xlane.xlu0 %524 }
 0xeed   :  { %v526_v31 = vsel %vm518_vm12, %v525_v29, %v504_v18  ;;  %v603_v18 = vxor.u32 2147483648, %v602_v16  ;;  %v624_v29 = vld [vmem:[#allocation2 + $0x1f] ss:$0 sm:$0xff] }
 0xeee   :  { %v545_v32 = vmul.f32 %v537_v30, %v526_v31 }
 0xef0   :  { %546 = vadd.xlane.f32.xlu0 %v545_v32  ;;  %v533_v33 = vpop.xlane.xlu0 %532 }
 0xef1   :  { %v534_v35 = vsel %vm518_vm12, %v533_v33, %v512_v21 }
 0xef2   :  { %v553_v37 = vmul.f32 %v537_v30, %v534_v35 }
 0xef4   :  { %554 = vadd.xlane.f32.xlu0 %v553_v37 }
 0xf63   :  { %v521_v38 = vpop.xlane.xlu1 %520 }
 0xf64   :  { %v522_v39 = vsel %vm518_vm12, %v521_v38, %v500_v24 }
 0xf65   :  { %v541_v40 = vmul.f32 %v537_v30, %v522_v39 }
 0xf67   :  { %542 = vadd.xlane.f32.xlu1 %v541_v40  ;;  %v529_v41 = vpop.xlane.xlu1 %528 }
 0xf68   :  { %v530_v42 = vsel %vm518_vm12, %v529_v41, %v508_v26 }
 0xf69   :  { %v549_v44 = vmul.f32 %v537_v30, %v530_v42 }
 0xf6b   :  { %550 = vadd.xlane.f32.xlu1 %v549_v44 }
 0xf7d   :  { %v547_v47 = vpop.xlane.xlu0 %546 }
 0xf7e   :  { %v548_v49 = vsel %vm540_vm13, %v547_v47, %v526_v31  ;;  %v625_v31 = vxor.u32 2147483648, %v624_v29 }
 0xf7f   :  { %v567_v50 = vmul.f32 %v559_v48, %v548_v49 }
 0xf81   :  { %568 = vadd.xlane.f32.xlu0 %v567_v50  ;;  %v555_v51 = vpop.xlane.xlu0 %554 }
 0xf82   :  { %v556_v52 = vsel %vm540_vm13, %v555_v51, %v534_v35 }
 0xf83   :  { %v575_v54 = vmul.f32 %v559_v48, %v556_v52 }
 0xf85   :  { %576 = vadd.xlane.f32.xlu0 %v575_v54 }
 0xff4   :  { %v543_v55 = vpop.xlane.xlu1 %542 }
 0xff5   :  { %v544_v56 = vsel %vm540_vm13, %v543_v55, %v522_v39 }
 0xff6   :  { %v563_v57 = vmul.f32 %v559_v48, %v544_v56 }
 0xff8   :  { %564 = vadd.xlane.f32.xlu1 %v563_v57  ;;  %v551_v58 = vpop.xlane.xlu1 %550 }
 0xff9   :  { %v552_v59 = vsel %vm540_vm13, %v551_v58, %v530_v42 }
 0xffa   :  { %v571_v60 = vmul.f32 %v559_v48, %v552_v59 }
 0xffc   :  { %572 = vadd.xlane.f32.xlu1 %v571_v60 }
0x100e   :  { %v569_v63 = vpop.xlane.xlu0 %568 }
0x100f   :  { %v570_v4 = vsel %vm562_vm14, %v569_v63, %v548_v49 }
0x1010   :  { %v589_v53 = vmul.f32 %v581_v1, %v570_v4 }
0x1012   :  { %590 = vadd.xlane.f32.xlu0 %v589_v53  ;;  %v577_v6 = vpop.xlane.xlu0 %576 }
0x1013   :  { %v578_v8 = vsel %vm562_vm14, %v577_v6, %v556_v52 }
0x1014   :  { %v597_v9 = vmul.f32 %v581_v1, %v578_v8 }
0x1016   :  { %598 = vadd.xlane.f32.xlu0 %v597_v9 }
0x1085   :  { %v565_v10 = vpop.xlane.xlu1 %564 }
0x1086   :  { %v566_v11 = vsel %vm562_vm14, %v565_v10, %v544_v56 }
0x1087   :  { %v585_v12 = vmul.f32 %v581_v1, %v566_v11 }
0x1089   :  { %586 = vadd.xlane.f32.xlu1 %v585_v12  ;;  %v573_v13 = vpop.xlane.xlu1 %572 }
0x108a   :  { %v574_v14 = vsel %vm562_vm14, %v573_v13, %v552_v59 }
0x108b   :  { %v593_v15 = vmul.f32 %v581_v1, %v574_v14 }
0x108d   :  { %594 = vadd.xlane.f32.xlu1 %v593_v15 }
0x109f   :  { %v591_v17 = vpop.xlane.xlu0 %590 }
0x10a0   :  { %v592_v19 = vsel %vm584_vm15, %v591_v17, %v570_v4 }
0x10a1   :  { %v611_v20 = vmul.f32 %v603_v18, %v592_v19 }
0x10a3   :  { %612 = vadd.xlane.f32.xlu0 %v611_v20  ;;  %v599_v21 = vpop.xlane.xlu0 %598 }
0x10a4   :  { %v600_v22 = vsel %vm584_vm15, %v599_v21, %v578_v8 }
0x10a5   :  { %v619_v23 = vmul.f32 %v603_v18, %v600_v22 }
0x10a7   :  { %620 = vadd.xlane.f32.xlu0 %v619_v23 }
0x1116   :  { %v587_v24 = vpop.xlane.xlu1 %586 }
0x1117   :  { %v588_v25 = vsel %vm584_vm15, %v587_v24, %v566_v11 }
0x1118   :  { %v607_v3 = vmul.f32 %v603_v18, %v588_v25 }
0x111a   :  { %608 = vadd.xlane.f32.xlu1 %v607_v3  ;;  %v595_v26 = vpop.xlane.xlu1 %594 }
0x111b   :  { %v596_v27 = vsel %vm584_vm15, %v595_v26, %v574_v14 }
0x111c   :  { %v615_v28 = vmul.f32 %v603_v18, %v596_v27 }
0x111e   :  { %616 = vadd.xlane.f32.xlu1 %v615_v28 }
0x1130   :  { %v613_v30 = vpop.xlane.xlu0 %612 }
0x1131   :  { %v614_v32 = vsel %vm606_vm0, %v613_v30, %v592_v19 }
0x1132   :  { %v633_v33 = vmul.f32 %v625_v31, %v614_v32 }
0x1134   :  { %634 = vadd.xlane.f32.xlu0 %v633_v33  ;;  %v621_v35 = vpop.xlane.xlu0 %620 }
0x1135   :  { %v622_v37 = vsel %vm606_vm0, %v621_v35, %v600_v22 }
0x1136   :  { %v641_v38 = vmul.f32 %v625_v31, %v622_v37 }
0x1138   :  { %642 = vadd.xlane.f32.xlu0 %v641_v38 }
0x11a7   :  { %v609_v39 = vpop.xlane.xlu1 %608 }
0x11a8   :  { %v610_v40 = vsel %vm606_vm0, %v609_v39, %v588_v25 }
0x11a9   :  { %v629_v41 = vmul.f32 %v625_v31, %v610_v40 }
0x11ab   :  { %630 = vadd.xlane.f32.xlu1 %v629_v41  ;;  %v617_v42 = vpop.xlane.xlu1 %616 }
0x11ac   :  { %v618_v44 = vsel %vm606_vm0, %v617_v42, %v596_v27 }
0x11ad   :  { %v637_v46 = vmul.f32 %v625_v31, %v618_v44 }
0x11af   :  { %638 = vadd.xlane.f32.xlu1 %v637_v46 }
0x11c1   :  { %v635_v47 = vpop.xlane.xlu0 %634 }
0x11c2   :  { %v636_v48 = vsel %vm628_vm2, %v635_v47, %v614_v32 }
0x11c3   :  { %v651_v49 = vmul.f32 %v781_v45, %v636_v48 }
0x11c5   :  { %v653_v50 = vsel %vm652_vm3, %v636_v48, %v651_v49  ;;  %v643_v51 = vpop.xlane.xlu0 %642 }
0x11c6   :  { %704 = vst [vmem:[%s885_s1 + $0x8] sm:$0xff] %v653_v50  ;;  %v644_v52 = vsel %vm628_vm2, %v643_v51, %v622_v37 }
0x11c7   :  { %v663_v54 = vmul.f32 %v838_v36, %v644_v52 }
0x11c9   :  { %v665_v55 = vsel %vm664_vm4, %v644_v52, %v663_v54 }
0x11ca   :  { %708 = vst [vmem:[%s885_s1 + $0x18] sm:$0xff] %v665_v55 }
0x1238   :  { %v631_v45 = vpop.xlane.xlu1 %630 }
0x1239   :  { %v632_v43 = vsel %vm628_vm2, %v631_v45, %v610_v40 }
0x123a   :  { %v646_v56 = vmul.f32 %v759_v7, %v632_v43 }
0x123c   :  { %v648_v57 = vsel %vm647_vm5, %v632_v43, %v646_v56  ;;  %v639_v58 = vpop.xlane.xlu1 %638 }
0x123d   :  { %702 = vst [vmem:[%s885_s1] sm:$0xff] %v648_v57  ;;  %v640_v34 = vsel %vm628_vm2, %v639_v58, %v618_v44 }
0x123e   :  { %v657_v36 = vmul.f32 %v806_v0, %v640_v34 }
0x1240   :  { %v659_v59 = vsel %vm658_vm6, %v640_v34, %v657_v36 }
0x1241   :  { %706 = vst [vmem:[%s885_s1 + $0x10] sm:$0xff] %v659_v59 }

// kernel: gcn_forward.1
= control target key start
LH: loop header
LB: loop body
LE: loop exit
PB: predicated region body
PF: predicated region fallthrough
CT: control target
= control target key end

     0   :  { %s2290_s15 = smov 0   ;;  %s2292_s16 = smov 0   ;;  %s2743_s0 = inlined_call_operand.vmem [shape: bf16[256,256], index: 0, kind: input, shape index: {}]   ;;  %s2744_s1 = inlined_call_operand.vmem [shape: bf16[256,128], index: 1, kind: input, shape index: {}]   ;;  %s2745_s2 = inlined_call_operand.vmem [shape: bf16[128,128], index: 2, kind: input, shape index: {}]   ;;  %s2746_s3 = inlined_call_operand.vmem [shape: bf16[128,128], index: 3, kind: input, shape index: {}]   ;;  %s2747_s4 = inlined_call_operand.vmem [shape: f32[256,128], index: 4, kind: output, shape index: {}]  }
   0x1   :  { %s2294_s17 = smov 0   ;;  %s2296_s18 = smov 0  }
   0x2   :  { %s2298_s19 = smov 0  }
   0x3 LB: > { %s23_s20 = sadd.s32 1, %s2255_s17  ;;  %s26_s21 = sadd.s32 1, %s2259_s18  ;;  %s2263_s19 = sphi %s2298_s19, %s14_s19   ;;  %s2259_s18 = sphi %s2296_s18, %s2751_s18   ;;  %s2255_s17 = sphi %s2294_s17, %s2750_s17   ;;  %s2251_s16 = sphi %s2292_s16, %s2749_s16   ;;  %s2247_s15 = sphi %s2290_s15, %s2748_s15  }
   0x4   : > { %p24_p0 = scmp.ge.s32.totalorder %s23_s20, 2  ;;  %p1635_p1 = scmp.ge.s32.totalorder %s2263_s19, 1 }
   0x5   : > { %p178_p2 = scmp.lt.s32.totalorder %s2263_s19, 5 }
   0x6   : > { %s2753_s20 = smov (%p24_p0, %s23_s20), 0  ;;  %s2755_s21 = smov (!%p24_p0, %s26_s21), %s2259_s18 }
   0x7   : > { %p179_p3 = pnand %p1635_p1, %p178_p2  ;;  %p28_p4 = scmp.ge.s32.totalorder %s2755_s21, 2 }
   0x8   : > { %s1636_s22 = sshll.u32 (!%p179_p3), %s2247_s15, 4  ;;  %s213_s23 = smul.u32 (!%p179_p3), %s2247_s15, %s2251_s16 }
   0x9   : > { %s2757_s21 = smov (%p28_p4, %s2755_s21), 0  ;;  %182 = sbr.rel (%p179_p3) target bundleno = 1427 (0x593), region = 36 }
   0xa   : > { %p207_p5 = scmp.lt.s32.totalorder (!%p179_p3), %s1636_s22, 31  ;;  %s2323_s24 = sshll.u32 (!%p179_p3), %s2247_s15, 7 }
   0xb   : > { %s1639_s25 = sshll.u32 (!%p179_p3), %s213_s23, 4  ;;  %p1642_p7 = scmp.ne.s32.totalorder (!%p179_p3), %s2251_s16, 0 }
   0xc   : > { %p215_p6 = scmp.lt.s32.totalorder (!%p179_p3), %s1639_s25, 31 }
  0x10   : > { %s2759_s22 = smov (!%p207_p5, %s1636_s22), 31  ;;  %s2761_s25 = smov (!%p215_p6, %s1639_s25), 31 }
  0x11   : > { %s1713_s26 = sshll.u32 %s2759_s22, 3  ;;  %s1640_s30 = sshll.u32 %s2761_s25, 3  ;;  %v2017_v0 = vld [vmem:[%s2744_s1 + $0x40] sm:$0xff] (!%p1642_p7)   ;;  %v2019_v2 = vld [vmem:[%s2744_s1 + $0x48] sm:$0xff] (!%p1642_p7)   ;;  %v2021_v4 = vld [vmem:[%s2744_s1 + $0x50] sm:$0xff] (!%p1642_p7)  }
  0x12   : > { %s2328_s29 = scalar_lea.vmem %s2743_s0, %s1713_s26  ;;  %s2333_s7 = scalar_lea.vmem %s2747_s4, %s1640_s30  ;;  %v2018_v1 = vld [vmem:[%s2744_s1] sm:$0xff] (!%p1642_p7)   ;;  %1753 = vmatprep.subr.bf16.mxu0 (!%p1642_p7), %v2017_v0  ;;  %v2020_v3 = vld [vmem:[%s2744_s1 + $0x8] sm:$0xff] (!%p1642_p7)   ;;  %v2022_v5 = vld [vmem:[%s2744_s1 + $0x10] sm:$0xff] (!%p1642_p7)  }
  0x13   : > { %226 = sbr.rel (%p1642_p7) target bundleno = 560 (0x230), region = 40  ;;  %1754 = vmatpush3.bf16.msra.mxu0 (!%p1642_p7), %v2018_v1  ;;  %v2023_v6 = vld [vmem:[%s2744_s1 + $0x58] sm:$0xff] (!%p1642_p7)   ;;  %v2025_v8 = vld [vmem:[%s2744_s1 + $0x60] sm:$0xff] (!%p1642_p7)   ;;  %v2027_v10 = vld [vmem:[%s2744_s1 + $0x68] sm:$0xff] (!%p1642_p7)   ;;  %s548_s30 = sshra.s32 (!%p1642_p7), %s2323_s24, 3 }
  0x14   : > { %1755 = vmatprep.subr.bf16.mxu0 (!%p1642_p7), %v2019_v2  ;;  %v2024_v7 = vld [vmem:[%s2744_s1 + $0x18] sm:$0xff] (!%p1642_p7)   ;;  %v2026_v9 = vld [vmem:[%s2744_s1 + $0x20] sm:$0xff] (!%p1642_p7)   ;;  %v2028_v12 = vld [vmem:[%s2744_s1 + $0x28] sm:$0xff] (!%p1642_p7)   ;;  %s1675_s5 = sshll.u32 (!%p1642_p7), %s548_s30, 2  ;;  %s841_s10 = sshra.s32 (!%p1642_p7), %s2323_s24, 4 }
  0x15   : > { %v2035_v11 = vld [vmem:[%s2328_s29 + $0x4] ss:$8 sps:$4 sm:$0xff] (!%p1642_p7)   ;;  %v2029_v13 = vld [vmem:[%s2744_s1 + $0x70] sm:$0xff] (!%p1642_p7)   ;;  %v2031_v15 = vld [vmem:[%s2744_s1 + $0x78] sm:$0xff] (!%p1642_p7)   ;;  %s2428_s9 = scalar_lea.vmem (!%p1642_p7), %s2744_s1, %s1675_s5  ;;  %s1684_s11 = sshll.u32 (!%p1642_p7), %s841_s10, 3 }
  0x16   : > { %483 = vmatprep.mubr.bf16.mxu0 (!%p1642_p7), %v2035_v11  ;;  %v2030_v14 = vld [vmem:[%s2744_s1 + $0x30] sm:$0xff] (!%p1642_p7)   ;;  %v2032_v16 = vld [vmem:[%s2744_s1 + $0x38] sm:$0xff] (!%p1642_p7)   ;;  %v2057_v17 = vld [vmem:[%s2745_s2] sm:$0xff] (!%p1642_p7)   ;;  %s2439_s12 = scalar_lea.vmem (!%p1642_p7), [#allocation2], %s1684_s11 }
  0x17   : > { %1756 = vmatpush3.bf16.msra.mxu0 (!%p1642_p7), %v2020_v3  ;;  %v2033_v18 = vld [vmem:[%s2328_s29] ss:$8 sps:$4 sm:$0xff] (!%p1642_p7)   ;;  %v2036_v20 = vld [vmem:[%s2328_s29 + $0x14] ss:$8 sps:$4 sm:$0xff] (!%p1642_p7)   ;;  %1913 = vmatprep.subr.bf16.mxu1 (!%p1642_p7), %v2057_v17  ;;  %v2038_v22 = vld [vmem:[%s2328_s29 + $0x10] ss:$8 sps:$4 sm:$0xff] (!%p1642_p7)  }
  0x18   : > { %1757 = vmatprep.subr.bf16.mxu0 (!%p1642_p7), %v2021_v4  ;;  %v2058_v19 = vld [vmem:[%s2745_s2 + $0x8] sm:$0xff] (!%p1642_p7)   ;;  %v2059_v21 = vld [vmem:[%s2745_s2 + $0x10] sm:$0xff] (!%p1642_p7)   ;;  %1914 = vmatpush3.bf16.msra.mxu1 (!%p1642_p7), %v2057_v17  ;;  %v2060_v35 = vld [vmem:[%s2745_s2 + $0x18] sm:$0xff] (!%p1642_p7)  }
  0x19   : > { %1915 = vmatprep.subr.bf16.mxu1 (!%p1642_p7), %v2058_v19  ;;  %v2039_v23 = vld [vmem:[%s2328_s29 + $0x24] ss:$8 sps:$4 sm:$0xff] (!%p1642_p7)   ;;  %v2041_v24 = vld [vmem:[%s2328_s29 + $0x20] ss:$8 sps:$4 sm:$0xff] (!%p1642_p7)   ;;  %v2042_v25 = vld [vmem:[%s2328_s29 + $0x34] ss:$8 sps:$4 sm:$0xff] (!%p1642_p7)  }
  0x1a   : > { %v2044_v26 = vld [vmem:[%s2328_s29 + $0x30] ss:$8 sps:$4 sm:$0xff]   ;;  %v2045_v27 = vld [vmem:[%s2328_s29 + $0x44] ss:$8 sps:$4 sm:$0xff]   ;;  %v2047_v28 = vld [vmem:[%s2328_s29 + $0x40] ss:$8 sps:$4 sm:$0xff]  }
  0x1b   : > { %1758 = vmatpush3.bf16.msra.mxu0 %v2022_v5  ;;  %v2048_v29 = vld [vmem:[%s2328_s29 + $0x54] ss:$8 sps:$4 sm:$0xff]   ;;  %v2050_v30 = vld [vmem:[%s2328_s29 + $0x50] ss:$8 sps:$4 sm:$0xff]   ;;  %v2051_v31 = vld [vmem:[%s2328_s29 + $0x64] ss:$8 sps:$4 sm:$0xff]  }
  0x1c   : > { %1759 = vmatprep.subr.bf16.mxu0 %v2023_v6  ;;  %1916 = vmatpush3.bf16.msra.mxu1 %v2058_v19  ;;  %v2053_v32 = vld [vmem:[%s2328_s29 + $0x60] ss:$8 sps:$4 sm:$0xff]   ;;  %v2054_v33 = vld [vmem:[%s2328_s29 + $0x74] ss:$8 sps:$4 sm:$0xff]   ;;  %v2056_v34 = vld [vmem:[%s2328_s29 + $0x70] ss:$8 sps:$4 sm:$0xff]  }
  0x1d   : > { %1917 = vmatprep.subr.bf16.mxu1 %v2059_v21  ;;  %v2061_v36 = vld [vmem:[%s2745_s2 + $0x20] sm:$0xff]   ;;  %v2062_v37 = vld [vmem:[%s2745_s2 + $0x28] sm:$0xff]   ;;  %v2063_v38 = vld [vmem:[%s2745_s2 + $0x30] sm:$0xff]  }
  0x1e   : > { %v2064_v39 = vld [vmem:[%s2745_s2 + $0x38] sm:$0xff]   ;;  %v1715_v40 = vld [vmem:[%s2428_s9] sm:$0xff]   ;;  %v1746_v52 = vld [vmem:[%s2428_s9 + $0x8] sm:$0xff]  }
  0x1f   : > { %1760 = vmatpush3.bf16.msra.mxu0 %v2024_v7  ;;  %v1716_v42 = vunpack.c.l.bf16 %v1715_v40  ;;  %v1717_v43 = vunpack.c.h.bf16 %v1715_v40  ;;  %v1720_v55 = vunpack.c.l.bf16 %v1746_v52  ;;  %v1721_v56 = vunpack.c.h.bf16 %v1746_v52  ;;  %v1747_v4 = vld [vmem:[%s2428_s9 + $0x10] sm:$0xff]   ;;  %v1750_v52 = vld [vmem:[%s2428_s9 + $0x28] sm:$0xff]  }
  0x20   : > { %1761 = vmatprep.subr.bf16.mxu0 %v2025_v8  ;;  %1918 = vmatpush3.bf16.msra.mxu1 %v2059_v21 }
  0x21   : > { %1919 = vmatprep.subr.bf16.mxu1 %v2060_v35  ;;  %v600_v50 = vmul.f32 0.1, %v1716_v42  ;;  %v601_v51 = vmul.f32 0.1, %v1717_v43  ;;  %v602_v1 = vmul.f32 0.1, %v1720_v55 }
  0x22   : > { %v603_v3 = vmul.f32 0.1, %v1721_v56 }
  0x23   : > { %1762 = vmatpush3.bf16.msra.mxu0 %v2026_v9  ;;  %v1724_v9 = vunpack.c.l.bf16 %v1747_v4 }
  0x24   : > { %1763 = vmatprep.subr.bf16.mxu0 %v2027_v10  ;;  %1920 = vmatpush3.bf16.msra.mxu1 %v2060_v35  ;;  %v1725_v10 = vunpack.c.h.bf16 %v1747_v4  ;;  %v1751_v4 = vld [vmem:[%s2428_s9 + $0x30] sm:$0xff]  }
  0x25   : > { %1921 = vmatprep.subr.bf16.mxu1 %v2061_v36  ;;  %v604_v17 = vmul.f32 0.1, %v1724_v9  ;;  %v1740_v9 = vunpack.c.l.bf16 %v1751_v4 }
  0x26   : > { %v605_v19 = vmul.f32 0.1, %v1725_v10  ;;  %v1741_v10 = vunpack.c.h.bf16 %v1751_v4 }
  0x27   : > { %1764 = vmatpush3.bf16.msra.mxu0 %v2028_v12 }
  0x28   : > { %1765 = vmatprep.subr.bf16.mxu0 %v2029_v13  ;;  %1922 = vmatpush3.bf16.msra.mxu1 %v2061_v36  ;;  %v1749_v36 = vld [vmem:[%s2428_s9 + $0x20] sm:$0xff]  }
  0x29   : > { %1923 = vmatprep.subr.bf16.mxu1 %v2062_v37  ;;  %v1733_v42 = vunpack.c.h.bf16 %v1749_v36 }
  0x2b   : > { %1766 = vmatpush3.bf16.msra.mxu0 %v2030_v14 }
  0x2c   : > { %1767 = vmatprep.subr.bf16.mxu0 %v2031_v15  ;;  %1924 = vmatpush3.bf16.msra.mxu1 %v2062_v37 }
  0x2d   : > { %1925 = vmatprep.subr.bf16.mxu1 %v2063_v38 }
  0x2f   : > { %1768 = vmatpush3.bf16.msra.mxu0 %v2032_v16 }
  0x30   : > { %1926 = vmatpush3.bf16.msra.mxu1 %v2063_v38 }
  0x31   : > { %1927 = vmatprep.subr.bf16.mxu1 %v2064_v39 }
  0x32   : > { %484 = vmatmul.mubr.bf16.vlgmr.msra.gmra.mrb[0].mxu0 %v2033_v18 }
  0x33   : > { %491 = vmatprep.mubr.bf16.mxu0 %v2036_v20  ;;  %v1748_v20 = vld [vmem:[%s2428_s9 + $0x18] sm:$0xff]  }
  0x34   : > { %1928 = vmatpush3.bf16.msra.mxu1 %v2064_v39 }
  0x3a   : > { %492 = vmatmul.mubr.bf16.gmra.mrb[4].mxu0 %v2038_v22 }
  0x3b   : > { %499 = vmatprep.mubr.bf16.mxu0 %v2039_v23 }
  0x42   : > { %500 = vmatmul.mubr.bf16.gmra.mrb[8].mxu0 %v2041_v24 }
  0x43   : > { %507 = vmatprep.mubr.bf16.mxu0 %v2042_v25  ;;  %v1728_v25 = vunpack.c.l.bf16 %v1748_v20 }
  0x4a   : > { %508 = vmatmul.mubr.bf16.gmra.mrb[12].mxu0 %v2044_v26  ;;  %v1729_v26 = vunpack.c.h.bf16 %v1748_v20  ;;  %v1752_v20 = vld [vmem:[%s2428_s9 + $0x38] sm:$0xff]  }
  0x4b   : > { %515 = vmatprep.mubr.bf16.mxu0 %v2045_v27 }
  0x4c   : > { %v607_v35 = vmul.f32 0.1, %v1729_v26  ;;  %v1745_v26 = vunpack.c.h.bf16 %v1752_v20 }
  0x52   : > { %516 = vmatmul.mubr.bf16.gmra.mrb[16].mxu0 %v2047_v28 }
  0x53   : > { %523 = vmatprep.mubr.bf16.mxu0 %v2048_v29 }
  0x5a   : > { %524 = vmatmul.mubr.bf16.gmra.mrb[20].mxu0 %v2050_v30 }
  0x5b   : > { %531 = vmatprep.mubr.bf16.mxu0 %v2051_v31 }
  0x62   : > { %532 = vmatmul.mubr.bf16.gmra.mrb[24].mxu0 %v2053_v32 }
  0x63   : > { %539 = vmatprep.mubr.bf16.mxu0 %v2054_v33  ;;  %v606_v33 = vmul.f32 0.1, %v1728_v25  ;;  %v1744_v25 = vunpack.c.l.bf16 %v1752_v20 }
  0x6a   : > { %540 = vmatmul.mubr.bf16.gmra.mrb[28].mxu0 %v2056_v34 }
 0x105   : > { %v1769_v41 = vpop.f32.mrb[0].mxu0 }
 0x106   : > { %v1770_v44 = vpop.f32.mrb[1].mxu0 }
 0x107   : > { %v1771_v45 = vadd.f32 %v1770_v44, %v1769_v41  ;;  %v1772_v46 = vpop.f32.mrb[2].mxu0  ;;  %v1732_v41 = vunpack.c.l.bf16 %v1749_v36 }
 0x108   : > { %v1773_v47 = vpop.f32.mrb[3].mxu0 }
 0x109   : > { %v584_v48 = vmul.f32 0.9, %v1771_v45  ;;  %v1774_v49 = vadd.f32 %v1773_v47, %v1772_v46 }
 0x10b   : > { %v585_v53 = vmul.f32 0.9, %v1774_v49  ;;  %v616_v57 = vadd.f32 %v600_v50, %v584_v48  ;;  %v608_v49 = vmul.f32 0.1, %v1732_v41 }
 0x10d   : > { %v1775_v54 = vpop.f32.mrb[4].mxu0  ;;  %v617_v58 = vadd.f32 %v601_v51, %v585_v53  ;;  %v609_v51 = vmul.f32 0.1, %v1733_v42 }
 0x10e   : > { %v1776_v59 = vpop.f32.mrb[5].mxu0 }
 0x10f   : > { %v1777_v60 = vadd.f32 %v1776_v59, %v1775_v54  ;;  %v1778_v61 = vpop.f32.mrb[6].mxu0  ;;  %v632_v62 = vpack.c.bf16 %v617_v58, %v616_v57  ;;  %v1736_v57 = vunpack.c.l.bf16 %v1750_v52  ;;  %v1737_v58 = vunpack.c.h.bf16 %v1750_v52 }
 0x110   : > { %v1779_v63 = vpop.f32.mrb[7].mxu0 }
 0x111   : > { %v586_v0 = vmul.f32 0.9, %v1777_v60  ;;  %v1780_v2 = vadd.f32 %v1779_v63, %v1778_v61  ;;  %1929 = vmatprep.mubr.bf16.mxu1 %v632_v62 }
 0x113   : > { %v587_v5 = vmul.f32 0.9, %v1780_v2  ;;  %v618_v6 = vadd.f32 %v602_v1, %v586_v0  ;;  %v610_v1 = vmul.f32 0.1, %v1736_v57 }
 0x115   : > { %v619_v7 = vadd.f32 %v603_v3, %v587_v5  ;;  %v1781_v8 = vpop.f32.mrb[8].mxu0  ;;  %v611_v3 = vmul.f32 0.1, %v1737_v58 }
 0x116   : > { %v1782_v11 = vpop.f32.mrb[9].mxu0 }
 0x117   : > { %v1783_v12 = vadd.f32 %v1782_v11, %v1781_v8  ;;  %v1784_v13 = vpop.f32.mrb[10].mxu0  ;;  %v633_v14 = vpack.c.bf16 %v619_v7, %v618_v6 }
 0x118   : > { %v1785_v15 = vpop.f32.mrb[11].mxu0 }
 0x119   : > { %v588_v16 = vmul.f32 0.9, %v1783_v12  ;;  %v1786_v18 = vadd.f32 %v1785_v15, %v1784_v13  ;;  %1930 = vmatmul.mubr.bf16.vlgmr.msra.gmra.mrb[0].mxu1 %v633_v14 }
 0x11b   : > { %v589_v21 = vmul.f32 0.9, %v1786_v18  ;;  %v620_v22 = vadd.f32 %v604_v17, %v588_v16  ;;  %v612_v17 = vmul.f32 0.1, %v1740_v9 }
 0x11d   : > { %v621_v23 = vadd.f32 %v605_v19, %v589_v21  ;;  %v1787_v24 = vpop.f32.mrb[12].mxu0  ;;  %v613_v19 = vmul.f32 0.1, %v1741_v10 }
 0x11e   : > { %v1788_v27 = vpop.f32.mrb[13].mxu0 }
 0x11f   : > { %v1789_v28 = vadd.f32 %v1788_v27, %v1787_v24  ;;  %v1790_v29 = vpop.f32.mrb[14].mxu0  ;;  %v634_v30 = vpack.c.bf16 %v621_v23, %v620_v22 }
 0x120   : > { %v1791_v31 = vpop.f32.mrb[15].mxu0 }
 0x121   : > { %v590_v32 = vmul.f32 0.9, %v1789_v28  ;;  %v1792_v34 = vadd.f32 %v1791_v31, %v1790_v29  ;;  %1933 = vmatprep.mubr.bf16.mxu1 %v634_v30 }
 0x123   : > { %v591_v37 = vmul.f32 0.9, %v1792_v34  ;;  %v622_v38 = vadd.f32 %v606_v33, %v590_v32  ;;  %v614_v33 = vmul.f32 0.1, %v1744_v25 }
 0x125   : > { %v623_v39 = vadd.f32 %v607_v35, %v591_v37  ;;  %v1793_v40 = vpop.f32.mrb[16].mxu0  ;;  %v615_v35 = vmul.f32 0.1, %v1745_v26 }
 0x126   : > { %v1794_v43 = vpop.f32.mrb[17].mxu0 }
 0x127   : > { %v1795_v44 = vadd.f32 %v1794_v43, %v1793_v40  ;;  %v1796_v45 = vpop.f32.mrb[18].mxu0  ;;  %v635_v46 = vpack.c.bf16 %v623_v39, %v622_v38 }
 0x128   : > { %v1797_v47 = vpop.f32.mrb[19].mxu0 }
 0x129   : > { %v592_v48 = vmul.f32 0.9, %v1795_v44  ;;  %v1798_v50 = vadd.f32 %v1797_v47, %v1796_v45  ;;  %1934 = vmatmul.mubr.bf16.gmra.mrb[4].mxu1 %v635_v46 }
 0x12b   : > { %v593_v53 = vmul.f32 0.9, %v1798_v50  ;;  %v624_v54 = vadd.f32 %v608_v49, %v592_v48 }
 0x12d   : > { %v625_v55 = vadd.f32 %v609_v51, %v593_v53  ;;  %v1799_v56 = vpop.f32.mrb[20].mxu0 }
 0x12e   : > { %v1800_v59 = vpop.f32.mrb[21].mxu0 }
 0x12f   : > { %v1801_v60 = vadd.f32 %v1800_v59, %v1799_v56  ;;  %v1802_v61 = vpop.f32.mrb[22].mxu0  ;;  %v636_v62 = vpack.c.bf16 %v625_v55, %v624_v54 }
 0x130   : > { %v1803_v63 = vpop.f32.mrb[23].mxu0 }
 0x131   : > { %v594_v0 = vmul.f32 0.9, %v1801_v60  ;;  %v1804_v2 = vadd.f32 %v1803_v63, %v1802_v61  ;;  %1937 = vmatprep.mubr.bf16.mxu1 %v636_v62 }
 0x133   : > { %v595_v5 = vmul.f32 0.9, %v1804_v2  ;;  %v626_v6 = vadd.f32 %v610_v1, %v594_v0 }
 0x135   : > { %v627_v7 = vadd.f32 %v611_v3, %v595_v5  ;;  %v1805_v8 = vpop.f32.mrb[24].mxu0 }
 0x136   : > { %v1806_v11 = vpop.f32.mrb[25].mxu0 }
 0x137   : > { %v1807_v12 = vadd.f32 %v1806_v11, %v1805_v8  ;;  %v1808_v13 = vpop.f32.mrb[26].mxu0  ;;  %v637_v14 = vpack.c.bf16 %v627_v7, %v626_v6 }
 0x138   : > { %v1809_v15 = vpop.f32.mrb[27].mxu0 }
 0x139   : > { %v596_v16 = vmul.f32 0.9, %v1807_v12  ;;  %v1810_v18 = vadd.f32 %v1809_v15, %v1808_v13  ;;  %1938 = vmatmul.mubr.bf16.gmra.mrb[8].mxu1 %v637_v14 }
 0x13b   : > { %v597_v21 = vmul.f32 0.9, %v1810_v18  ;;  %v628_v22 = vadd.f32 %v612_v17, %v596_v16 }
 0x13d   : > { %v629_v23 = vadd.f32 %v613_v19, %v597_v21  ;;  %v1811_v24 = vpop.f32.mrb[28].mxu0 }
 0x13e   : > { %v1812_v27 = vpop.f32.mrb[29].mxu0 }
 0x13f   : > { %v1813_v28 = vadd.f32 %v1812_v27, %v1811_v24  ;;  %v1814_v29 = vpop.f32.mrb[30].mxu0  ;;  %v638_v30 = vpack.c.bf16 %v629_v23, %v628_v22 }
 0x140   : > { %v1815_v31 = vpop.f32.mrb[31].mxu0 }
 0x141   : > { %v598_v32 = vmul.f32 0.9, %v1813_v28  ;;  %v1816_v34 = vadd.f32 %v1815_v31, %v1814_v29  ;;  %1941 = vmatprep.mubr.bf16.mxu1 %v638_v30 }
 0x143   : > { %v599_v36 = vmul.f32 0.9, %v1816_v34  ;;  %v630_v37 = vadd.f32 %v614_v33, %v598_v32 }
 0x145   : > { %v631_v38 = vadd.f32 %v615_v35, %v599_v36 }
 0x147   : > { %v639_v39 = vpack.c.bf16 %v631_v38, %v630_v37 }
 0x149   : > { %1942 = vmatmul.mubr.bf16.gmra.mrb[12].mxu1 %v639_v39 }
 0x1ec   : > { %v1931_v40 = vpop.f32.mrb[0].mxu1 }
 0x1ed   : > { %2065 = vtanh.f32 %v1931_v40  ;;  %v738_v41 = vpop.f32.mrb[1].mxu1 }
 0x1ee   : > { %2067 = vtanh.f32 %v738_v41  ;;  %v1932_v42 = vpop.f32.mrb[2].mxu1 }
 0x1ef   : > { %2069 = vtanh.f32 %v1932_v42  ;;  %v741_v43 = vpop.f32.mrb[3].mxu1 }
 0x1f0   : > { %2071 = vtanh.f32 %v741_v43 }
 0x1f7   : > { %v2066_v44 = vpop.eup %2065 }
 0x1f8   : > { %v2068_v45 = vpop.eup %2067  ;;  %v819_v48 = vmax.f32 %v2066_v44, 0.0 }
 0x1f9   : > { %v2070_v46 = vpop.eup %2069  ;;  %v817_v50 = vmax.f32 %v2068_v45, 0.0 }
 0x1fa   : > { %v2072_v47 = vpop.eup %2071  ;;  %v820_v49 = vmax.f32 %v2070_v46, 0.0 }
 0x1fb   : > { %v818_v51 = vmax.f32 %v2072_v47, 0.0 }
 0x1fc   : > { %v834_v52 = vpack.c.bf16 %v820_v49, %v819_v48  ;;  %v1935_v53 = vpop.f32.mrb[4].mxu1 }
 0x1fd   : > { %v833_v54 = vpack.c.bf16 %v818_v51, %v817_v50  ;;  %2073 = vtanh.f32 %v1935_v53  ;;  %v754_v55 = vpop.f32.mrb[5].mxu1 }
 0x1fe   : > { %846 = vst [vmem:[%s2439_s12 + $0x8] sm:$0xff] %v834_v52  ;;  %2075 = vtanh.f32 %v754_v55  ;;  %v1936_v56 = vpop.f32.mrb[6].mxu1 }
 0x1ff   : > { %845 = vst [vmem:[%s2439_s12] sm:$0xff] %v833_v54  ;;  %2077 = vtanh.f32 %v1936_v56  ;;  %v757_v57 = vpop.f32.mrb[7].mxu1 }
 0x200   : > { %2079 = vtanh.f32 %v757_v57 }
 0x207   : > { %v2074_v58 = vpop.eup %2073 }
 0x208   : > { %v2076_v59 = vpop.eup %2075  ;;  %v823_v62 = vmax.f32 %v2074_v58, 0.0 }
 0x209   : > { %v2078_v60 = vpop.eup %2077  ;;  %v821_v0 = vmax.f32 %v2076_v59, 0.0 }
 0x20a   : > { %v2080_v61 = vpop.eup %2079  ;;  %v824_v63 = vmax.f32 %v2078_v60, 0.0 }
 0x20b   : > { %v822_v1 = vmax.f32 %v2080_v61, 0.0 }
 0x20c   : > { %v836_v2 = vpack.c.bf16 %v824_v63, %v823_v62  ;;  %v1939_v3 = vpop.f32.mrb[8].mxu1 }
 0x20d   : > { %v835_v4 = vpack.c.bf16 %v822_v1, %v821_v0  ;;  %2081 = vtanh.f32 %v1939_v3  ;;  %v770_v5 = vpop.f32.mrb[9].mxu1 }
 0x20e   : > { %848 = vst [vmem:[%s2439_s12 + $0x18] sm:$0xff] %v836_v2  ;;  %2083 = vtanh.f32 %v770_v5  ;;  %v1940_v6 = vpop.f32.mrb[10].mxu1 }
 0x20f   : > { %847 = vst [vmem:[%s2439_s12 + $0x10] sm:$0xff] %v835_v4  ;;  %2085 = vtanh.f32 %v1940_v6  ;;  %v773_v7 = vpop.f32.mrb[11].mxu1 }
 0x210   : > { %2087 = vtanh.f32 %v773_v7 }
 0x217   : > { %v2082_v8 = vpop.eup %2081 }
 0x218   : > { %v2084_v9 = vpop.eup %2083  ;;  %v827_v12 = vmax.f32 %v2082_v8, 0.0 }
 0x219   : > { %v2086_v10 = vpop.eup %2085  ;;  %v825_v14 = vmax.f32 %v2084_v9, 0.0 }
 0x21a   : > { %v2088_v11 = vpop.eup %2087  ;;  %v828_v13 = vmax.f32 %v2086_v10, 0.0 }
 0x21b   : > { %v826_v15 = vmax.f32 %v2088_v11, 0.0 }
 0x21c   : > { %v838_v16 = vpack.c.bf16 %v828_v13, %v827_v12  ;;  %v1943_v17 = vpop.f32.mrb[12].mxu1 }
 0x21d   : > { %v837_v18 = vpack.c.bf16 %v826_v15, %v825_v14  ;;  %2089 = vtanh.f32 %v1943_v17  ;;  %v786_v19 = vpop.f32.mrb[13].mxu1 }
 0x21e   : > { %850 = vst [vmem:[%s2439_s12 + $0x28] sm:$0xff] %v838_v16  ;;  %2091 = vtanh.f32 %v786_v19  ;;  %v1944_v20 = vpop.f32.mrb[14].mxu1 }
 0x21f   : > { %849 = vst [vmem:[%s2439_s12 + $0x20] sm:$0xff] %v837_v18  ;;  %2093 = vtanh.f32 %v1944_v20  ;;  %v789_v21 = vpop.f32.mrb[15].mxu1 }
 0x220   : > { %2095 = vtanh.f32 %v789_v21 }
 0x227   : > { %v2090_v22 = vpop.eup %2089 }
 0x228   : > { %v2092_v23 = vpop.eup %2091  ;;  %v831_v26 = vmax.f32 %v2090_v22, 0.0 }
 0x229   : > { %v2094_v24 = vpop.eup %2093  ;;  %v829_v28 = vmax.f32 %v2092_v23, 0.0 }
 0x22a   : > { %v2096_v25 = vpop.eup %2095  ;;  %v832_v27 = vmax.f32 %v2094_v24, 0.0 }
 0x22b   : > { %v830_v29 = vmax.f32 %v2096_v25, 0.0 }
 0x22c   : > { %v840_v30 = vpack.c.bf16 %v832_v27, %v831_v26 }
 0x22d   : > { %v839_v31 = vpack.c.bf16 %v830_v29, %v829_v28 }
 0x22e   : > { %852 = vst [vmem:[%s2439_s12 + $0x38] sm:$0xff] %v840_v30 }
 0x22f   : > { %851 = vst [vmem:[%s2439_s12 + $0x30] sm:$0xff] %v839_v31 }
 0x230 PF: > { %p1685_p8 = scmp.ne.s32.totalorder %s2251_s16, 1 }
 0x231   : > { %v2099_v37 = vld [vmem:[%s2328_s29 + $0x4] ss:$8 sps:$4 sm:$0xff] (!%p1685_p8)   ;;  %v2123_v48 = vld [vmem:[%s2746_s3 + $0x10] sm:$0xff] (!%p1685_p8)   ;;  %v2097_v52 = vld [vmem:[%s2328_s29] ss:$8 sps:$4 sm:$0xff] (!%p1685_p8)   ;;  %s1066_s10 = sshra.s32 (!%p1685_p8), %s2323_s24, 4 }
 0x232   : > { %856 = sbr.rel (%p1685_p8) target bundleno = 1427 (0x593), region = 44  ;;  %1001 = vmatprep.mubr.bf16.mxu0 (!%p1685_p8), %v2099_v37  ;;  %v2121_v44 = vld [vmem:[%s2746_s3] sm:$0xff] (!%p1685_p8)   ;;  %v2122_v46 = vld [vmem:[%s2746_s3 + $0x8] sm:$0xff] (!%p1685_p8)   ;;  %v2100_v53 = vld [vmem:[%s2328_s29 + $0x14] ss:$8 sps:$4 sm:$0xff] (!%p1685_p8)   ;;  %s1702_s11 = sshll.u32 (!%p1685_p8), %s1066_s10, 3 }
 0x233   : > { %1945 = vmatprep.subr.bf16.mxu1 (!%p1685_p8), %v2121_v44  ;;  %v2102_v54 = vld [vmem:[%s2328_s29 + $0x10] ss:$8 sps:$4 sm:$0xff] (!%p1685_p8)   ;;  %v2103_v55 = vld [vmem:[%s2328_s29 + $0x24] ss:$8 sps:$4 sm:$0xff] (!%p1685_p8)   ;;  %v2105_v56 = vld [vmem:[%s2328_s29 + $0x20] ss:$8 sps:$4 sm:$0xff] (!%p1685_p8)  }
 0x234   : > { %1946 = vmatpush3.bf16.msra.mxu1 (!%p1685_p8), %v2121_v44  ;;  %v2106_v57 = vld [vmem:[%s2328_s29 + $0x34] ss:$8 sps:$4 sm:$0xff] (!%p1685_p8)   ;;  %v2108_v58 = vld [vmem:[%s2328_s29 + $0x30] ss:$8 sps:$4 sm:$0xff] (!%p1685_p8)   ;;  %v2109_v59 = vld [vmem:[%s2328_s29 + $0x44] ss:$8 sps:$4 sm:$0xff] (!%p1685_p8)  }
 0x235   : > { %1947 = vmatprep.subr.bf16.mxu1 (!%p1685_p8), %v2122_v46  ;;  %v2111_v60 = vld [vmem:[%s2328_s29 + $0x40] ss:$8 sps:$4 sm:$0xff] (!%p1685_p8)   ;;  %v2112_v61 = vld [vmem:[%s2328_s29 + $0x54] ss:$8 sps:$4 sm:$0xff] (!%p1685_p8)   ;;  %v2114_v62 = vld [vmem:[%s2328_s29 + $0x50] ss:$8 sps:$4 sm:$0xff] (!%p1685_p8)  }
 0x236   : > { %v881_v32 = vld [vmem:[#allocation2 + $0x40] sm:$0xff] (!%p1685_p8)  ;;  %v882_v34 = vld [vmem:[#allocation2 + $0x48] sm:$0xff] (!%p1685_p8)  ;;  %v883_v36 = vld [vmem:[#allocation2 + $0x50] sm:$0xff] (!%p1685_p8)  ;;  %s2491_s12 = scalar_lea.vmem (!%p1685_p8), [#allocation2], %s1702_s11 }
 0x237   : > { %v873_v33 = vld [vmem:[#allocation2] sm:$0xff] (!%p1685_p8)  ;;  %1833 = vmatprep.subr.bf16.mxu0 (!%p1685_p8), %v881_v32  ;;  %v874_v35 = vld [vmem:[#allocation2 + $0x8] sm:$0xff] (!%p1685_p8)  ;;  %v875_v38 = vld [vmem:[#allocation2 + $0x10] sm:$0xff] (!%p1685_p8) }
 0x238   : > { %1834 = vmatpush3.bf16.msra.mxu0 (!%p1685_p8), %v873_v33  ;;  %v884_v39 = vld [vmem:[#allocation2 + $0x58] sm:$0xff] (!%p1685_p8)  ;;  %v885_v41 = vld [vmem:[#allocation2 + $0x60] sm:$0xff] (!%p1685_p8)  ;;  %v886_v43 = vld [vmem:[#allocation2 + $0x68] sm:$0xff] (!%p1685_p8)  ;;  %1948 = vmatpush3.bf16.msra.mxu1 (!%p1685_p8), %v2122_v46 }
 0x239   : > { %1835 = vmatprep.subr.bf16.mxu0 %v882_v34  ;;  %v876_v40 = vld [vmem:[#allocation2 + $0x18] sm:$0xff]  ;;  %v877_v42 = vld [vmem:[#allocation2 + $0x20] sm:$0xff]  ;;  %v878_v45 = vld [vmem:[#allocation2 + $0x28] sm:$0xff]  ;;  %1949 = vmatprep.subr.bf16.mxu1 %v2123_v48 }
 0x23a   : > { %v887_v47 = vld [vmem:[#allocation2 + $0x70] sm:$0xff]  ;;  %v888_v50 = vld [vmem:[#allocation2 + $0x78] sm:$0xff]  ;;  %v2115_v63 = vld [vmem:[%s2328_s29 + $0x64] ss:$8 sps:$4 sm:$0xff]  }
 0x23b   : > { %v879_v49 = vld [vmem:[#allocation2 + $0x30] sm:$0xff]  ;;  %v880_v51 = vld [vmem:[#allocation2 + $0x38] sm:$0xff]  ;;  %v2117_v0 = vld [vmem:[%s2328_s29 + $0x60] ss:$8 sps:$4 sm:$0xff]  }
 0x23c   : > { %1836 = vmatpush3.bf16.msra.mxu0 %v874_v35  ;;  %1950 = vmatpush3.bf16.msra.mxu1 %v2123_v48  ;;  %v2118_v1 = vld [vmem:[%s2328_s29 + $0x74] ss:$8 sps:$4 sm:$0xff]   ;;  %v2120_v2 = vld [vmem:[%s2328_s29 + $0x70] ss:$8 sps:$4 sm:$0xff]   ;;  %v2125_v4 = vld [vmem:[%s2746_s3 + $0x20] sm:$0xff]  }
 0x23d   : > { %1837 = vmatprep.subr.bf16.mxu0 %v883_v36  ;;  %v2124_v3 = vld [vmem:[%s2746_s3 + $0x18] sm:$0xff]   ;;  %v2126_v5 = vld [vmem:[%s2746_s3 + $0x28] sm:$0xff]   ;;  %v2127_v6 = vld [vmem:[%s2746_s3 + $0x30] sm:$0xff]  }
 0x23e   : > { %1951 = vmatprep.subr.bf16.mxu1 %v2124_v3  ;;  %v2128_v7 = vld [vmem:[%s2746_s3 + $0x38] sm:$0xff]   ;;  %v1070_v8 = vld [vmem:[%s2491_s12] sm:$0xff]  ;;  %v1071_v20 = vld [vmem:[%s2491_s12 + $0x8] sm:$0xff] }
 0x23f   : > { %v1078_v10 = vunpack.c.l.bf16 %v1070_v8  ;;  %v1079_v11 = vunpack.c.h.bf16 %v1070_v8  ;;  %v1080_v23 = vunpack.c.l.bf16 %v1071_v20  ;;  %v1081_v24 = vunpack.c.h.bf16 %v1071_v20  ;;  %v1072_v36 = vld [vmem:[%s2491_s12 + $0x10] sm:$0xff]  ;;  %v1075_v20 = vld [vmem:[%s2491_s12 + $0x28] sm:$0xff] }
 0x240   : > { %1838 = vmatpush3.bf16.msra.mxu0 %v875_v38  ;;  %1952 = vmatpush3.bf16.msra.mxu1 %v2124_v3 }
 0x241   : > { %1839 = vmatprep.subr.bf16.mxu0 %v884_v39  ;;  %1953 = vmatprep.subr.bf16.mxu1 %v2125_v4  ;;  %v1110_v18 = vmul.f32 0.1, %v1078_v10  ;;  %v1111_v19 = vmul.f32 0.1, %v1079_v11  ;;  %v1112_v33 = vmul.f32 0.1, %v1080_v23 }
 0x242   : > { %v1113_v35 = vmul.f32 0.1, %v1081_v24 }
 0x244   : > { %1840 = vmatpush3.bf16.msra.mxu0 %v876_v40  ;;  %1954 = vmatpush3.bf16.msra.mxu1 %v2125_v4  ;;  %v1074_v4 = vld [vmem:[%s2491_s12 + $0x20] sm:$0xff] }
 0x245   : > { %1841 = vmatprep.subr.bf16.mxu0 %v885_v41  ;;  %1955 = vmatprep.subr.bf16.mxu1 %v2126_v5  ;;  %v1082_v41 = vunpack.c.l.bf16 %v1072_v36  ;;  %v1087_v10 = vunpack.c.h.bf16 %v1074_v4 }
 0x248   : > { %1842 = vmatpush3.bf16.msra.mxu0 %v877_v42  ;;  %1956 = vmatpush3.bf16.msra.mxu1 %v2126_v5  ;;  %v1083_v42 = vunpack.c.h.bf16 %v1072_v36  ;;  %v1076_v36 = vld [vmem:[%s2491_s12 + $0x30] sm:$0xff] }
 0x249   : > { %1843 = vmatprep.subr.bf16.mxu0 %v886_v43  ;;  %1957 = vmatprep.subr.bf16.mxu1 %v2127_v6 }
 0x24c   : > { %1844 = vmatpush3.bf16.msra.mxu0 %v878_v45  ;;  %1958 = vmatpush3.bf16.msra.mxu1 %v2127_v6 }
 0x24d   : > { %1845 = vmatprep.subr.bf16.mxu0 %v887_v47  ;;  %1959 = vmatprep.subr.bf16.mxu1 %v2128_v7 }
 0x250   : > { %1846 = vmatpush3.bf16.msra.mxu0 %v879_v49  ;;  %1960 = vmatpush3.bf16.msra.mxu1 %v2128_v7  ;;  %v1114_v49 = vmul.f32 0.1, %v1082_v41  ;;  %v1090_v41 = vunpack.c.l.bf16 %v1076_v36 }
 0x251   : > { %1847 = vmatprep.subr.bf16.mxu0 %v888_v50 }
 0x254   : > { %1848 = vmatpush3.bf16.msra.mxu0 %v880_v51  ;;  %v1115_v51 = vmul.f32 0.1, %v1083_v42  ;;  %v1091_v42 = vunpack.c.h.bf16 %v1076_v36 }
 0x257   : > { %1002 = vmatmul.mubr.bf16.vlgmr.msra.gmra.mrb[0].mxu0 %v2097_v52  ;;  %v1073_v52 = vld [vmem:[%s2491_s12 + $0x18] sm:$0xff] }
 0x258   : > { %1009 = vmatprep.mubr.bf16.mxu0 %v2100_v53 }
 0x25f   : > { %1010 = vmatmul.mubr.bf16.gmra.mrb[4].mxu0 %v2102_v54 }
 0x260   : > { %1017 = vmatprep.mubr.bf16.mxu0 %v2103_v55 }
 0x267   : > { %1018 = vmatmul.mubr.bf16.gmra.mrb[8].mxu0 %v2105_v56 }
 0x268   : > { %1025 = vmatprep.mubr.bf16.mxu0 %v2106_v57  ;;  %v1084_v57 = vunpack.c.l.bf16 %v1073_v52 }
 0x26f   : > { %1026 = vmatmul.mubr.bf16.gmra.mrb[12].mxu0 %v2108_v58  ;;  %v1085_v58 = vunpack.c.h.bf16 %v1073_v52  ;;  %v1077_v52 = vld [vmem:[%s2491_s12 + $0x38] sm:$0xff] }
 0x270   : > { %1033 = vmatprep.mubr.bf16.mxu0 %v2109_v59 }
 0x271   : > { %v1117_v3 = vmul.f32 0.1, %v1085_v58  ;;  %v1093_v58 = vunpack.c.h.bf16 %v1077_v52 }
 0x277   : > { %1034 = vmatmul.mubr.bf16.gmra.mrb[16].mxu0 %v2111_v60 }
 0x278   : > { %1041 = vmatprep.mubr.bf16.mxu0 %v2112_v61 }
 0x27f   : > { %1042 = vmatmul.mubr.bf16.gmra.mrb[20].mxu0 %v2114_v62 }
 0x280   : > { %1049 = vmatprep.mubr.bf16.mxu0 %v2115_v63 }
 0x287   : > { %1050 = vmatmul.mubr.bf16.gmra.mrb[24].mxu0 %v2117_v0 }
 0x288   : > { %1057 = vmatprep.mubr.bf16.mxu0 %v2118_v1  ;;  %v1116_v1 = vmul.f32 0.1, %v1084_v57  ;;  %v1092_v57 = vunpack.c.l.bf16 %v1077_v52 }
 0x28f   : > { %1058 = vmatmul.mubr.bf16.gmra.mrb[28].mxu0 %v2120_v2 }
 0x32a   : > { %v1849_v9 = vpop.f32.mrb[0].mxu0 }
 0x32b   : > { %v1850_v12 = vpop.f32.mrb[1].mxu0 }
 0x32c   : > { %v1851_v13 = vadd.f32 %v1850_v12, %v1849_v9  ;;  %v1852_v14 = vpop.f32.mrb[2].mxu0  ;;  %v1086_v9 = vunpack.c.l.bf16 %v1074_v4 }
 0x32d   : > { %v1853_v15 = vpop.f32.mrb[3].mxu0 }
 0x32e   : > { %v1094_v16 = vmul.f32 0.9, %v1851_v13  ;;  %v1854_v17 = vadd.f32 %v1853_v15, %v1852_v14 }
 0x330   : > { %v1095_v21 = vmul.f32 0.9, %v1854_v17  ;;  %v1126_v25 = vadd.f32 %v1110_v18, %v1094_v16  ;;  %v1118_v17 = vmul.f32 0.1, %v1086_v9 }
 0x332   : > { %v1855_v22 = vpop.f32.mrb[4].mxu0  ;;  %v1127_v26 = vadd.f32 %v1111_v19, %v1095_v21  ;;  %v1119_v19 = vmul.f32 0.1, %v1087_v10  ;;  %v1327_v10 = vlaneseq }
 0x333   : > { %v1856_v27 = vpop.f32.mrb[5].mxu0 }
 0x334   : > { %v1857_v28 = vadd.f32 %v1856_v27, %v1855_v22  ;;  %v1858_v29 = vpop.f32.mrb[6].mxu0  ;;  %v1142_v30 = vpack.c.bf16 %v1127_v26, %v1126_v25  ;;  %v1088_v25 = vunpack.c.l.bf16 %v1075_v20  ;;  %v1089_v26 = vunpack.c.h.bf16 %v1075_v20 }
 0x335   : > { %v1859_v31 = vpop.f32.mrb[7].mxu0 }
 0x336   : > { %v1096_v32 = vmul.f32 0.9, %v1857_v28  ;;  %v1860_v34 = vadd.f32 %v1859_v31, %v1858_v29  ;;  %1961 = vmatprep.mubr.bf16.mxu1 %v1142_v30 }
 0x338   : > { %v1097_v37 = vmul.f32 0.9, %v1860_v34  ;;  %v1128_v38 = vadd.f32 %v1112_v33, %v1096_v32  ;;  %v1120_v33 = vmul.f32 0.1, %v1088_v25 }
 0x33a   : > { %v1129_v39 = vadd.f32 %v1113_v35, %v1097_v37  ;;  %v1861_v40 = vpop.f32.mrb[8].mxu0  ;;  %v1121_v35 = vmul.f32 0.1, %v1089_v26 }
 0x33b   : > { %v1862_v43 = vpop.f32.mrb[9].mxu0 }
 0x33c   : > { %v1863_v44 = vadd.f32 %v1862_v43, %v1861_v40  ;;  %v1864_v45 = vpop.f32.mrb[10].mxu0  ;;  %v1143_v46 = vpack.c.bf16 %v1129_v39, %v1128_v38 }
 0x33d   : > { %v1865_v47 = vpop.f32.mrb[11].mxu0 }
 0x33e   : > { %v1098_v48 = vmul.f32 0.9, %v1863_v44  ;;  %v1866_v50 = vadd.f32 %v1865_v47, %v1864_v45  ;;  %1962 = vmatmul.mubr.bf16.vlgmr.msra.gmra.mrb[0].mxu1 %v1143_v46 }
 0x340   : > { %v1099_v53 = vmul.f32 0.9, %v1866_v50  ;;  %v1130_v54 = vadd.f32 %v1114_v49, %v1098_v48  ;;  %v1122_v49 = vmul.f32 0.1, %v1090_v41 }
 0x342   : > { %v1131_v55 = vadd.f32 %v1115_v51, %v1099_v53  ;;  %v1867_v56 = vpop.f32.mrb[12].mxu0  ;;  %v1123_v51 = vmul.f32 0.1, %v1091_v42 }
 0x343   : > { %v1868_v59 = vpop.f32.mrb[13].mxu0 }
 0x344   : > { %v1869_v60 = vadd.f32 %v1868_v59, %v1867_v56  ;;  %v1870_v61 = vpop.f32.mrb[14].mxu0  ;;  %v1144_v62 = vpack.c.bf16 %v1131_v55, %v1130_v54 }
 0x345   : > { %v1871_v63 = vpop.f32.mrb[15].mxu0 }
 0x346   : > { %v1100_v0 = vmul.f32 0.9, %v1869_v60  ;;  %v1872_v2 = vadd.f32 %v1871_v63, %v1870_v61  ;;  %1965 = vmatprep.mubr.bf16.mxu1 %v1144_v62 }
 0x348   : > { %v1101_v5 = vmul.f32 0.9, %v1872_v2  ;;  %v1132_v6 = vadd.f32 %v1116_v1, %v1100_v0  ;;  %v1124_v1 = vmul.f32 0.1, %v1092_v57 }
 0x34a   : > { %v1133_v7 = vadd.f32 %v1117_v3, %v1101_v5  ;;  %v1873_v8 = vpop.f32.mrb[16].mxu0  ;;  %v1125_v3 = vmul.f32 0.1, %v1093_v58 }
 0x34b   : > { %v1874_v11 = vpop.f32.mrb[17].mxu0 }
 0x34c   : > { %v1875_v12 = vadd.f32 %v1874_v11, %v1873_v8  ;;  %v1876_v13 = vpop.f32.mrb[18].mxu0  ;;  %v1145_v14 = vpack.c.bf16 %v1133_v7, %v1132_v6 }
 0x34d   : > { %v1877_v15 = vpop.f32.mrb[19].mxu0 }
 0x34e   : > { %v1102_v16 = vmul.f32 0.9, %v1875_v12  ;;  %v1878_v18 = vadd.f32 %v1877_v15, %v1876_v13  ;;  %1966 = vmatmul.mubr.bf16.gmra.mrb[4].mxu1 %v1145_v14  ;;  %v2501_v13 = vand.u32 127, %v1327_v10 }
 0x350   : > { %v1103_v21 = vmul.f32 0.9, %v1878_v18  ;;  %v1134_v22 = vadd.f32 %v1118_v17, %v1102_v16  ;;  %vm1329_vm0 = vcmp.lt.s32.totalorder %v2501_v13, 32 }
 0x352   : > { %v1135_v23 = vadd.f32 %v1119_v19, %v1103_v21  ;;  %v1879_v24 = vpop.f32.mrb[20].mxu0 }
 0x353   : > { %v1880_v27 = vpop.f32.mrb[21].mxu0 }
 0x354   : > { %v1881_v28 = vadd.f32 %v1880_v27, %v1879_v24  ;;  %v1882_v29 = vpop.f32.mrb[22].mxu0  ;;  %v1146_v30 = vpack.c.bf16 %v1135_v23, %v1134_v22 }
 0x355   : > { %v1883_v31 = vpop.f32.mrb[23].mxu0 }
 0x356   : > { %v1104_v32 = vmul.f32 0.9, %v1881_v28  ;;  %v1884_v34 = vadd.f32 %v1883_v31, %v1882_v29  ;;  %1969 = vmatprep.mubr.bf16.mxu1 %v1146_v30 }
 0x358   : > { %v1105_v37 = vmul.f32 0.9, %v1884_v34  ;;  %v1136_v38 = vadd.f32 %v1120_v33, %v1104_v32 }
 0x35a   : > { %v1137_v39 = vadd.f32 %v1121_v35, %v1105_v37  ;;  %v1885_v40 = vpop.f32.mrb[24].mxu0 }
 0x35b   : > { %v1886_v43 = vpop.f32.mrb[25].mxu0 }
 0x35c   : > { %v1887_v44 = vadd.f32 %v1886_v43, %v1885_v40  ;;  %v1888_v45 = vpop.f32.mrb[26].mxu0  ;;  %v1147_v46 = vpack.c.bf16 %v1137_v39, %v1136_v38 }
 0x35d   : > { %v1889_v47 = vpop.f32.mrb[27].mxu0 }
 0x35e   : > { %v1106_v48 = vmul.f32 0.9, %v1887_v44  ;;  %v1890_v50 = vadd.f32 %v1889_v47, %v1888_v45  ;;  %1970 = vmatmul.mubr.bf16.gmra.mrb[8].mxu1 %v1147_v46 }
 0x360   : > { %v1107_v53 = vmul.f32 0.9, %v1890_v50  ;;  %v1138_v54 = vadd.f32 %v1122_v49, %v1106_v48 }
 0x362   : > { %v1139_v55 = vadd.f32 %v1123_v51, %v1107_v53  ;;  %v1891_v56 = vpop.f32.mrb[28].mxu0 }
 0x363   : > { %v1892_v59 = vpop.f32.mrb[29].mxu0 }
 0x364   : > { %v1893_v60 = vadd.f32 %v1892_v59, %v1891_v56  ;;  %v1894_v61 = vpop.f32.mrb[30].mxu0  ;;  %v1148_v62 = vpack.c.bf16 %v1139_v55, %v1138_v54 }
 0x365   : > { %v1895_v63 = vpop.f32.mrb[31].mxu0 }
 0x366   : > { %v1108_v0 = vmul.f32 0.9, %v1893_v60  ;;  %v1896_v2 = vadd.f32 %v1895_v63, %v1894_v61  ;;  %1973 = vmatprep.mubr.bf16.mxu1 %v1148_v62 }
 0x368   : > { %v1109_v4 = vmul.f32 0.9, %v1896_v2  ;;  %v1140_v5 = vadd.f32 %v1124_v1, %v1108_v0 }
 0x36a   : > { %v1141_v6 = vadd.f32 %v1125_v3, %v1109_v4 }
 0x36c   : > { %v1149_v7 = vpack.c.bf16 %v1141_v6, %v1140_v5 }
 0x36e   : > { %1974 = vmatmul.mubr.bf16.gmra.mrb[12].mxu1 %v1149_v7 }
 0x411   : > { %v1963_v8 = vpop.f32.mrb[0].mxu1 }
 0x412   : > { %2129 = vtanh.f32 %v1963_v8  ;;  %v1248_v9 = vpop.f32.mrb[1].mxu1 }
 0x413   : > { %2131 = vtanh.f32 %v1248_v9  ;;  %v1964_v11 = vpop.f32.mrb[2].mxu1 }
 0x414   : > { %2133 = vtanh.f32 %v1964_v11  ;;  %v1251_v12 = vpop.f32.mrb[3].mxu1 }
 0x415   : > { %2135 = vtanh.f32 %v1251_v12 }
 0x41c   : > { %v2504_v14 = vpop.eup %2129 }
 0x41d   : > { %v2506_v15 = vpop.eup %2131  ;;  %v1332_v16 = vsel %vm1329_vm0, %v2504_v14, -1e+30 }
 0x41e   : > { %v2511_v17 = vpop.eup %2133  ;;  %1350 = vmax.xlane.f32.xlu1 %v1332_v16  ;;  %v1330_v18 = vsel %vm1329_vm0, %v2506_v15, -1e+30 }
 0x41f   : > { %v2516_v19 = vpop.eup %2135  ;;  %1346 = vmax.xlane.f32.xlu0 %v1330_v18  ;;  %v1333_v21 = vsel %vm1329_vm0, %v2511_v17, -1e+30 }
 0x420   : > { %v1331_v23 = vsel %vm1329_vm0, %v2516_v19, -1e+30 }
 0x421   : > { %v1967_v20 = vpop.f32.mrb[4].mxu1 }
 0x422   : > { %2137 = vtanh.f32 %v1967_v20  ;;  %1352 = vmax.xlane.f32.xlu1 %v1333_v21  ;;  %v1264_v22 = vpop.f32.mrb[5].mxu1 }
 0x423   : > { %2139 = vtanh.f32 %v1264_v22  ;;  %1348 = vmax.xlane.f32.xlu0 %v1331_v23  ;;  %v1968_v24 = vpop.f32.mrb[6].mxu1 }
 0x424   : > { %2141 = vtanh.f32 %v1968_v24  ;;  %v1267_v25 = vpop.f32.mrb[7].mxu1 }
 0x425   : > { %2143 = vtanh.f32 %v1267_v25 }
 0x42c   : > { %v2524_v26 = vpop.eup %2137 }
 0x42d   : > { %v2526_v27 = vpop.eup %2139  ;;  %v1336_v28 = vsel %vm1329_vm0, %v2524_v26, -1e+30 }
 0x42e   : > { %v2531_v29 = vpop.eup %2141  ;;  %1358 = vmax.xlane.f32.xlu0 %v1336_v28  ;;  %v1334_v33 = vsel %vm1329_vm0, %v2526_v27, -1e+30 }
 0x42f   : > { %v1337_v30 = vsel %vm1329_vm0, %v2531_v29, -1e+30  ;;  %v2536_v31 = vpop.eup %2143 }
 0x430   : > { %1360 = vmax.xlane.f32.xlu1 %v1337_v30  ;;  %v1335_v36 = vsel %vm1329_vm0, %v2536_v31, -1e+30 }
 0x431   : > { %v1971_v32 = vpop.f32.mrb[8].mxu1 }
 0x432   : > { %2145 = vtanh.f32 %v1971_v32  ;;  %1354 = vmax.xlane.f32.xlu0 %v1334_v33  ;;  %v1280_v34 = vpop.f32.mrb[9].mxu1 }
 0x433   : > { %2147 = vtanh.f32 %v1280_v34  ;;  %v1972_v35 = vpop.f32.mrb[10].mxu1 }
 0x434   : > { %2149 = vtanh.f32 %v1972_v35  ;;  %1356 = vmax.xlane.f32.xlu1 %v1335_v36  ;;  %v1283_v37 = vpop.f32.mrb[11].mxu1 }
 0x435   : > { %2151 = vtanh.f32 %v1283_v37 }
 0x43c   : > { %v2544_v38 = vpop.eup %2145 }
 0x43d   : > { %v2546_v39 = vpop.eup %2147  ;;  %v1340_v40 = vsel %vm1329_vm0, %v2544_v38, -1e+30 }
 0x43e   : > { %v2551_v41 = vpop.eup %2149  ;;  %1366 = vmax.xlane.f32.xlu0 %v1340_v40  ;;  %v1338_v45 = vsel %vm1329_vm0, %v2546_v39, -1e+30 }
 0x43f   : > { %v1341_v42 = vsel %vm1329_vm0, %v2551_v41, -1e+30  ;;  %v2556_v43 = vpop.eup %2151 }
 0x440   : > { %1368 = vmax.xlane.f32.xlu1 %v1341_v42  ;;  %v1339_v48 = vsel %vm1329_vm0, %v2556_v43, -1e+30 }
 0x441   : > { %v1975_v44 = vpop.f32.mrb[12].mxu1 }
 0x442   : > { %1362 = vmax.xlane.f32.xlu0 %v1338_v45  ;;  %v1296_v46 = vpop.f32.mrb[13].mxu1 }
 0x443   : > { %2153 = vtanh.f32 %v1296_v46  ;;  %v1976_v47 = vpop.f32.mrb[14].mxu1 }
 0x444   : > { %2155 = vtanh.f32 %v1975_v44  ;;  %1364 = vmax.xlane.f32.xlu1 %v1339_v48  ;;  %v1299_v49 = vpop.f32.mrb[15].mxu1 }
 0x445   : > { %2157 = vtanh.f32 %v1299_v49 }
 0x446   : > { %2159 = vtanh.f32 %v1976_v47 }
 0x44d   : > { %v2564_v50 = vpop.eup %2153 }
 0x44e   : > { %v2566_v51 = vpop.eup %2155  ;;  %v1342_v52 = vsel %vm1329_vm0, %v2564_v50, -1e+30 }
 0x44f   : > { %v2571_v53 = vpop.eup %2157  ;;  %1370 = vmax.xlane.f32.xlu0 %v1342_v52  ;;  %v1344_v56 = vsel %vm1329_vm0, %v2566_v51, -1e+30 }
 0x450   : > { %v1343_v54 = vsel %vm1329_vm0, %v2571_v53, -1e+30  ;;  %v2576_v55 = vpop.eup %2159 }
 0x451   : > { %1372 = vmax.xlane.f32.xlu1 %v1343_v54  ;;  %v1345_v57 = vsel %vm1329_vm0, %v2576_v55, -1e+30 }
 0x453   : > { %1374 = vmax.xlane.f32.xlu0 %v1344_v56 }
 0x455   : > { %1376 = vmax.xlane.f32.xlu1 %v1345_v57 }
 0x4ab   : > { %v2584_v58 = vpop.xlane.xlu1 %1350 }
 0x4ac   : > { %v1380_v59 = vsub.f32 %v2504_v14, %v2584_v58  ;;  %v2588_v60 = vpop.xlane.xlu0 %1346 }
 0x4ad   : > { %v1378_v61 = vsub.f32 %v2506_v15, %v2588_v60 }
 0x4ae   : > { %v1398_v62 = vmul.f32 1.442695, %v1380_v59 }
 0x4af   : > { %v1394_v63 = vmul.f32 1.442695, %v1378_v61  ;;  %v2592_v0 = vpop.xlane.xlu1 %1352 }
 0x4b0   : > { %2161 = vpow2.f32 %v1398_v62  ;;  %v1381_v1 = vsub.f32 %v2511_v17, %v2592_v0  ;;  %v2596_v2 = vpop.xlane.xlu0 %1348 }
 0x4b1   : > { %v1379_v3 = vsub.f32 %v2516_v19, %v2596_v2  ;;  %2163 = vpow2.f32 %v1394_v63 }
 0x4b2   : > { %v1400_v4 = vmul.f32 1.442695, %v1381_v1 }
 0x4b3   : > { %v1396_v5 = vmul.f32 1.442695, %v1379_v3 }
 0x4b4   : > { %2165 = vpow2.f32 %v1400_v4 }
 0x4b5   : > { %2167 = vpow2.f32 %v1396_v5 }
 0x4ba   : > { %v2162_v6 = vpop.eup %2161 }
 0x4bb   : > { %v2600_v7 = vpop.xlane.xlu0 %1358  ;;  %v1428_v8 = vsel %vm1329_vm0, %v2162_v6, 0.0  ;;  %v2164_v9 = vpop.eup %2163 }
 0x4bc   : > { %v1384_v10 = vsub.f32 %v2524_v26, %v2600_v7  ;;  %1446 = vadd.xlane.f32.xlu0 %v1428_v8  ;;  %v1426_v21 = vsel %vm1329_vm0, %v2164_v9, 0.0 }
 0x4bd   : > { %v2606_v11 = vpop.xlane.xlu1 %1360 }
 0x4be   : > { %v2166_v12 = vpop.eup %2165  ;;  %v1406_v16 = vmul.f32 1.442695, %v1384_v10  ;;  %v1385_v18 = vsub.f32 %v2531_v29, %v2606_v11 }
 0x4bf   : > { %v2610_v20 = vpop.xlane.xlu0 %1354  ;;  %v1429_v22 = vsel %vm1329_vm0, %v2166_v12, 0.0  ;;  %v2168_v23 = vpop.eup %2167 }
 0x4c0   : > { %2169 = vpow2.f32 %v1406_v16  ;;  %v1408_v24 = vmul.f32 1.442695, %v1385_v18  ;;  %v1382_v25 = vsub.f32 %v2526_v27, %v2610_v20  ;;  %1442 = vadd.xlane.f32.xlu0 %v1426_v21  ;;  %1448 = vadd.xlane.f32.xlu1 %v1429_v22  ;;  %v1427_v33 = vsel %vm1329_vm0, %v2168_v23, 0.0 }
 0x4c1   : > { %v2618_v28 = vpop.xlane.xlu1 %1356 }
 0x4c2   : > { %2171 = vpow2.f32 %v1408_v24  ;;  %v1402_v30 = vmul.f32 1.442695, %v1382_v25  ;;  %v1383_v32 = vsub.f32 %v2536_v31, %v2618_v28 }
 0x4c4   : > { %2173 = vpow2.f32 %v1402_v30  ;;  %v1404_v34 = vmul.f32 1.442695, %v1383_v32  ;;  %1444 = vadd.xlane.f32.xlu1 %v1427_v33 }
 0x4c6   : > { %2175 = vpow2.f32 %v1404_v34 }
 0x4ca   : > { %v2170_v35 = vpop.eup %2169 }
 0x4cb   : > { %v2624_v36 = vpop.xlane.xlu0 %1366  ;;  %v1432_v37 = vsel %vm1329_vm0, %v2170_v35, 0.0 }
 0x4cc   : > { %v2172_v40 = vpop.eup %2171  ;;  %v1388_v42 = vsub.f32 %v2544_v38, %v2624_v36  ;;  %1454 = vadd.xlane.f32.xlu0 %v1432_v37 }
 0x4cd   : > { %v2630_v44 = vpop.xlane.xlu1 %1368  ;;  %v1433_v45 = vsel %vm1329_vm0, %v2172_v40, 0.0 }
 0x4ce   : > { %v2174_v46 = vpop.eup %2173  ;;  %v1414_v47 = vmul.f32 1.442695, %v1388_v42  ;;  %v1389_v48 = vsub.f32 %v2551_v41, %v2630_v44  ;;  %1456 = vadd.xlane.f32.xlu1 %v1433_v45 }
 0x4cf   : > { %v2636_v49 = vpop.xlane.xlu0 %1362  ;;  %v1430_v52 = vsel %vm1329_vm0, %v2174_v46, 0.0 }
 0x4d0   : > { %v2176_v54 = vpop.eup %2175  ;;  %2177 = vpow2.f32 %v1414_v47  ;;  %v1416_v56 = vmul.f32 1.442695, %v1389_v48  ;;  %v1386_v57 = vsub.f32 %v2546_v39, %v2636_v49  ;;  %1450 = vadd.xlane.f32.xlu0 %v1430_v52 }
 0x4d1   : > { %v2642_v59 = vpop.xlane.xlu1 %1364  ;;  %v1431_v61 = vsel %vm1329_vm0, %v2176_v54, 0.0 }
 0x4d2   : > { %2179 = vpow2.f32 %v1416_v56  ;;  %v1410_v62 = vmul.f32 1.442695, %v1386_v57  ;;  %v1387_v63 = vsub.f32 %v2556_v43, %v2642_v59  ;;  %1452 = vadd.xlane.f32.xlu1 %v1431_v61 }
 0x4d4   : > { %2181 = vpow2.f32 %v1410_v62  ;;  %v1412_v1 = vmul.f32 1.442695, %v1387_v63 }
 0x4d6   : > { %2183 = vpow2.f32 %v1412_v1 }
 0x4da   : > { %v2178_v3 = vpop.eup %2177 }
 0x4db   : > { %v1436_v4 = vsel %vm1329_vm0, %v2178_v3, 0.0 }
 0x4dc   : > { %v2180_v5 = vpop.eup %2179  ;;  %1462 = vadd.xlane.f32.xlu0 %v1436_v4  ;;  %v2650_v6 = vpop.xlane.xlu0 %1370 }
 0x4dd   : > { %v1390_v8 = vsub.f32 %v2564_v50, %v2650_v6  ;;  %v1437_v9 = vsel %vm1329_vm0, %v2180_v5, 0.0 }
 0x4de   : > { %v2182_v10 = vpop.eup %2181  ;;  %1464 = vadd.xlane.f32.xlu1 %v1437_v9  ;;  %v2656_v12 = vpop.xlane.xlu1 %1372 }
 0x4df   : > { %v1418_v16 = vmul.f32 1.442695, %v1390_v8  ;;  %v1391_v18 = vsub.f32 %v2571_v53, %v2656_v12  ;;  %v1434_v21 = vsel %vm1329_vm0, %v2182_v10, 0.0 }
 0x4e0   : > { %v2184_v22 = vpop.eup %2183  ;;  %1458 = vadd.xlane.f32.xlu0 %v1434_v21  ;;  %v2662_v23 = vpop.xlane.xlu0 %1374 }
 0x4e1   : > { %2185 = vpow2.f32 %v1418_v16  ;;  %v1420_v24 = vmul.f32 1.442695, %v1391_v18  ;;  %v1392_v25 = vsub.f32 %v2566_v51, %v2662_v23  ;;  %v1435_v30 = vsel %vm1329_vm0, %v2184_v22, 0.0 }
 0x4e2   : > { %1460 = vadd.xlane.f32.xlu1 %v1435_v30  ;;  %v2668_v32 = vpop.xlane.xlu1 %1376 }
 0x4e3   : > { %2187 = vpow2.f32 %v1420_v24  ;;  %v1422_v33 = vmul.f32 1.442695, %v1392_v25  ;;  %v1393_v34 = vsub.f32 %v2576_v55, %v2668_v32 }
 0x4e5   : > { %2189 = vpow2.f32 %v1422_v33  ;;  %v1424_v35 = vmul.f32 1.442695, %v1393_v34 }
 0x4e7   : > { %2191 = vpow2.f32 %v1424_v35 }
 0x4eb   : > { %v2186_v37 = vpop.eup %2185 }
 0x4ec   : > { %v1438_v40 = vsel %vm1329_vm0, %v2186_v37, 0.0 }
 0x4ed   : > { %v2188_v42 = vpop.eup %2187  ;;  %1466 = vadd.xlane.f32.xlu0 %v1438_v40 }
 0x4ee   : > { %v1439_v45 = vsel %vm1329_vm0, %v2188_v42, 0.0 }
 0x4ef   : > { %v2190_v46 = vpop.eup %2189  ;;  %1468 = vadd.xlane.f32.xlu1 %v1439_v45 }
 0x4f0   : > { %v1440_v47 = vsel %vm1329_vm0, %v2190_v46, 0.0 }
 0x4f1   : > { %v2192_v48 = vpop.eup %2191  ;;  %1470 = vadd.xlane.f32.xlu0 %v1440_v47 }
 0x4f2   : > { %v1441_v52 = vsel %vm1329_vm0, %v2192_v48, 0.0 }
 0x4f3   : > { %1472 = vadd.xlane.f32.xlu1 %v1441_v52 }
 0x549   : > { %v1447_v54 = vpop.xlane.xlu0 %1446 }
 0x54a   : > { %2193 = vlog2.f32 %v1447_v54 }
 0x54d   : > { %v1443_v56 = vpop.xlane.xlu0 %1442  ;;  %v1449_v57 = vpop.xlane.xlu1 %1448 }
 0x54e   : > { %2195 = vlog2.f32 %v1443_v56 }
 0x54f   : > { %2197 = vlog2.f32 %v1449_v57 }
 0x551   : > { %v1445_v61 = vpop.xlane.xlu1 %1444 }
 0x552   : > { %2199 = vlog2.f32 %v1445_v61 }
 0x554   : > { %v2194_v62 = vpop.eup %2193 }
 0x555   : > { %v1479_v63 = vmul.f32 0.6931472, %v2194_v62 }
 0x557   : > { %v1508_v1 = vadd.f32 %v1479_v63, %v2584_v58 }
 0x558   : > { %v2196_v3 = vpop.eup %2195 }
 0x559   : > { %v2198_v4 = vpop.eup %2197  ;;  %v1524_v5 = vsub.f32 %v2504_v14, %v1508_v1  ;;  %v1475_v13 = vmul.f32 0.6931472, %v2196_v3  ;;  %v1455_v8 = vpop.xlane.xlu0 %1454 }
 0x55a   : > { %v1481_v9 = vmul.f32 0.6931472, %v2198_v4  ;;  %2201 = vlog2.f32 %v1455_v8 }
 0x55b   : > { %1540 = vst [vmem:[%s2333_s7 + $0x10] sm:$0xff] %v1524_v5  ;;  %v1506_v10 = vadd.f32 %v1475_v13, %v2588_v60  ;;  %v1457_v16 = vpop.xlane.xlu1 %1456 }
 0x55c   : > { %v2200_v18 = vpop.eup %2199  ;;  %v1509_v21 = vadd.f32 %v1481_v9, %v2592_v0  ;;  %2203 = vlog2.f32 %v1457_v16 }
 0x55d   : > { %v1522_v58 = vsub.f32 %v2506_v15, %v1506_v10  ;;  %v1477_v22 = vmul.f32 0.6931472, %v2200_v18  ;;  %v1451_v24 = vpop.xlane.xlu0 %1450 }
 0x55e   : > { %v1525_v14 = vsub.f32 %v2511_v17, %v1509_v21  ;;  %2205 = vlog2.f32 %v1451_v24 }
 0x55f   : > { %1538 = vst [vmem:[%s2333_s7] sm:$0xff] %v1522_v58  ;;  %v1507_v25 = vadd.f32 %v1477_v22, %v2596_v2  ;;  %v1453_v30 = vpop.xlane.xlu1 %1452 }
 0x560   : > { %1541 = vst [vmem:[%s2333_s7 + $0x18] sm:$0xff] %v1525_v14  ;;  %2207 = vlog2.f32 %v1453_v30 }
 0x561   : > { %v1523_v60 = vsub.f32 %v2516_v19, %v1507_v25 }
 0x563   : > { %1539 = vst [vmem:[%s2333_s7 + $0x8] sm:$0xff] %v1523_v60 }
 0x564   : > { %v2202_v33 = vpop.eup %2201 }
 0x565   : > { %v1487_v0 = vmul.f32 0.6931472, %v2202_v33 }
 0x566   : > { %v2204_v34 = vpop.eup %2203 }
 0x567   : > { %v1512_v15 = vadd.f32 %v1487_v0, %v2600_v7  ;;  %v1489_v35 = vmul.f32 0.6931472, %v2204_v34 }
 0x568   : > { %v2206_v37 = vpop.eup %2205 }
 0x569   : > { %v1528_v17 = vsub.f32 %v2524_v26, %v1512_v15  ;;  %v1513_v40 = vadd.f32 %v1489_v35, %v2606_v11  ;;  %v1483_v2 = vmul.f32 0.6931472, %v2206_v37  ;;  %v1463_v42 = vpop.xlane.xlu0 %1462 }
 0x56a   : > { %v2208_v45 = vpop.eup %2207  ;;  %2209 = vlog2.f32 %v1463_v42 }
 0x56b   : > { %1544 = vst [vmem:[%s2333_s7 + $0x30] sm:$0xff] %v1528_v17  ;;  %v1529_v19 = vsub.f32 %v2531_v29, %v1513_v40  ;;  %v1510_v46 = vadd.f32 %v1483_v2, %v2610_v20  ;;  %v1485_v47 = vmul.f32 0.6931472, %v2208_v45  ;;  %v1465_v48 = vpop.xlane.xlu1 %1464 }
 0x56c   : > { %2211 = vlog2.f32 %v1465_v48 }
 0x56d   : > { %1545 = vst [vmem:[%s2333_s7 + $0x38] sm:$0xff] %v1529_v19  ;;  %v1526_v7 = vsub.f32 %v2526_v27, %v1510_v46  ;;  %v1511_v26 = vadd.f32 %v1485_v47, %v2618_v28  ;;  %v1459_v11 = vpop.xlane.xlu0 %1458 }
 0x56e   : > { %2213 = vlog2.f32 %v1459_v11 }
 0x56f   : > { %1542 = vst [vmem:[%s2333_s7 + $0x20] sm:$0xff] %v1526_v7  ;;  %v1527_v52 = vsub.f32 %v2536_v31, %v1511_v26  ;;  %v1461_v54 = vpop.xlane.xlu1 %1460 }
 0x570   : > { %2215 = vlog2.f32 %v1461_v54 }
 0x571   : > { %1543 = vst [vmem:[%s2333_s7 + $0x28] sm:$0xff] %v1527_v52 }
 0x574   : > { %v2210_v29 = vpop.eup %2209 }
 0x575   : > { %v1495_v56 = vmul.f32 0.6931472, %v2210_v29 }
 0x576   : > { %v2212_v20 = vpop.eup %2211 }
 0x577   : > { %v1516_v57 = vadd.f32 %v1495_v56, %v2624_v36  ;;  %v1497_v61 = vmul.f32 0.6931472, %v2212_v20 }
 0x578   : > { %v2214_v62 = vpop.eup %2213 }
 0x579   : > { %v1532_v27 = vsub.f32 %v2544_v38, %v1516_v57  ;;  %v1517_v28 = vadd.f32 %v1497_v61, %v2630_v44  ;;  %v1491_v63 = vmul.f32 0.6931472, %v2214_v62 }
 0x57a   : > { %v2216_v1 = vpop.eup %2215  ;;  %v1467_v3 = vpop.xlane.xlu0 %1466 }
 0x57b   : > { %1548 = vst [vmem:[%s2333_s7 + $0x50] sm:$0xff] %v1532_v27  ;;  %v1533_v31 = vsub.f32 %v2551_v41, %v1517_v28  ;;  %v1514_v4 = vadd.f32 %v1491_v63, %v2636_v49  ;;  %v1493_v5 = vmul.f32 0.6931472, %v2216_v1  ;;  %2217 = vlog2.f32 %v1467_v3 }
 0x57c   : > { %v1469_v13 = vpop.xlane.xlu1 %1468 }
 0x57d   : > { %1549 = vst [vmem:[%s2333_s7 + $0x58] sm:$0xff] %v1533_v31  ;;  %v1530_v36 = vsub.f32 %v2546_v39, %v1514_v4  ;;  %v1515_v38 = vadd.f32 %v1493_v5, %v2642_v59  ;;  %2219 = vlog2.f32 %v1469_v13 }
 0x57e   : > { %v1471_v8 = vpop.xlane.xlu0 %1470 }
 0x57f   : > { %1546 = vst [vmem:[%s2333_s7 + $0x40] sm:$0xff] %v1530_v36  ;;  %v1531_v44 = vsub.f32 %v2556_v43, %v1515_v38  ;;  %2221 = vlog2.f32 %v1471_v8 }
 0x580   : > { %v1473_v9 = vpop.xlane.xlu1 %1472 }
 0x581   : > { %1547 = vst [vmem:[%s2333_s7 + $0x48] sm:$0xff] %v1531_v44  ;;  %2223 = vlog2.f32 %v1473_v9 }
 0x585   : > { %v2218_v41 = vpop.eup %2217 }
 0x586   : > { %v1499_v49 = vmul.f32 0.6931472, %v2218_v41 }
 0x587   : > { %v2220_v10 = vpop.eup %2219 }
 0x588   : > { %v1518_v16 = vadd.f32 %v1499_v49, %v2650_v6  ;;  %v1501_v39 = vmul.f32 0.6931472, %v2220_v10 }
 0x589   : > { %v2222_v59 = vpop.eup %2221 }
 0x58a   : > { %v1534_v18 = vsub.f32 %v2564_v50, %v1518_v16  ;;  %v1519_v21 = vadd.f32 %v1501_v39, %v2656_v12  ;;  %v1503_v58 = vmul.f32 0.6931472, %v2222_v59 }
 0x58b   : > { %v2224_v43 = vpop.eup %2223 }
 0x58c   : > { %1550 = vst [vmem:[%s2333_s7 + $0x60] sm:$0xff] %v1534_v18  ;;  %v1535_v22 = vsub.f32 %v2571_v53, %v1519_v21  ;;  %v1520_v24 = vadd.f32 %v1503_v58, %v2662_v23  ;;  %v1505_v14 = vmul.f32 0.6931472, %v2224_v43 }
 0x58e   : > { %1551 = vst [vmem:[%s2333_s7 + $0x68] sm:$0xff] %v1535_v22  ;;  %v1536_v25 = vsub.f32 %v2566_v51, %v1520_v24  ;;  %v1521_v6 = vadd.f32 %v1505_v14, %v2668_v32 }
 0x590   : > { %1552 = vst [vmem:[%s2333_s7 + $0x70] sm:$0xff] %v1536_v25  ;;  %v1537_v30 = vsub.f32 %v2576_v55, %v1521_v6 }
 0x592   : > { %1553 = vst [vmem:[%s2333_s7 + $0x78] sm:$0xff] %v1537_v30 }
 0x593 PF: > { %s14_s19 = sadd.s32 1, %s2263_s19   ;;  %s2748_s15 = smov %s2255_s17 }
 0x594   : > { %p11_p9 = scmp.ge.s32.totalorder %s14_s19, 6   ;;  %s2749_s16 = smov %s2259_s18 }
 0x595   : > { %s2750_s17 = smov %s2753_s20  ;;  %s2751_s18 = smov %s2757_s21 }
 0x596   :  { %13 = sbr.rel (!%p11_p9) target bundleno = 3 (0x3), region = 77 }

</bundles_post_ra>
